<compile_context>
chip_gen: v6e
topology: v6e:2x2x1
jax: 0.10.0
libtpu: 0.0.40
codegen_flags: <defaults>
</compile_context>

<pallas_src>
from functools import partial

import jax
import jax.numpy as jnp
from jax import lax
from jax.experimental import pallas as pl
from jax.experimental.pallas import tpu as pltpu


# ----------------------------- fused kernel -------------------------------- #

def down_fused_kernel(x_ref, w1_ref, b1_ref, w2_ref, b2_ref, o_ref,
                      xpad1, xpad2):
    # x_ref : (B, H, W, Cin)           B images (NHWC tile), compute dtype
    # w1_ref: (9, Cin, C1p)            per-tap weights, BN scale folded in
    # b1_ref: (1, C1p)   f32           folded conv-bias + BN bias
    # w2_ref: (9, C1p, C2p)
    # b2_ref: (1, C2p)   f32
    # o_ref : (B, Ho*Wo, C2p)  f32     lane-dense flattened-spatial output
    # xpad1 : VMEM (B, Ho+2, Wo+2, Cin)  zero-bordered pooled input (scratch)
    # xpad2 : VMEM (B, Ho+2, Wo+2, C1p)  zero-bordered conv1 output (scratch)
    B, H, W, Cin = x_ref.shape
    Ho, Wo = H // 2, W // 2
    C1p = w1_ref.shape[-1]
    C2p = w2_ref.shape[-1]
    M = B * Ho * Wo
    cdt = xpad1.dtype

    # ---- MaxPool2d(2) ----
    # Split H via a free leading-dim reshape; only W (already halved in H)
    # needs a sublane-splitting reshape.
    x = x_ref[...]                                        # (B, H, W, Cin)
    xh = x.reshape(B, Ho, 2, W, Cin)
    xh = jnp.maximum(xh[:, :, 0], xh[:, :, 1])            # (B, Ho, W, Cin)
    xw = xh.reshape(B, Ho, Wo, 2, Cin)
    pooled = jnp.maximum(xw[:, :, :, 0], xw[:, :, :, 1])  # (B, Ho, Wo, Cin)

    def conv3x3_bn_relu(xpad_ref, interior, w_ref, b_ref):
        cin = xpad_ref.shape[-1]
        cout = w_ref.shape[-1]
        # Zero only the 1-px halo border (interior fully overwritten below);
        # done every step so it is correct even when the batch axis is split
        # across TensorCores (each core has its own scratch).
        xpad_ref[:, 0:1, :, :] = jnp.zeros((B, 1, Wo + 2, cin), cdt)
        xpad_ref[:, Ho + 1:Ho + 2, :, :] = jnp.zeros((B, 1, Wo + 2, cin), cdt)
        xpad_ref[:, :, 0:1, :] = jnp.zeros((B, Ho + 2, 1, cin), cdt)
        xpad_ref[:, :, Wo + 1:Wo + 2, :] = jnp.zeros((B, Ho + 2, 1, cin), cdt)
        xpad_ref[:, 1:Ho + 1, 1:Wo + 1, :] = interior.astype(cdt)
        # TODO(synk): the interior store/reload through VMEM could be removed
        # entirely with 9 edge-masked dots on the unpadded tensor.
        xp = xpad_ref[...]                                # (B, Ho+2, Wo+2, cin)

        # 9 accumulating shifted dots (no im2col patch matrix).
        acc = None
        for dy in range(3):
            for dx in range(3):
                a = xp[:, dy:dy + Ho, dx:dx + Wo, :].reshape(M, cin)
                c = jnp.dot(a, w_ref[dy * 3 + dx],
                            preferred_element_type=jnp.float32)
                acc = c if acc is None else acc + c
        # BN scale is folded into the weights; bias-add + ReLU in f32.
        return jnp.maximum(acc + b_ref[...], 0.0)         # (M, cout) f32

    y1 = conv3x3_bn_relu(xpad1, pooled, w1_ref, b1_ref)               # (M, C1p)
    y2 = conv3x3_bn_relu(xpad2, y1.reshape(B, Ho, Wo, C1p),
                         w2_ref, b2_ref)                              # (M, C2p)
    o_ref[...] = y2.reshape(B, Ho * Wo, C2p).astype(o_ref.dtype)


# ------------------------------ wrapper ------------------------------------- #

def _round_up(v, m):
    return ((v + m - 1) // m) * m


def _pick_batch_tile(n, rows_per_image):
    """Batch images per grid step so the MXU M-dim gets ~256 rows."""
    bt = max(1, min(n, -(-256 // rows_per_image)))
    while n % bt:
        bt -= 1
    return bt


def _fold_conv_bn(w_oihw, conv_b, gamma, beta, mean, var,
                  cin_pad, cout_pad, eps, cdt):
    """Fold eval-mode BN + conv bias into a (9, cin_pad, cout_pad) weight
    (BN scale folded in, taps ordered (ky, kx)) and a (1, cout_pad) f32 bias.
    Padded channels carry zero weights / zero bias."""
    cout, cin = w_oihw.shape[0], w_oihw.shape[1]
    scale = gamma * lax.rsqrt(var + eps)                       # (Cout,)
    bias = (conv_b - mean) * scale + beta                      # (Cout,)
    w = jnp.transpose(w_oihw, (2, 3, 1, 0)).reshape(9, cin, cout)
    w = w * scale[None, None, :]
    w = jnp.pad(w, ((0, 0), (0, cin_pad - cin), (0, cout_pad - cout)))
    b = jnp.pad(bias, (0, cout_pad - cout)).reshape(1, cout_pad)
    return w.astype(cdt), b.astype(jnp.float32)


@partial(jax.jit, static_argnames=("compute_dtype",))
def down_forward(x_nchw, params, compute_dtype=jnp.bfloat16):
    """Full Down block. NCHW in / NCHW out to match the PyTorch module."""
    N, Cin, H, W = x_nchw.shape
    # TODO(synk): PyTorch MaxPool2d(2) floors odd spatial dims; not handled.
    assert H % 2 == 0 and W % 2 == 0, "even spatial dims required"
    Ho, Wo = H // 2, W // 2
    C1 = params["w1"].shape[0]
    C2 = params["w2"].shape[0]
    C1p = _round_up(C1, 128)           # lane-dense intermediate / MXU K of conv2
    C2p = _round_up(C2, 128)           # lane-dense output stores
    eps = 1e-5

    w1, b1 = _fold_conv_bn(params["w1"], params["b1"], params["g1"],
                           params["be1"], params["m1"], params["v1"],
                           Cin, C1p, eps, compute_dtype)
    w2, b2 = _fold_conv_bn(params["w2"], params["b2"], params["g2"],
                           params["be2"], params["m2"], params["v2"],
                           C1p, C2p, eps, compute_dtype)

    # NCHW -> NHWC glue; activations cast to the (bf16) compute dtype.
    x_nhwc = jnp.transpose(x_nchw, (0, 2, 3, 1)).astype(compute_dtype)

    bt = _pick_batch_tile(N, Ho * Wo)
    grid = (N // bt,)

    act_bytes = jnp.finfo(compute_dtype).bits // 8
    flops = 2 * N * Ho * Wo * 9 * (Cin * C1p + C1p * C2p)
    bytes_accessed = ((N * H * W * Cin + 9 * Cin * C1p + 9 * C1p * C2p)
                      * act_bytes + N * Ho * Wo * C2p * 4)

    out_flat = pl.pallas_call(
        down_fused_kernel,
        out_shape=jax.ShapeDtypeStruct((N, Ho * Wo, C2p), jnp.float32),
        grid=grid,
        in_specs=[
            pl.BlockSpec((bt, H, W, Cin), lambda n: (n, 0, 0, 0)),
            pl.BlockSpec((9, Cin, C1p), lambda n: (0, 0, 0)),
            pl.BlockSpec((1, C1p), lambda n: (0, 0)),
            pl.BlockSpec((9, C1p, C2p), lambda n: (0, 0, 0)),
            pl.BlockSpec((1, C2p), lambda n: (0, 0)),
        ],
        out_specs=pl.BlockSpec((bt, Ho * Wo, C2p), lambda n: (n, 0, 0)),
        scratch_shapes=[
            pltpu.VMEM((bt, Ho + 2, Wo + 2, Cin), compute_dtype),
            pltpu.VMEM((bt, Ho + 2, Wo + 2, C1p), compute_dtype),
        ],
        compiler_params=pltpu.CompilerParams(
            dimension_semantics=("parallel",),           # batch axis -> 2 TCs
            vmem_limit_bytes=48 * 1024 * 1024),          # < v7x 64 MiB physical
        cost_estimate=pl.CostEstimate(flops=flops, transcendentals=0,
                                      bytes_accessed=bytes_accessed),
    )(x_nhwc, w1, b1, w2, b2)

    out = out_flat[:, :, :C2].reshape(N, Ho, Wo, C2)     # strip channel padding
    return jnp.transpose(out, (0, 3, 1, 2))              # NHWC -> NCHW glue


# ------------------------------ reference ----------------------------------- #

def ref_down_forward(x, params, eps=1e-5):
    def bn_relu(y, g, b, m, v):
        y = (y - m[None, :, None, None]) / jnp.sqrt(v + eps)[None, :, None, None]
        y = y * g[None, :, None, None] + b[None, :, None, None]
        return jnp.maximum(y, 0.0)

    p = lax.reduce_window(x, -jnp.inf, lax.max, (1, 1, 2, 2), (1, 1, 2, 2),
                          "VALID")
    dn = ("NCHW", "OIHW", "NCHW")
    y = lax.conv_general_dilated(p, params["w1"], (1, 1), "SAME",
                                 dimension_numbers=dn)
    y = y + params["b1"][None, :, None, None]
    y = bn_relu(y, params["g1"], params["be1"], params["m1"], params["v1"])
    y = lax.conv_general_dilated(y, params["w2"], (1, 1), "SAME",
                                 dimension_numbers=dn)
    y = y + params["b2"][None, :, None, None]
    y = bn_relu(y, params["g2"], params["be2"], params["m2"], params["v2"])
    return y


# -------------------------------- main --------------------------------------- #

if __name__ == "__main__":
    N, Cin, Cout, H, W = 2, 4, 8, 16, 16

    key = jax.random.PRNGKey(0)
    ks = jax.random.split(key, 13)

    x = jax.random.normal(ks[0], (N, Cin, H, W), dtype=jnp.float32)

    params = {
        "w1": 0.2 * jax.random.normal(ks[1], (Cout, Cin, 3, 3), jnp.float32),
        "b1": 0.1 * jax.random.normal(ks[2], (Cout,), jnp.float32),
        "g1": 1.0 + 0.1 * jax.random.normal(ks[3], (Cout,), jnp.float32),
        "be1": 0.05 * jax.random.normal(ks[4], (Cout,), jnp.float32),
        "m1": 0.1 * jax.random.normal(ks[5], (Cout,), jnp.float32),
        "v1": 1.0 + 0.1 * jax.nn.sigmoid(jax.random.normal(ks[6], (Cout,), jnp.float32)),
        "w2": 0.2 * jax.random.normal(ks[7], (Cout, Cout, 3, 3), jnp.float32),
        "b2": 0.1 * jax.random.normal(ks[8], (Cout,), jnp.float32),
        "g2": 1.0 + 0.1 * jax.random.normal(ks[9], (Cout,), jnp.float32),
        "be2": 0.05 * jax.random.normal(ks[10], (Cout,), jnp.float32),
        "m2": 0.1 * jax.random.normal(ks[11], (Cout,), jnp.float32),
        "v2": 1.0 + 0.1 * jax.nn.sigmoid(jax.random.normal(ks[12], (Cout,), jnp.float32)),
    }

    ref = ref_down_forward(x, params)

    # f32 path: validates the kernel algorithm tightly against the reference.
    out_f32 = jax.block_until_ready(
        down_forward(x, params, compute_dtype=jnp.float32))
    assert out_f32.shape == (N, Cout, H // 2, W // 2), out_f32.shape
    assert jnp.allclose(out_f32, ref, atol=1e-3, rtol=1e-3), (
        "f32 max abs diff = " + str(float(jnp.max(jnp.abs(out_f32 - ref)))))

    # bf16 path (the performance configuration): looser tolerance.
    out_bf16 = jax.block_until_ready(
        down_forward(x, params, compute_dtype=jnp.bfloat16))
    assert out_bf16.shape == (N, Cout, H // 2, W // 2), out_bf16.shape
    max_err = float(jnp.max(jnp.abs(out_bf16 - ref)))
    ref_scale = float(jnp.max(jnp.abs(ref)))
    assert max_err <= 0.05 * ref_scale + 1e-3, (
        f"bf16 max abs diff {max_err} (ref scale {ref_scale})")

    print("KERNEL_OK")
</pallas_src>

<mosaic_0001>
module attributes {stable_mosaic.version = 11 : i64} {
  func.func @down_fused_kernel(%arg0: i32, %arg1: memref<2x16x16x4xf32, #tpu.memory_space<vmem>>, %arg2: memref<9x4x128xf32, #tpu.memory_space<vmem>>, %arg3: memref<1x128xf32, #tpu.memory_space<vmem>>, %arg4: memref<9x128x128xf32, #tpu.memory_space<vmem>>, %arg5: memref<1x128xf32, #tpu.memory_space<vmem>>, %arg6: memref<2x64x128xf32, #tpu.memory_space<vmem>>, %arg7: memref<2x10x10x4xf32, #tpu.memory_space<vmem>>, %arg8: memref<2x10x10x128xf32, #tpu.memory_space<vmem>>) attributes {dimension_semantics = [#tpu.dimension_semantics<parallel>], iteration_bounds = array<i64: 1>, scalar_prefetch = 0 : i64, scratch_operands = 2 : i64, tpu.core_type = #tpu.core_type<tc>, window_params = [{transform_indices = @transform_0, window_bounds = array<i64: 2, 16, 16, 4>}, {pipeline_mode = #tpu.pipeline_mode<synchronous>, transform_indices = @transform_1, window_bounds = array<i64: 9, 4, 128>}, {pipeline_mode = #tpu.pipeline_mode<synchronous>, transform_indices = @transform_2, window_bounds = array<i64: 1, 128>}, {pipeline_mode = #tpu.pipeline_mode<synchronous>, transform_indices = @transform_3, window_bounds = array<i64: 9, 128, 128>}, {pipeline_mode = #tpu.pipeline_mode<synchronous>, transform_indices = @transform_4, window_bounds = array<i64: 1, 128>}, {transform_indices = @transform_5, window_bounds = array<i64: 2, 64, 128>}]} {
    %c0 = arith.constant 0 : index
    %c0_0 = arith.constant 0 : index
    %c0_1 = arith.constant 0 : index
    %c0_2 = arith.constant 0 : index
    %0 = vector.load %arg1[%c0, %c0_0, %c0_1, %c0_2] : memref<2x16x16x4xf32, #tpu.memory_space<vmem>>, vector<2x16x16x4xf32>
    %1 = vector.shape_cast %0 : vector<2x16x16x4xf32> to vector<2x8x2x16x4xf32>
    %2 = vector.extract_strided_slice %1 {offsets = [0, 0, 0, 0, 0], sizes = [2, 8, 1, 16, 4], strides = [1, 1, 1, 1, 1]} : vector<2x8x2x16x4xf32> to vector<2x8x1x16x4xf32>
    %3 = vector.shape_cast %2 : vector<2x8x1x16x4xf32> to vector<2x8x16x4xf32>
    %4 = vector.extract_strided_slice %1 {offsets = [0, 0, 1, 0, 0], sizes = [2, 8, 1, 16, 4], strides = [1, 1, 1, 1, 1]} : vector<2x8x2x16x4xf32> to vector<2x8x1x16x4xf32>
    %5 = vector.shape_cast %4 : vector<2x8x1x16x4xf32> to vector<2x8x16x4xf32>
    %6 = arith.maximumf %3, %5 : vector<2x8x16x4xf32>
    %7 = vector.shape_cast %6 : vector<2x8x16x4xf32> to vector<2x8x8x2x4xf32>
    %8 = vector.extract_strided_slice %7 {offsets = [0, 0, 0, 0, 0], sizes = [2, 8, 8, 1, 4], strides = [1, 1, 1, 1, 1]} : vector<2x8x8x2x4xf32> to vector<2x8x8x1x4xf32>
    %9 = vector.shape_cast %8 : vector<2x8x8x1x4xf32> to vector<2x8x8x4xf32>
    %10 = vector.extract_strided_slice %7 {offsets = [0, 0, 0, 1, 0], sizes = [2, 8, 8, 1, 4], strides = [1, 1, 1, 1, 1]} : vector<2x8x8x2x4xf32> to vector<2x8x8x1x4xf32>
    %11 = vector.shape_cast %10 : vector<2x8x8x1x4xf32> to vector<2x8x8x4xf32>
    %12 = arith.maximumf %9, %11 : vector<2x8x8x4xf32>
    %cst = arith.constant 0.000000e+00 : f32
    %13 = vector.broadcast %cst : f32 to vector<2x1x10x4xf32>
    %c0_3 = arith.constant 0 : index
    %c0_4 = arith.constant 0 : index
    %c0_5 = arith.constant 0 : index
    %c0_6 = arith.constant 0 : index
    %14 = vector.load %arg7[%c0_3, %c0_4, %c0_5, %c0_6] : memref<2x10x10x4xf32, #tpu.memory_space<vmem>>, vector<2x1x10x4xf32>
    tpu.vector_store %arg7[%c0_3, %c0_4, %c0_5, %c0_6], %13 {strides = array<i32>} : memref<2x10x10x4xf32, #tpu.memory_space<vmem>>, vector<2x1x10x4xf32>,
    %cst_7 = arith.constant 0.000000e+00 : f32
    %15 = vector.broadcast %cst_7 : f32 to vector<2x1x10x4xf32>
    %c0_8 = arith.constant 0 : index
    %c9 = arith.constant 9 : index
    %c0_9 = arith.constant 0 : index
    %c0_10 = arith.constant 0 : index
    %16 = vector.load %arg7[%c0_8, %c9, %c0_9, %c0_10] : memref<2x10x10x4xf32, #tpu.memory_space<vmem>>, vector<2x1x10x4xf32>
    tpu.vector_store %arg7[%c0_8, %c9, %c0_9, %c0_10], %15 {strides = array<i32>} : memref<2x10x10x4xf32, #tpu.memory_space<vmem>>, vector<2x1x10x4xf32>,
    %cst_11 = arith.constant 0.000000e+00 : f32
    %17 = vector.broadcast %cst_11 : f32 to vector<2x10x1x4xf32>
    %c0_12 = arith.constant 0 : index
    %c0_13 = arith.constant 0 : index
    %c0_14 = arith.constant 0 : index
    %c0_15 = arith.constant 0 : index
    %18 = vector.load %arg7[%c0_12, %c0_13, %c0_14, %c0_15] : memref<2x10x10x4xf32, #tpu.memory_space<vmem>>, vector<2x10x1x4xf32>
    tpu.vector_store %arg7[%c0_12, %c0_13, %c0_14, %c0_15], %17 {strides = array<i32>} : memref<2x10x10x4xf32, #tpu.memory_space<vmem>>, vector<2x10x1x4xf32>,
    %cst_16 = arith.constant 0.000000e+00 : f32
    %19 = vector.broadcast %cst_16 : f32 to vector<2x10x1x4xf32>
    %c0_17 = arith.constant 0 : index
    %c0_18 = arith.constant 0 : index
    %c9_19 = arith.constant 9 : index
    %c0_20 = arith.constant 0 : index
    %20 = vector.load %arg7[%c0_17, %c0_18, %c9_19, %c0_20] : memref<2x10x10x4xf32, #tpu.memory_space<vmem>>, vector<2x10x1x4xf32>
    tpu.vector_store %arg7[%c0_17, %c0_18, %c9_19, %c0_20], %19 {strides = array<i32>} : memref<2x10x10x4xf32, #tpu.memory_space<vmem>>, vector<2x10x1x4xf32>,
    %c0_21 = arith.constant 0 : index
    %c1 = arith.constant 1 : index
    %c1_22 = arith.constant 1 : index
    %c0_23 = arith.constant 0 : index
    %21 = vector.load %arg7[%c0_21, %c1, %c1_22, %c0_23] : memref<2x10x10x4xf32, #tpu.memory_space<vmem>>, vector<2x8x8x4xf32>
    tpu.vector_store %arg7[%c0_21, %c1, %c1_22, %c0_23], %12 {strides = array<i32>} : memref<2x10x10x4xf32, #tpu.memory_space<vmem>>, vector<2x8x8x4xf32>,
    %c0_24 = arith.constant 0 : index
    %c0_25 = arith.constant 0 : index
    %c0_26 = arith.constant 0 : index
    %c0_27 = arith.constant 0 : index
    %22 = vector.load %arg7[%c0_24, %c0_25, %c0_26, %c0_27] : memref<2x10x10x4xf32, #tpu.memory_space<vmem>>, vector<2x10x10x4xf32>
    %23 = vector.extract_strided_slice %22 {offsets = [0, 0, 0, 0], sizes = [2, 8, 8, 4], strides = [1, 1, 1, 1]} : vector<2x10x10x4xf32> to vector<2x8x8x4xf32>
    %24 = vector.shape_cast %23 : vector<2x8x8x4xf32> to vector<128x4xf32>
    %c0_28 = arith.constant 0 : index
    %c0_29 = arith.constant 0 : index
    %c0_30 = arith.constant 0 : index
    %25 = vector.load %arg2[%c0_28, %c0_29, %c0_30] : memref<9x4x128xf32, #tpu.memory_space<vmem>>, vector<1x4x128xf32>
    %26 = vector.shape_cast %25 : vector<1x4x128xf32> to vector<4x128xf32>
    %cst_31 = arith.constant dense<0.000000e+00> : vector<128x128xf32>
    %27 = tpu.matmul %24, %26, %cst_31 {dimension_numbers = #tpu.dot_dimension_numbers<[1], [0], [0], [1], [0, 0, 1, 1], [], []>} : vector<128x4xf32>, vector<4x128xf32>, vector<128x128xf32> -> vector<128x128xf32>
    %28 = vector.extract_strided_slice %22 {offsets = [0, 0, 1, 0], sizes = [2, 8, 8, 4], strides = [1, 1, 1, 1]} : vector<2x10x10x4xf32> to vector<2x8x8x4xf32>
    %29 = vector.shape_cast %28 : vector<2x8x8x4xf32> to vector<128x4xf32>
    %c1_32 = arith.constant 1 : index
    %c0_33 = arith.constant 0 : index
    %c0_34 = arith.constant 0 : index
    %30 = vector.load %arg2[%c1_32, %c0_33, %c0_34] : memref<9x4x128xf32, #tpu.memory_space<vmem>>, vector<1x4x128xf32>
    %31 = vector.shape_cast %30 : vector<1x4x128xf32> to vector<4x128xf32>
    %cst_35 = arith.constant dense<0.000000e+00> : vector<128x128xf32>
    %32 = tpu.matmul %29, %31, %cst_35 {dimension_numbers = #tpu.dot_dimension_numbers<[1], [0], [0], [1], [0, 0, 1, 1], [], []>} : vector<128x4xf32>, vector<4x128xf32>, vector<128x128xf32> -> vector<128x128xf32>
    %33 = arith.addf %27, %32 : vector<128x128xf32>
    %34 = vector.extract_strided_slice %22 {offsets = [0, 0, 2, 0], sizes = [2, 8, 8, 4], strides = [1, 1, 1, 1]} : vector<2x10x10x4xf32> to vector<2x8x8x4xf32>
    %35 = vector.shape_cast %34 : vector<2x8x8x4xf32> to vector<128x4xf32>
    %c2 = arith.constant 2 : index
    %c0_36 = arith.constant 0 : index
    %c0_37 = arith.constant 0 : index
    %36 = vector.load %arg2[%c2, %c0_36, %c0_37] : memref<9x4x128xf32, #tpu.memory_space<vmem>>, vector<1x4x128xf32>
    %37 = vector.shape_cast %36 : vector<1x4x128xf32> to vector<4x128xf32>
    %cst_38 = arith.constant dense<0.000000e+00> : vector<128x128xf32>
    %38 = tpu.matmul %35, %37, %cst_38 {dimension_numbers = #tpu.dot_dimension_numbers<[1], [0], [0], [1], [0, 0, 1, 1], [], []>} : vector<128x4xf32>, vector<4x128xf32>, vector<128x128xf32> -> vector<128x128xf32>
    %39 = arith.addf %33, %38 : vector<128x128xf32>
    %40 = vector.extract_strided_slice %22 {offsets = [0, 1, 0, 0], sizes = [2, 8, 8, 4], strides = [1, 1, 1, 1]} : vector<2x10x10x4xf32> to vector<2x8x8x4xf32>
    %41 = vector.shape_cast %40 : vector<2x8x8x4xf32> to vector<128x4xf32>
    %c3 = arith.constant 3 : index
    %c0_39 = arith.constant 0 : index
    %c0_40 = arith.constant 0 : index
    %42 = vector.load %arg2[%c3, %c0_39, %c0_40] : memref<9x4x128xf32, #tpu.memory_space<vmem>>, vector<1x4x128xf32>
    %43 = vector.shape_cast %42 : vector<1x4x128xf32> to vector<4x128xf32>
    %cst_41 = arith.constant dense<0.000000e+00> : vector<128x128xf32>
    %44 = tpu.matmul %41, %43, %cst_41 {dimension_numbers = #tpu.dot_dimension_numbers<[1], [0], [0], [1], [0, 0, 1, 1], [], []>} : vector<128x4xf32>, vector<4x128xf32>, vector<128x128xf32> -> vector<128x128xf32>
    %45 = arith.addf %39, %44 : vector<128x128xf32>
    %46 = vector.extract_strided_slice %22 {offsets = [0, 1, 1, 0], sizes = [2, 8, 8, 4], strides = [1, 1, 1, 1]} : vector<2x10x10x4xf32> to vector<2x8x8x4xf32>
    %47 = vector.shape_cast %46 : vector<2x8x8x4xf32> to vector<128x4xf32>
    %c4 = arith.constant 4 : index
    %c0_42 = arith.constant 0 : index
    %c0_43 = arith.constant 0 : index
    %48 = vector.load %arg2[%c4, %c0_42, %c0_43] : memref<9x4x128xf32, #tpu.memory_space<vmem>>, vector<1x4x128xf32>
    %49 = vector.shape_cast %48 : vector<1x4x128xf32> to vector<4x128xf32>
    %cst_44 = arith.constant dense<0.000000e+00> : vector<128x128xf32>
    %50 = tpu.matmul %47, %49, %cst_44 {dimension_numbers = #tpu.dot_dimension_numbers<[1], [0], [0], [1], [0, 0, 1, 1], [], []>} : vector<128x4xf32>, vector<4x128xf32>, vector<128x128xf32> -> vector<128x128xf32>
    %51 = arith.addf %45, %50 : vector<128x128xf32>
    %52 = vector.extract_strided_slice %22 {offsets = [0, 1, 2, 0], sizes = [2, 8, 8, 4], strides = [1, 1, 1, 1]} : vector<2x10x10x4xf32> to vector<2x8x8x4xf32>
    %53 = vector.shape_cast %52 : vector<2x8x8x4xf32> to vector<128x4xf32>
    %c5 = arith.constant 5 : index
    %c0_45 = arith.constant 0 : index
    %c0_46 = arith.constant 0 : index
    %54 = vector.load %arg2[%c5, %c0_45, %c0_46] : memref<9x4x128xf32, #tpu.memory_space<vmem>>, vector<1x4x128xf32>
    %55 = vector.shape_cast %54 : vector<1x4x128xf32> to vector<4x128xf32>
    %cst_47 = arith.constant dense<0.000000e+00> : vector<128x128xf32>
    %56 = tpu.matmul %53, %55, %cst_47 {dimension_numbers = #tpu.dot_dimension_numbers<[1], [0], [0], [1], [0, 0, 1, 1], [], []>} : vector<128x4xf32>, vector<4x128xf32>, vector<128x128xf32> -> vector<128x128xf32>
    %57 = arith.addf %51, %56 : vector<128x128xf32>
    %58 = vector.extract_strided_slice %22 {offsets = [0, 2, 0, 0], sizes = [2, 8, 8, 4], strides = [1, 1, 1, 1]} : vector<2x10x10x4xf32> to vector<2x8x8x4xf32>
    %59 = vector.shape_cast %58 : vector<2x8x8x4xf32> to vector<128x4xf32>
    %c6 = arith.constant 6 : index
    %c0_48 = arith.constant 0 : index
    %c0_49 = arith.constant 0 : index
    %60 = vector.load %arg2[%c6, %c0_48, %c0_49] : memref<9x4x128xf32, #tpu.memory_space<vmem>>, vector<1x4x128xf32>
    %61 = vector.shape_cast %60 : vector<1x4x128xf32> to vector<4x128xf32>
    %cst_50 = arith.constant dense<0.000000e+00> : vector<128x128xf32>
    %62 = tpu.matmul %59, %61, %cst_50 {dimension_numbers = #tpu.dot_dimension_numbers<[1], [0], [0], [1], [0, 0, 1, 1], [], []>} : vector<128x4xf32>, vector<4x128xf32>, vector<128x128xf32> -> vector<128x128xf32>
    %63 = arith.addf %57, %62 : vector<128x128xf32>
    %64 = vector.extract_strided_slice %22 {offsets = [0, 2, 1, 0], sizes = [2, 8, 8, 4], strides = [1, 1, 1, 1]} : vector<2x10x10x4xf32> to vector<2x8x8x4xf32>
    %65 = vector.shape_cast %64 : vector<2x8x8x4xf32> to vector<128x4xf32>
    %c7 = arith.constant 7 : index
    %c0_51 = arith.constant 0 : index
    %c0_52 = arith.constant 0 : index
    %66 = vector.load %arg2[%c7, %c0_51, %c0_52] : memref<9x4x128xf32, #tpu.memory_space<vmem>>, vector<1x4x128xf32>
    %67 = vector.shape_cast %66 : vector<1x4x128xf32> to vector<4x128xf32>
    %cst_53 = arith.constant dense<0.000000e+00> : vector<128x128xf32>
    %68 = tpu.matmul %65, %67, %cst_53 {dimension_numbers = #tpu.dot_dimension_numbers<[1], [0], [0], [1], [0, 0, 1, 1], [], []>} : vector<128x4xf32>, vector<4x128xf32>, vector<128x128xf32> -> vector<128x128xf32>
    %69 = arith.addf %63, %68 : vector<128x128xf32>
    %70 = vector.extract_strided_slice %22 {offsets = [0, 2, 2, 0], sizes = [2, 8, 8, 4], strides = [1, 1, 1, 1]} : vector<2x10x10x4xf32> to vector<2x8x8x4xf32>
    %71 = vector.shape_cast %70 : vector<2x8x8x4xf32> to vector<128x4xf32>
    %c8 = arith.constant 8 : index
    %c0_54 = arith.constant 0 : index
    %c0_55 = arith.constant 0 : index
    %72 = vector.load %arg2[%c8, %c0_54, %c0_55] : memref<9x4x128xf32, #tpu.memory_space<vmem>>, vector<1x4x128xf32>
    %73 = vector.shape_cast %72 : vector<1x4x128xf32> to vector<4x128xf32>
    %cst_56 = arith.constant dense<0.000000e+00> : vector<128x128xf32>
    %74 = tpu.matmul %71, %73, %cst_56 {dimension_numbers = #tpu.dot_dimension_numbers<[1], [0], [0], [1], [0, 0, 1, 1], [], []>} : vector<128x4xf32>, vector<4x128xf32>, vector<128x128xf32> -> vector<128x128xf32>
    %75 = arith.addf %69, %74 : vector<128x128xf32>
    %c0_57 = arith.constant 0 : index
    %c0_58 = arith.constant 0 : index
    %76 = vector.load %arg3[%c0_57, %c0_58] : memref<1x128xf32, #tpu.memory_space<vmem>>, vector<1x128xf32>
    %77 = vector.broadcast %76 : vector<1x128xf32> to vector<128x128xf32>
    %78 = arith.addf %75, %77 : vector<128x128xf32>
    %cst_59 = arith.constant 0.000000e+00 : f32
    %79 = vector.broadcast %cst_59 : f32 to vector<128x128xf32>
    %80 = arith.maximumf %78, %79 : vector<128x128xf32>
    %81 = vector.shape_cast %80 : vector<128x128xf32> to vector<2x8x8x128xf32>
    %cst_60 = arith.constant 0.000000e+00 : f32
    %82 = vector.broadcast %cst_60 : f32 to vector<2x1x10x128xf32>
    %c0_61 = arith.constant 0 : index
    %c0_62 = arith.constant 0 : index
    %c0_63 = arith.constant 0 : index
    %c0_64 = arith.constant 0 : index
    %83 = vector.load %arg8[%c0_61, %c0_62, %c0_63, %c0_64] : memref<2x10x10x128xf32, #tpu.memory_space<vmem>>, vector<2x1x10x128xf32>
    tpu.vector_store %arg8[%c0_61, %c0_62, %c0_63, %c0_64], %82 {strides = array<i32>} : memref<2x10x10x128xf32, #tpu.memory_space<vmem>>, vector<2x1x10x128xf32>,
    %cst_65 = arith.constant 0.000000e+00 : f32
    %84 = vector.broadcast %cst_65 : f32 to vector<2x1x10x128xf32>
    %c0_66 = arith.constant 0 : index
    %c9_67 = arith.constant 9 : index
    %c0_68 = arith.constant 0 : index
    %c0_69 = arith.constant 0 : index
    %85 = vector.load %arg8[%c0_66, %c9_67, %c0_68, %c0_69] : memref<2x10x10x128xf32, #tpu.memory_space<vmem>>, vector<2x1x10x128xf32>
    tpu.vector_store %arg8[%c0_66, %c9_67, %c0_68, %c0_69], %84 {strides = array<i32>} : memref<2x10x10x128xf32, #tpu.memory_space<vmem>>, vector<2x1x10x128xf32>,
    %cst_70 = arith.constant 0.000000e+00 : f32
    %86 = vector.broadcast %cst_70 : f32 to vector<2x10x1x128xf32>
    %c0_71 = arith.constant 0 : index
    %c0_72 = arith.constant 0 : index
    %c0_73 = arith.constant 0 : index
    %c0_74 = arith.constant 0 : index
    %87 = vector.load %arg8[%c0_71, %c0_72, %c0_73, %c0_74] : memref<2x10x10x128xf32, #tpu.memory_space<vmem>>, vector<2x10x1x128xf32>
    tpu.vector_store %arg8[%c0_71, %c0_72, %c0_73, %c0_74], %86 {strides = array<i32>} : memref<2x10x10x128xf32, #tpu.memory_space<vmem>>, vector<2x10x1x128xf32>,
    %cst_75 = arith.constant 0.000000e+00 : f32
    %88 = vector.broadcast %cst_75 : f32 to vector<2x10x1x128xf32>
    %c0_76 = arith.constant 0 : index
    %c0_77 = arith.constant 0 : index
    %c9_78 = arith.constant 9 : index
    %c0_79 = arith.constant 0 : index
    %89 = vector.load %arg8[%c0_76, %c0_77, %c9_78, %c0_79] : memref<2x10x10x128xf32, #tpu.memory_space<vmem>>, vector<2x10x1x128xf32>
    tpu.vector_store %arg8[%c0_76, %c0_77, %c9_78, %c0_79], %88 {strides = array<i32>} : memref<2x10x10x128xf32, #tpu.memory_space<vmem>>, vector<2x10x1x128xf32>,
    %c0_80 = arith.constant 0 : index
    %c1_81 = arith.constant 1 : index
    %c1_82 = arith.constant 1 : index
    %c0_83 = arith.constant 0 : index
    %90 = vector.load %arg8[%c0_80, %c1_81, %c1_82, %c0_83] : memref<2x10x10x128xf32, #tpu.memory_space<vmem>>, vector<2x8x8x128xf32>
    tpu.vector_store %arg8[%c0_80, %c1_81, %c1_82, %c0_83], %81 {strides = array<i32>} : memref<2x10x10x128xf32, #tpu.memory_space<vmem>>, vector<2x8x8x128xf32>,
    %c0_84 = arith.constant 0 : index
    %c0_85 = arith.constant 0 : index
    %c0_86 = arith.constant 0 : index
    %c0_87 = arith.constant 0 : index
    %91 = vector.load %arg8[%c0_84, %c0_85, %c0_86, %c0_87] : memref<2x10x10x128xf32, #tpu.memory_space<vmem>>, vector<2x10x10x128xf32>
    %92 = vector.extract_strided_slice %91 {offsets = [0, 0, 0, 0], sizes = [2, 8, 8, 128], strides = [1, 1, 1, 1]} : vector<2x10x10x128xf32> to vector<2x8x8x128xf32>
    %93 = vector.shape_cast %92 : vector<2x8x8x128xf32> to vector<128x128xf32>
    %c0_88 = arith.constant 0 : index
    %c0_89 = arith.constant 0 : index
    %c0_90 = arith.constant 0 : index
    %94 = vector.load %arg4[%c0_88, %c0_89, %c0_90] : memref<9x128x128xf32, #tpu.memory_space<vmem>>, vector<1x128x128xf32>
    %95 = vector.shape_cast %94 : vector<1x128x128xf32> to vector<128x128xf32>
    %cst_91 = arith.constant dense<0.000000e+00> : vector<128x128xf32>
    %96 = tpu.matmul %93, %95, %cst_91 {dimension_numbers = #tpu.dot_dimension_numbers<[1], [0], [0], [1], [0, 0, 1, 1], [], []>} : vector<128x128xf32>, vector<128x128xf32>, vector<128x128xf32> -> vector<128x128xf32>
    %97 = vector.extract_strided_slice %91 {offsets = [0, 0, 1, 0], sizes = [2, 8, 8, 128], strides = [1, 1, 1, 1]} : vector<2x10x10x128xf32> to vector<2x8x8x128xf32>
    %98 = vector.shape_cast %97 : vector<2x8x8x128xf32> to vector<128x128xf32>
    %c1_92 = arith.constant 1 : index
    %c0_93 = arith.constant 0 : index
    %c0_94 = arith.constant 0 : index
    %99 = vector.load %arg4[%c1_92, %c0_93, %c0_94] : memref<9x128x128xf32, #tpu.memory_space<vmem>>, vector<1x128x128xf32>
    %100 = vector.shape_cast %99 : vector<1x128x128xf32> to vector<128x128xf32>
    %cst_95 = arith.constant dense<0.000000e+00> : vector<128x128xf32>
    %101 = tpu.matmul %98, %100, %cst_95 {dimension_numbers = #tpu.dot_dimension_numbers<[1], [0], [0], [1], [0, 0, 1, 1], [], []>} : vector<128x128xf32>, vector<128x128xf32>, vector<128x128xf32> -> vector<128x128xf32>
    %102 = arith.addf %96, %101 : vector<128x128xf32>
    %103 = vector.extract_strided_slice %91 {offsets = [0, 0, 2, 0], sizes = [2, 8, 8, 128], strides = [1, 1, 1, 1]} : vector<2x10x10x128xf32> to vector<2x8x8x128xf32>
    %104 = vector.shape_cast %103 : vector<2x8x8x128xf32> to vector<128x128xf32>
    %c2_96 = arith.constant 2 : index
    %c0_97 = arith.constant 0 : index
    %c0_98 = arith.constant 0 : index
    %105 = vector.load %arg4[%c2_96, %c0_97, %c0_98] : memref<9x128x128xf32, #tpu.memory_space<vmem>>, vector<1x128x128xf32>
    %106 = vector.shape_cast %105 : vector<1x128x128xf32> to vector<128x128xf32>
    %cst_99 = arith.constant dense<0.000000e+00> : vector<128x128xf32>
    %107 = tpu.matmul %104, %106, %cst_99 {dimension_numbers = #tpu.dot_dimension_numbers<[1], [0], [0], [1], [0, 0, 1, 1], [], []>} : vector<128x128xf32>, vector<128x128xf32>, vector<128x128xf32> -> vector<128x128xf32>
    %108 = arith.addf %102, %107 : vector<128x128xf32>
    %109 = vector.extract_strided_slice %91 {offsets = [0, 1, 0, 0], sizes = [2, 8, 8, 128], strides = [1, 1, 1, 1]} : vector<2x10x10x128xf32> to vector<2x8x8x128xf32>
    %110 = vector.shape_cast %109 : vector<2x8x8x128xf32> to vector<128x128xf32>
    %c3_100 = arith.constant 3 : index
    %c0_101 = arith.constant 0 : index
    %c0_102 = arith.constant 0 : index
    %111 = vector.load %arg4[%c3_100, %c0_101, %c0_102] : memref<9x128x128xf32, #tpu.memory_space<vmem>>, vector<1x128x128xf32>
    %112 = vector.shape_cast %111 : vector<1x128x128xf32> to vector<128x128xf32>
    %cst_103 = arith.constant dense<0.000000e+00> : vector<128x128xf32>
    %113 = tpu.matmul %110, %112, %cst_103 {dimension_numbers = #tpu.dot_dimension_numbers<[1], [0], [0], [1], [0, 0, 1, 1], [], []>} : vector<128x128xf32>, vector<128x128xf32>, vector<128x128xf32> -> vector<128x128xf32>
    %114 = arith.addf %108, %113 : vector<128x128xf32>
    %115 = vector.extract_strided_slice %91 {offsets = [0, 1, 1, 0], sizes = [2, 8, 8, 128], strides = [1, 1, 1, 1]} : vector<2x10x10x128xf32> to vector<2x8x8x128xf32>
    %116 = vector.shape_cast %115 : vector<2x8x8x128xf32> to vector<128x128xf32>
    %c4_104 = arith.constant 4 : index
    %c0_105 = arith.constant 0 : index
    %c0_106 = arith.constant 0 : index
    %117 = vector.load %arg4[%c4_104, %c0_105, %c0_106] : memref<9x128x128xf32, #tpu.memory_space<vmem>>, vector<1x128x128xf32>
    %118 = vector.shape_cast %117 : vector<1x128x128xf32> to vector<128x128xf32>
    %cst_107 = arith.constant dense<0.000000e+00> : vector<128x128xf32>
    %119 = tpu.matmul %116, %118, %cst_107 {dimension_numbers = #tpu.dot_dimension_numbers<[1], [0], [0], [1], [0, 0, 1, 1], [], []>} : vector<128x128xf32>, vector<128x128xf32>, vector<128x128xf32> -> vector<128x128xf32>
    %120 = arith.addf %114, %119 : vector<128x128xf32>
    %121 = vector.extract_strided_slice %91 {offsets = [0, 1, 2, 0], sizes = [2, 8, 8, 128], strides = [1, 1, 1, 1]} : vector<2x10x10x128xf32> to vector<2x8x8x128xf32>
    %122 = vector.shape_cast %121 : vector<2x8x8x128xf32> to vector<128x128xf32>
    %c5_108 = arith.constant 5 : index
    %c0_109 = arith.constant 0 : index
    %c0_110 = arith.constant 0 : index
    %123 = vector.load %arg4[%c5_108, %c0_109, %c0_110] : memref<9x128x128xf32, #tpu.memory_space<vmem>>, vector<1x128x128xf32>
    %124 = vector.shape_cast %123 : vector<1x128x128xf32> to vector<128x128xf32>
    %cst_111 = arith.constant dense<0.000000e+00> : vector<128x128xf32>
    %125 = tpu.matmul %122, %124, %cst_111 {dimension_numbers = #tpu.dot_dimension_numbers<[1], [0], [0], [1], [0, 0, 1, 1], [], []>} : vector<128x128xf32>, vector<128x128xf32>, vector<128x128xf32> -> vector<128x128xf32>
    %126 = arith.addf %120, %125 : vector<128x128xf32>
    %127 = vector.extract_strided_slice %91 {offsets = [0, 2, 0, 0], sizes = [2, 8, 8, 128], strides = [1, 1, 1, 1]} : vector<2x10x10x128xf32> to vector<2x8x8x128xf32>
    %128 = vector.shape_cast %127 : vector<2x8x8x128xf32> to vector<128x128xf32>
    %c6_112 = arith.constant 6 : index
    %c0_113 = arith.constant 0 : index
    %c0_114 = arith.constant 0 : index
    %129 = vector.load %arg4[%c6_112, %c0_113, %c0_114] : memref<9x128x128xf32, #tpu.memory_space<vmem>>, vector<1x128x128xf32>
    %130 = vector.shape_cast %129 : vector<1x128x128xf32> to vector<128x128xf32>
    %cst_115 = arith.constant dense<0.000000e+00> : vector<128x128xf32>
    %131 = tpu.matmul %128, %130, %cst_115 {dimension_numbers = #tpu.dot_dimension_numbers<[1], [0], [0], [1], [0, 0, 1, 1], [], []>} : vector<128x128xf32>, vector<128x128xf32>, vector<128x128xf32> -> vector<128x128xf32>
    %132 = arith.addf %126, %131 : vector<128x128xf32>
    %133 = vector.extract_strided_slice %91 {offsets = [0, 2, 1, 0], sizes = [2, 8, 8, 128], strides = [1, 1, 1, 1]} : vector<2x10x10x128xf32> to vector<2x8x8x128xf32>
    %134 = vector.shape_cast %133 : vector<2x8x8x128xf32> to vector<128x128xf32>
    %c7_116 = arith.constant 7 : index
    %c0_117 = arith.constant 0 : index
    %c0_118 = arith.constant 0 : index
    %135 = vector.load %arg4[%c7_116, %c0_117, %c0_118] : memref<9x128x128xf32, #tpu.memory_space<vmem>>, vector<1x128x128xf32>
    %136 = vector.shape_cast %135 : vector<1x128x128xf32> to vector<128x128xf32>
    %cst_119 = arith.constant dense<0.000000e+00> : vector<128x128xf32>
    %137 = tpu.matmul %134, %136, %cst_119 {dimension_numbers = #tpu.dot_dimension_numbers<[1], [0], [0], [1], [0, 0, 1, 1], [], []>} : vector<128x128xf32>, vector<128x128xf32>, vector<128x128xf32> -> vector<128x128xf32>
    %138 = arith.addf %132, %137 : vector<128x128xf32>
    %139 = vector.extract_strided_slice %91 {offsets = [0, 2, 2, 0], sizes = [2, 8, 8, 128], strides = [1, 1, 1, 1]} : vector<2x10x10x128xf32> to vector<2x8x8x128xf32>
    %140 = vector.shape_cast %139 : vector<2x8x8x128xf32> to vector<128x128xf32>
    %c8_120 = arith.constant 8 : index
    %c0_121 = arith.constant 0 : index
    %c0_122 = arith.constant 0 : index
    %141 = vector.load %arg4[%c8_120, %c0_121, %c0_122] : memref<9x128x128xf32, #tpu.memory_space<vmem>>, vector<1x128x128xf32>
    %142 = vector.shape_cast %141 : vector<1x128x128xf32> to vector<128x128xf32>
    %cst_123 = arith.constant dense<0.000000e+00> : vector<128x128xf32>
    %143 = tpu.matmul %140, %142, %cst_123 {dimension_numbers = #tpu.dot_dimension_numbers<[1], [0], [0], [1], [0, 0, 1, 1], [], []>} : vector<128x128xf32>, vector<128x128xf32>, vector<128x128xf32> -> vector<128x128xf32>
    %144 = arith.addf %138, %143 : vector<128x128xf32>
    %c0_124 = arith.constant 0 : index
    %c0_125 = arith.constant 0 : index
    %145 = vector.load %arg5[%c0_124, %c0_125] : memref<1x128xf32, #tpu.memory_space<vmem>>, vector<1x128xf32>
    %146 = vector.broadcast %145 : vector<1x128xf32> to vector<128x128xf32>
    %147 = arith.addf %144, %146 : vector<128x128xf32>
    %cst_126 = arith.constant 0.000000e+00 : f32
    %148 = vector.broadcast %cst_126 : f32 to vector<128x128xf32>
    %149 = arith.maximumf %147, %148 : vector<128x128xf32>
    %150 = vector.shape_cast %149 : vector<128x128xf32> to vector<2x64x128xf32>
    %c0_127 = arith.constant 0 : index
    %c0_128 = arith.constant 0 : index
    %c0_129 = arith.constant 0 : index
    %151 = vector.load %arg6[%c0_127, %c0_128, %c0_129] : memref<2x64x128xf32, #tpu.memory_space<vmem>>, vector<2x64x128xf32>
    tpu.vector_store %arg6[%c0_127, %c0_128, %c0_129], %150 {strides = array<i32>} : memref<2x64x128xf32, #tpu.memory_space<vmem>>, vector<2x64x128xf32>,
    return
  }
  func.func @transform_0(%arg0: i32) -> (i32, i32, i32, i32) {
    %c0_i32 = arith.constant 0 : i32
    %c0_i32_0 = arith.constant 0 : i32
    %c0_i32_1 = arith.constant 0 : i32
    %c0_i32_2 = arith.constant 0 : i32
    return %arg0, %c0_i32, %c0_i32_0, %c0_i32_1 : i32, i32, i32, i32
  }
  func.func @transform_1(%arg0: i32) -> (i32, i32, i32) {
    %c0_i32 = arith.constant 0 : i32
    %c0_i32_0 = arith.constant 0 : i32
    %c0_i32_1 = arith.constant 0 : i32
    %c0_i32_2 = arith.constant 0 : i32
    return %c0_i32, %c0_i32_0, %c0_i32_1 : i32, i32, i32
  }
  func.func @transform_2(%arg0: i32) -> (i32, i32) {
    %c0_i32 = arith.constant 0 : i32
    %c0_i32_0 = arith.constant 0 : i32
    %c0_i32_1 = arith.constant 0 : i32
    return %c0_i32, %c0_i32_0 : i32, i32
  }
  func.func @transform_3(%arg0: i32) -> (i32, i32, i32) {
    %c0_i32 = arith.constant 0 : i32
    %c0_i32_0 = arith.constant 0 : i32
    %c0_i32_1 = arith.constant 0 : i32
    %c0_i32_2 = arith.constant 0 : i32
    return %c0_i32, %c0_i32_0, %c0_i32_1 : i32, i32, i32
  }
  func.func @transform_4(%arg0: i32) -> (i32, i32) {
    %c0_i32 = arith.constant 0 : i32
    %c0_i32_0 = arith.constant 0 : i32
    %c0_i32_1 = arith.constant 0 : i32
    return %c0_i32, %c0_i32_0 : i32, i32
  }
  func.func @transform_5(%arg0: i32) -> (i32, i32, i32) {
    %c0_i32 = arith.constant 0 : i32
    %c0_i32_0 = arith.constant 0 : i32
    %c0_i32_1 = arith.constant 0 : i32
    return %arg0, %c0_i32, %c0_i32_0 : i32, i32, i32
  }
}

</mosaic_0001>

<bundles_post_ra>
// kernel: down_forward.1
= control target key start
LH: loop header
LB: loop body
LE: loop exit
PB: predicated region body
PF: predicated region fallthrough
CT: control target
= control target key end

     0   :  { %vm2332_vm0 = vcmask 1043456   ;;  %vm1332_vm1 = vcmask 31744   ;;  %vm1334_vm2 = vcmask 25600   ;;  %v7555_v2 = vmov 0.0   ;;  %s10298_s1 = inlined_call_operand.vmem [shape: f32[9,4,128], index: 1, kind: input, shape index: {}]   ;;  %s10299_s0 = inlined_call_operand.vmem [shape: f32[2,16,16,4], index: 0, kind: input, shape index: {}]   ;;  %s10300_s3 = inlined_call_operand.vmem [shape: f32[9,128,128], index: 3, kind: input, shape index: {}]   ;;  %s10301_s2 = inlined_call_operand.vmem [shape: f32[1,128], index: 2, kind: input, shape index: {}]   ;;  %s10302_s4 = inlined_call_operand.vmem [shape: f32[1,128], index: 4, kind: input, shape index: {}]   ;;  %s10303_s5 = inlined_call_operand.vmem [shape: f32[2,64,128], index: 5, kind: output, shape index: {}]  }
   0x1   :  { %v7590_v0 = vld [vmem:[%s10298_s1 + $0x4] sm:$0xf]  ;;  %v7595_v1 = vld [vmem:[%s10298_s1] sm:$0xf]  ;;  %1333 = vst.msk [vmem:[#allocation2] sm:$0xff] %vm1332_vm1, %v7555_v2  ;;  %vm1343_vm3 = vcmask 24576   ;;  %v152_v3 = vlaneseq }
   0x2   :  { %1335 = vst.msk [vmem:[#allocation2 + $0x8] sm:$0x3] %vm1334_vm2, %v7555_v2  ;;  %1337 = vst.msk [vmem:[#allocation2 + $0xa8] sm:$0x3] %vm1334_vm2, %v7555_v2  ;;  %6793 = vmatprep.subr.msk.mxu0 %vm2332_vm0, %v7590_v0  ;;  %6819 = vmatprep.subr.msk.mxu1 %vm2332_vm0, %v7595_v1  ;;  %v7744_v4 = vld [vmem:[%s10298_s1 + $0x8] sm:$0xf] }
   0x3   :  { %1336 = vst.msk [vmem:[#allocation2 + $0xa0] sm:$0xff] %vm1332_vm1, %v7555_v2  ;;  %1339 = vst.msk [vmem:[#allocation2 + $0x90] sm:$0xff] %vm1332_vm1, %v7555_v2  ;;  %v20_v5 = vld [vmem:[%s10299_s0] sm:$0xff]  ;;  %v21_v6 = vld [vmem:[%s10299_s0 + $0x8] sm:$0xff]  ;;  %6794 = vmatpush3.msk.msra.mxu0 %vm2332_vm0, %v7590_v0  ;;  %6820 = vmatpush3.msk.msra.mxu1 %vm2332_vm0, %v7595_v1  ;;  %v7556_v9 = vmov 1983009808  }
   0x4   :  { %1340 = vst.msk [vmem:[#allocation2 + $0x98] sm:$0x3] %vm1334_vm2, %v7555_v2  ;;  %1342 = vst.msk [vmem:[#allocation2 + $0x138] sm:$0x3] %vm1334_vm2, %v7555_v2  ;;  %v22_v7 = vld [vmem:[%s10299_s0 + $0x10] sm:$0xff]  ;;  %v23_v8 = vld [vmem:[%s10299_s0 + $0x18] sm:$0xff]  ;;  %v150_v10 = vunpack.c.l.s4 %v7556_v9  ;;  %6845 = vmatprep.subr.msk.mxu0 %vm2332_vm0, %v7744_v4 }
   0x5   :  { %1341 = vst.msk [vmem:[#allocation2 + $0x130] sm:$0xff] %vm1332_vm1, %v7555_v2  ;;  %3999 = vst [vmem:[#allocation3] sm:$0xff] %v7555_v2  ;;  %v153_v11 = vshrl.u32 %v152_v3, 7  ;;  %v24_v12 = vld [vmem:[%s10299_s0 + $0x20] sm:$0xff]  ;;  %v84_v13 = vmax.f32 %v20_v5, %v22_v7  ;;  %v85_v14 = vmax.f32 %v21_v6, %v23_v8  ;;  %v25_v15 = vld [vmem:[%s10299_s0 + $0x28] sm:$0xff]  ;;  %vm2249_vm4 = vcmask 1046528  }
   0x6   :  { %4000 = vst [vmem:[#allocation3 + $0x8] sm:$0x3] %v7555_v2  ;;  %4001 = vst [vmem:[#allocation3 + $0xa0] sm:$0xff] %v7555_v2  ;;  %v26_v16 = vld [vmem:[%s10299_s0 + $0x30] sm:$0xff]  ;;  %v27_v17 = vld [vmem:[%s10299_s0 + $0x38] sm:$0xff]  ;;  %v151_v18 = vunpack.c.0.s8 %v150_v10  ;;  %vm2024_vm5 = vcmask 1041409  }
   0x7   :  { %4002 = vst [vmem:[#allocation3 + $0xa8] sm:$0x3] %v7555_v2  ;;  %4004 = vst [vmem:[#allocation3 + $0x90] sm:$0xff] %v7555_v2  ;;  %v28_v19 = vld [vmem:[%s10299_s0 + $0x40] sm:$0xff]  ;;  %v29_v20 = vld [vmem:[%s10299_s0 + $0x48] sm:$0xff]  ;;  %v148_v22 = vcombine.high %v84_v13, %v84_v13  ;;  %v165_v23 = vcombine.high %v85_v14, %v85_v14  ;;  %v86_v24 = vmax.f32 %v24_v12, %v26_v16  ;;  %v7790_v27 = vsub.s32 0, %v153_v11 }
   0x8   :  { %4005 = vst [vmem:[#allocation3 + $0x98] sm:$0x3] %v7555_v2  ;;  %4006 = vst [vmem:[#allocation3 + $0x130] sm:$0xff] %v7555_v2  ;;  %v30_v21 = vld [vmem:[%s10299_s0 + $0x50] sm:$0xff]  ;;  %v31_v25 = vld [vmem:[%s10299_s0 + $0x58] sm:$0xff]  ;;  %v7788_v26 = vsub.s32 %v151_v18, %v153_v11  ;;  %v87_v30 = vmax.f32 %v25_v15, %v27_v17  ;;  %vm2026_vm6 = vcmask 1042434  }
   0x9   :  { %4007 = vst [vmem:[#allocation3 + $0x138] sm:$0x3] %v7555_v2  ;;  %4009 = vst [vmem:[#allocation3 + $0x10] sm:$0x1] %v7555_v2  ;;  %v32_v28 = vld [vmem:[%s10299_s0 + $0x60] sm:$0xff]  ;;  %v34_v29 = vld [vmem:[%s10299_s0 + $0x70] sm:$0xff]  ;;  %v182_v31 = vcombine.high %v86_v24, %v86_v24  ;;  %v7798_v32 = vmax.f32 %v28_v19, %v30_v21  ;;  %v7800_v33 = vmax.f32 %v29_v20, %v31_v25 }
   0xa   :  { %4010 = vst [vmem:[#allocation3 + $0x20] sm:$0x1] %v7555_v2  ;;  %4011 = vst [vmem:[#allocation3 + $0x30] sm:$0x1] %v7555_v2  ;;  %v155_v36 = vrot.slane %v84_v13, %v7788_v26  ;;  %v162_v37 = vrot.slane %v148_v22, %v7788_v26  ;;  %v172_v38 = vrot.slane %v85_v14, %v7788_v26  ;;  %vm2028_vm7 = vcmask 1043459  }
   0xb   :  { %4012 = vst [vmem:[#allocation3 + $0x40] sm:$0x1] %v7555_v2  ;;  %4013 = vst [vmem:[#allocation3 + $0x50] sm:$0x1] %v7555_v2  ;;  %v179_v39 = vrot.slane %v165_v23, %v7788_v26  ;;  %v189_v42 = vrot.slane %v86_v24, %v7788_v26  ;;  %v7808_v43 = vmax.f32 %v32_v28, %v34_v29  ;;  %vm2030_vm8 = vcmask 1044484  }
   0xc   :  { %4014 = vst [vmem:[#allocation3 + $0x60] sm:$0x1] %v7555_v2  ;;  %4015 = vst [vmem:[#allocation3 + $0x70] sm:$0x1] %v7555_v2  ;;  %v163_v44 = vcombine.high %v155_v36, %v155_v36  ;;  %v164_v45 = vcombine.high %v162_v37, %v162_v37  ;;  %v180_v46 = vcombine.high %v172_v38, %v172_v38  ;;  %v5933_v49 = vrot.slane %v155_v36, 9 }
   0xd   :  { %4016 = vst [vmem:[#allocation3 + $0x80] sm:$0x1] %v7555_v2  ;;  %4019 = vst [vmem:[#allocation3 + $0xb0] sm:$0x1] %v7555_v2  ;;  %v181_v47 = vcombine.high %v179_v39, %v179_v39  ;;  %v5935_v50 = vrot.slane %v162_v37, 9  ;;  %v5937_v51 = vrot.slane %v172_v38, 9  ;;  %v196_v10 = vrot.slane %v182_v31, %v7788_v26 }
   0xe   :  { %4020 = vst [vmem:[#allocation3 + $0xc0] sm:$0x1] %v7555_v2  ;;  %4021 = vst [vmem:[#allocation3 + $0xd0] sm:$0x1] %v7555_v2  ;;  %vm2032_vm9 = vcmask 1045509   ;;  %v5934_v52 = vrot.slane %v163_v44, 9  ;;  %v1204_v57 = vmax.f32 %v155_v36, %v5933_v49  ;;  %v197_v11 = vcombine.high %v189_v42, %v189_v42 }
   0xf   :  { %4022 = vst [vmem:[#allocation3 + $0xe0] sm:$0x1] %v7555_v2  ;;  %4023 = vst [vmem:[#allocation3 + $0xf0] sm:$0x1] %v7555_v2  ;;  %v5936_v53 = vrot.slane %v164_v45, 9  ;;  %v5938_v54 = vrot.slane %v180_v46, 9  ;;  %v1206_v58 = vmax.f32 %v162_v37, %v5935_v50  ;;  %v1208_v59 = vmax.f32 %v172_v38, %v5937_v51 }
  0x10   :  { %4024 = vst [vmem:[#allocation3 + $0x100] sm:$0x1] %v7555_v2  ;;  %4025 = vst [vmem:[#allocation3 + $0x110] sm:$0x1] %v7555_v2  ;;  %v5939_v55 = vrot.slane %v179_v39, 9  ;;  %vm2034_vm10 = vcmask 1046534   ;;  %v1205_v60 = vmax.f32 %v163_v44, %v5934_v52  ;;  %v1515_v1 = vrot.slane %v1204_v57, %v7790_v27 }
  0x11   :  { %4026 = vst [vmem:[#allocation3 + $0x120] sm:$0x1] %v7555_v2  ;;  %4029 = vst [vmem:[#allocation3 + $0x19] sm:$0x1] %v7555_v2  ;;  %v5940_v56 = vrot.slane %v181_v47, 9  ;;  %vm2036_vm11 = vcmask 1047559   ;;  %v1207_v61 = vmax.f32 %v164_v45, %v5936_v53  ;;  %v1209_v62 = vmax.f32 %v180_v46, %v5938_v54 }
  0x12   :  { %4030 = vst [vmem:[#allocation3 + $0x29] sm:$0x1] %v7555_v2  ;;  %4031 = vst [vmem:[#allocation3 + $0x39] sm:$0x1] %v7555_v2  ;;  %v1210_v63 = vmax.f32 %v179_v39, %v5939_v55  ;;  %v1531_v3 = vrot.slane %v1208_v59, %v7790_v27  ;;  %v1519_v5 = vrot.slane %v1205_v60, %v7790_v27  ;;  %v5941_v15 = vrot.slane %v189_v42, 9  ;;  %v35_v44 = vld [vmem:[%s10299_s0 + $0x78] sm:$0xff] }
  0x13   :  { %4032 = vst [vmem:[#allocation3 + $0x49] sm:$0x1] %v7555_v2  ;;  %4033 = vst [vmem:[#allocation3 + $0x59] sm:$0x1] %v7555_v2  ;;  %v1211_v0 = vmax.f32 %v181_v47, %v5940_v56  ;;  %v1527_v6 = vrot.slane %v1207_v61, %v7790_v27  ;;  %v1535_v7 = vrot.slane %v1209_v62, %v7790_v27  ;;  %v5942_v20 = vrot.slane %v197_v11, 9 }
  0x14   :  { %4034 = vst [vmem:[#allocation3 + $0x69] sm:$0x1] %v7555_v2  ;;  %4035 = vst [vmem:[#allocation3 + $0x79] sm:$0x1] %v7555_v2  ;;  %v1539_v8 = vrot.slane %v1210_v63, %v7790_v27  ;;  %v199_v12 = vcombine.high %v87_v30, %v87_v30  ;;  %v2025_v13 = vsel %vm2024_vm5, %v1519_v5, %v1515_v1  ;;  %v5943_v23 = vrot.slane %v196_v10, 9 }
  0x15   :  { %4036 = vst [vmem:[#allocation3 + $0x89] sm:$0x1] %v7555_v2  ;;  %4039 = vst [vmem:[#allocation3 + $0xb9] sm:$0x1] %v7555_v2  ;;  %v1543_v9 = vrot.slane %v1211_v0, %v7790_v27  ;;  %v206_v14 = vrot.slane %v87_v30, %v7788_v26  ;;  %v216_v16 = vcombine.high %v7798_v32, %v7798_v32  ;;  %vm2661_vm12 = vcmask 1045504  }
  0x16   :  { %4040 = vst [vmem:[#allocation3 + $0xc9] sm:$0x1] %v7555_v2  ;;  %4041 = vst [vmem:[#allocation3 + $0xd9] sm:$0x1] %v7555_v2  ;;  %v198_v18 = vcombine.high %v196_v10, %v196_v10  ;;  %v213_v19 = vrot.slane %v199_v12, %v7788_v26  ;;  %v1213_v36 = vmax.f32 %v197_v11, %v5942_v20 }
  0x17   :  { %4042 = vst [vmem:[#allocation3 + $0xe9] sm:$0x1] %v7555_v2  ;;  %4043 = vst [vmem:[#allocation3 + $0xf9] sm:$0x1] %v7555_v2  ;;  %v214_v22 = vcombine.high %v206_v14, %v206_v14  ;;  %v5945_v24 = vrot.slane %v206_v14, 9  ;;  %v1214_v39 = vmax.f32 %v196_v10, %v5943_v23  ;;  %v230_v59 = vrot.slane %v216_v16, %v7788_v26 }
  0x18   :  { %4044 = vst [vmem:[#allocation3 + $0x109] sm:$0x1] %v7555_v2  ;;  %4045 = vst [vmem:[#allocation3 + $0x119] sm:$0x1] %v7555_v2  ;;  %v215_v28 = vcombine.high %v213_v19, %v213_v19  ;;  %v5944_v29 = vrot.slane %v198_v18, 9  ;;  %v5947_v30 = vrot.slane %v213_v19, 9  ;;  %v1551_v50 = vrot.slane %v1213_v36, %v7790_v27 }
  0x19   :  { %4046 = vst [vmem:[#allocation3 + $0x129] sm:$0x1] %v7555_v2  ;;  %1344 = vst.msk [vmem:[#allocation2] sm:$0x1] %vm1343_vm3, %v7555_v2  ;;  %v1216_v46 = vmax.f32 %v206_v14, %v5945_v24  ;;  %v1555_v51 = vrot.slane %v1214_v39, %v7790_v27  ;;  %v233_v62 = vcombine.high %v7800_v33, %v7800_v33 }
  0x1a   :  { %1364 = vst.msk [vmem:[#allocation2 + $0x9] sm:$0x1] %vm1343_vm3, %v7555_v2  ;;  %1345 = vst.msk [vmem:[#allocation2 + $0x10] sm:$0x1] %vm1343_vm3, %v7555_v2  ;;  %v5948_v38 = vrot.slane %v215_v28, 9  ;;  %v240_v63 = vrot.slane %v7800_v33, %v7788_v26  ;;  %v250_v20 = vcombine.high %v7808_v43, %v7808_v43 }
  0x1b   :  { %1346 = vst.msk [vmem:[#allocation2 + $0x20] sm:$0x1] %vm1343_vm3, %v7555_v2  ;;  %1347 = vst.msk [vmem:[#allocation2 + $0x30] sm:$0x1] %vm1343_vm3, %v7555_v2  ;;  %v1563_v53 = vrot.slane %v1216_v46, %v7790_v27 }
  0x1c   :  { %1348 = vst.msk [vmem:[#allocation2 + $0x40] sm:$0x1] %vm1343_vm3, %v7555_v2  ;;  %1349 = vst.msk [vmem:[#allocation2 + $0x50] sm:$0x1] %vm1343_vm3, %v7555_v2  ;;  %v5953_v11 = vrot.slane %v240_v63, 9 }
  0x1d   :  { %1350 = vst.msk [vmem:[#allocation2 + $0x60] sm:$0x1] %vm1343_vm3, %v7555_v2  ;;  %1351 = vst.msk [vmem:[#allocation2 + $0x70] sm:$0x1] %vm1343_vm3, %v7555_v2 }
  0x1e   :  { %1352 = vst.msk [vmem:[#allocation2 + $0x80] sm:$0x1] %vm1343_vm3, %v7555_v2  ;;  %1355 = vst.msk [vmem:[#allocation2 + $0xb0] sm:$0x1] %vm1343_vm3, %v7555_v2 }
  0x1f   :  { %1356 = vst.msk [vmem:[#allocation2 + $0xc0] sm:$0x1] %vm1343_vm3, %v7555_v2  ;;  %1357 = vst.msk [vmem:[#allocation2 + $0xd0] sm:$0x1] %vm1343_vm3, %v7555_v2 }
  0x20   :  { %1358 = vst.msk [vmem:[#allocation2 + $0xe0] sm:$0x1] %vm1343_vm3, %v7555_v2  ;;  %1359 = vst.msk [vmem:[#allocation2 + $0xf0] sm:$0x1] %vm1343_vm3, %v7555_v2  ;;  %v2176_v34 = vld [vmem:[#allocation2] sm:$0xff] }
  0x21   :  { %1360 = vst.msk [vmem:[#allocation2 + $0x100] sm:$0x1] %vm1343_vm3, %v7555_v2  ;;  %1361 = vst.msk [vmem:[#allocation2 + $0x110] sm:$0x1] %vm1343_vm3, %v7555_v2  ;;  %v2177_v35 = vld [vmem:[#allocation2 + $0x8] sm:$0x3]  ;;  %6821 = vmatprep.mubr.msk.f32.mxu1 %vm1332_vm1, %v2176_v34 }
  0x22   :  { %1362 = vst.msk [vmem:[#allocation2 + $0x120] sm:$0x1] %vm1343_vm3, %v7555_v2  ;;  %1365 = vst.msk [vmem:[#allocation2 + $0x19] sm:$0x1] %vm1343_vm3, %v7555_v2  ;;  %v2250_v40 = vrot.slane %v2176_v34, 1  ;;  %v2251_v41 = vrot.slane %v2177_v35, 1  ;;  %v1212_v35 = vmax.f32 %v189_v42, %v5941_v15  ;;  %v1219_v42 = vmax.f32 %v215_v28, %v5948_v38 }
  0x23   :  { %1366 = vst.msk [vmem:[#allocation2 + $0x29] sm:$0x1] %vm1343_vm3, %v7555_v2  ;;  %1367 = vst.msk [vmem:[#allocation2 + $0x39] sm:$0x1] %vm1343_vm3, %v7555_v2  ;;  %v5946_v34 = vrot.slane %v214_v22, 9 }
  0x24   :  { %1368 = vst.msk [vmem:[#allocation2 + $0x49] sm:$0x1] %vm1343_vm3, %v7555_v2  ;;  %1369 = vst.msk [vmem:[#allocation2 + $0x59] sm:$0x1] %vm1343_vm3, %v7555_v2  ;;  %v2252_v48 = vsel %vm2249_vm4, %v2250_v40, %v2251_v41  ;;  %v1215_v40 = vmax.f32 %v198_v18, %v5944_v29  ;;  %v33_v41 = vld [vmem:[%s10299_s0 + $0x68] sm:$0xff]  ;;  %v1547_v49 = vrot.slane %v1212_v35, %v7790_v27 }
  0x25   :  { %1370 = vst.msk [vmem:[#allocation2 + $0x69] sm:$0x1] %vm1343_vm3, %v7555_v2  ;;  %1371 = vst.msk [vmem:[#allocation2 + $0x79] sm:$0x1] %vm1343_vm3, %v7555_v2  ;;  %6795 = vmatprep.mubr.msk.f32.mxu0 %vm1332_vm1, %v2252_v48  ;;  %v1217_v47 = vmax.f32 %v214_v22, %v5946_v34  ;;  %v1218_v48 = vmax.f32 %v213_v19, %v5947_v30  ;;  %v7845_v55 = vmax.f32 %v33_v41, %v35_v44  ;;  %v36_v41 = vld [vmem:[%s10299_s0 + $0x80] sm:$0xff]  ;;  %v38_v44 = vld [vmem:[%s10299_s0 + $0x90] sm:$0xff] }
  0x26   :  { %1372 = vst.msk [vmem:[#allocation2 + $0x89] sm:$0x1] %vm1343_vm3, %v7555_v2  ;;  %1375 = vst.msk [vmem:[#allocation2 + $0xb9] sm:$0x1] %vm1343_vm3, %v7555_v2  ;;  %v1559_v52 = vrot.slane %v1215_v40, %v7790_v27  ;;  %v2038_v57 = vsel %vm2024_vm5, %v1551_v50, %v1547_v49  ;;  %v1575_v60 = vrot.slane %v1219_v42, %v7790_v27 }
  0x27   :  { %1376 = vst.msk [vmem:[#allocation2 + $0xc9] sm:$0x1] %vm1343_vm3, %v7555_v2  ;;  %1377 = vst.msk [vmem:[#allocation2 + $0xd9] sm:$0x1] %vm1343_vm3, %v7555_v2  ;;  %v1567_v54 = vrot.slane %v1217_v47, %v7790_v27  ;;  %v1571_v56 = vrot.slane %v1218_v48, %v7790_v27  ;;  %v2039_v61 = vsel %vm2026_vm6, %v1555_v51, %v2038_v57 }
  0x28   :  { %1378 = vst.msk [vmem:[#allocation2 + $0xe9] sm:$0x1] %vm1343_vm3, %v7555_v2  ;;  %1379 = vst.msk [vmem:[#allocation2 + $0xf9] sm:$0x1] %vm1343_vm3, %v7555_v2  ;;  %v2040_v0 = vsel %vm2028_vm7, %v1559_v52, %v2039_v61  ;;  %v1224_v29 = vmax.f32 %v240_v63, %v5953_v11  ;;  %v257_v47 = vrot.slane %v7808_v43, %v7788_v26 }
  0x29   :  { %1380 = vst.msk [vmem:[#allocation2 + $0x109] sm:$0x1] %vm1343_vm3, %v7555_v2  ;;  %1381 = vst.msk [vmem:[#allocation2 + $0x119] sm:$0x1] %vm1343_vm3, %v7555_v2  ;;  %v2041_v5 = vsel %vm2030_vm8, %v1563_v53, %v2040_v0  ;;  %v264_v42 = vrot.slane %v250_v20, %v7788_v26  ;;  %v267_v49 = vcombine.high %v7845_v55, %v7845_v55 }
  0x2a   :  { %1382 = vst.msk [vmem:[#allocation2 + $0x129] sm:$0x1] %vm1343_vm3, %v7555_v2  ;;  %1353 = vst.msk [vmem:[#allocation2 + $0x90] sm:$0x1] %vm1343_vm3, %v7555_v2  ;;  %v1595_v39 = vrot.slane %v1224_v29, %v7790_v27  ;;  %v274_v50 = vrot.slane %v7845_v55, %v7788_v26  ;;  %v265_v52 = vcombine.high %v257_v47, %v257_v47  ;;  %v5957_v53 = vrot.slane %v257_v47, 9 }
  0x2b   :  { %1354 = vst.msk [vmem:[#allocation2 + $0xa0] sm:$0x1] %vm1343_vm3, %v7555_v2  ;;  %1363 = vst.msk [vmem:[#allocation2 + $0x130] sm:$0x1] %vm1343_vm3, %v7555_v2  ;;  %v266_v43 = vcombine.high %v264_v42, %v264_v42 }
  0x2c   :  { %1373 = vst.msk [vmem:[#allocation2 + $0x99] sm:$0x1] %vm1343_vm3, %v7555_v2  ;;  %1374 = vst.msk [vmem:[#allocation2 + $0xa9] sm:$0x1] %vm1343_vm3, %v7555_v2  ;;  %v5958_v55 = vrot.slane %v265_v52, 9 }
  0x2d   :  { %1383 = vst.msk [vmem:[#allocation2 + $0x139] sm:$0x1] %vm1343_vm3, %v7555_v2  ;;  %4008 = vst [vmem:[#allocation3] sm:$0x1] %v7555_v2 }
  0x2e   :  { %4017 = vst [vmem:[#allocation3 + $0x90] sm:$0x1] %v7555_v2  ;;  %4018 = vst [vmem:[#allocation3 + $0xa0] sm:$0x1] %v7555_v2  ;;  %v1229_v11 = vmax.f32 %v265_v52, %v5958_v55  ;;  %v6114_v55 = vld [vmem:[%s10298_s1 + $0xc] sm:$0xf] }
  0x2f   :  { %4027 = vst [vmem:[#allocation3 + $0x130] sm:$0x1] %v7555_v2  ;;  %4028 = vst [vmem:[#allocation3 + $0x9] sm:$0x1] %v7555_v2  ;;  %6871 = vmatprep.subr.msk.mxu1 %vm2332_vm0, %v6114_v55 }
  0x30   :  { %4037 = vst [vmem:[#allocation3 + $0x99] sm:$0x1] %v7555_v2  ;;  %4038 = vst [vmem:[#allocation3 + $0xa9] sm:$0x1] %v7555_v2  ;;  %v1615_v20 = vrot.slane %v1229_v11, %v7790_v27 }
  0x31   :  { %4047 = vst [vmem:[#allocation3 + $0x139] sm:$0x1] %v7555_v2  ;;  %v1523_v2 = vrot.slane %v1206_v58, %v7790_v27  ;;  %v223_v58 = vrot.slane %v7798_v32, %v7788_v26  ;;  %v247_v32 = vrot.slane %v233_v62, %v7788_v26 }
  0x33   :  { %v2027_v17 = vsel %vm2026_vm6, %v1523_v2, %v2025_v13  ;;  %v231_v1 = vcombine.high %v223_v58, %v223_v58  ;;  %v232_v2 = vcombine.high %v230_v59, %v230_v59  ;;  %v249_v14 = vcombine.high %v247_v32, %v247_v32 }
  0x34   :  { %v2029_v21 = vsel %vm2028_vm7, %v1527_v6, %v2027_v17  ;;  %v248_v6 = vcombine.high %v240_v63, %v240_v63  ;;  %v5955_v16 = vrot.slane %v247_v32, 9 }
  0x35   :  { %v2031_v25 = vsel %vm2030_vm8, %v1531_v3, %v2029_v21  ;;  %v5949_v3 = vrot.slane %v223_v58, 9  ;;  %v5952_v10 = vrot.slane %v232_v2, 9  ;;  %v5956_v21 = vrot.slane %v249_v14, 9 }
  0x36   :  { %v2033_v31 = vsel %vm2032_vm9, %v1535_v7, %v2031_v25  ;;  %v5951_v7 = vrot.slane %v230_v59, 9  ;;  %v5954_v15 = vrot.slane %v248_v6, 9 }
  0x37   :  { %v2035_v37 = vsel %vm2034_vm10, %v1539_v8, %v2033_v31  ;;  %v2042_v8 = vsel %vm2032_vm9, %v1567_v54, %v2041_v5  ;;  %v1220_v22 = vmax.f32 %v223_v58, %v5949_v3  ;;  %v1223_v28 = vmax.f32 %v232_v2, %v5952_v10 }
  0x38   :  { %v2037_v45 = vsel %vm2036_vm11, %v1543_v9, %v2035_v37  ;;  %v5950_v9 = vrot.slane %v231_v1, 9  ;;  %v2043_v33 = vsel %vm2034_vm10, %v1571_v56, %v2042_v8  ;;  %v1222_v24 = vmax.f32 %v230_v59, %v5951_v7 }
  0x39   :  { %2160 = vst.msk [vmem:[#allocation2 + $0x11] sm:$0xff] %vm1332_vm1, %v2037_v45  ;;  %v2044_v19 = vsel %vm2036_vm11, %v1575_v60, %v2043_v33  ;;  %v1225_v30 = vmax.f32 %v248_v6, %v5954_v15  ;;  %v1226_v31 = vmax.f32 %v247_v32, %v5955_v16  ;;  %v1227_v34 = vmax.f32 %v249_v14, %v5956_v21  ;;  %v37_v15 = vld [vmem:[%s10299_s0 + $0x88] sm:$0xff]  ;;  %v39_v16 = vld [vmem:[%s10299_s0 + $0x98] sm:$0xff]  ;;  %v40_v21 = vld [vmem:[%s10299_s0 + $0xa0] sm:$0xff] }
  0x3a   :  { %2161 = vst.msk [vmem:[#allocation2 + $0x21] sm:$0xff] %vm1332_vm1, %v2044_v19  ;;  %v1221_v23 = vmax.f32 %v231_v1, %v5950_v9  ;;  %v1579_v35 = vrot.slane %v1220_v22, %v7790_v27  ;;  %v1587_v37 = vrot.slane %v1222_v24, %v7790_v27  ;;  %v1591_v38 = vrot.slane %v1223_v28, %v7790_v27  ;;  %v42_v22 = vld [vmem:[%s10299_s0 + $0xb0] sm:$0xff] }
  0x3b   :  { %v1599_v40 = vrot.slane %v1225_v30, %v7790_v27  ;;  %v1603_v45 = vrot.slane %v1226_v31, %v7790_v27  ;;  %v92_v54 = vmax.f32 %v36_v41, %v38_v44  ;;  %v281_v59 = vrot.slane %v267_v49, %v7788_v26  ;;  %v41_v30 = vld [vmem:[%s10299_s0 + $0xa8] sm:$0xff]  ;;  %v43_v31 = vld [vmem:[%s10299_s0 + $0xb8] sm:$0xff] }
  0x3c   :  { %v1583_v36 = vrot.slane %v1221_v23, %v7790_v27  ;;  %v282_v60 = vcombine.high %v274_v50, %v274_v50  ;;  %v5959_v2 = vrot.slane %v264_v42, 9  ;;  %v5960_v3 = vrot.slane %v266_v43, 9 }
  0x3d   :  { %v283_v1 = vcombine.high %v281_v59, %v281_v59  ;;  %v5961_v6 = vrot.slane %v274_v50, 9  ;;  %v5963_v8 = vrot.slane %v281_v59, 9  ;;  %v1228_v10 = vmax.f32 %v257_v47, %v5957_v53 }
  0x3e   :  { %v2045_v46 = vsel %vm2024_vm5, %v1583_v36, %v1579_v35  ;;  %v5962_v7 = vrot.slane %v282_v60, 9  ;;  %v7940_v41 = vmax.f32 %v40_v21, %v42_v22 }
  0x3f   :  { %v2046_v48 = vsel %vm2026_vm6, %v1587_v37, %v2045_v46  ;;  %v5964_v9 = vrot.slane %v283_v1, 9  ;;  %v1232_v33 = vmax.f32 %v274_v50, %v5961_v6  ;;  %v1611_v19 = vrot.slane %v1228_v10, %v7790_v27 }
  0x40   :  { %v2178_v12 = vld [vmem:[#allocation2 + $0x10] sm:$0xff]  ;;  %v2179_v13 = vld [vmem:[#allocation2 + $0x18] sm:$0x3]  ;;  %v2047_v51 = vsel %vm2028_vm7, %v1591_v38, %v2046_v48  ;;  %v1233_v14 = vmax.f32 %v282_v60, %v5962_v7  ;;  %v93_v37 = vmax.f32 %v37_v15, %v39_v16  ;;  %v7944_v46 = vmax.f32 %v41_v30, %v43_v31 }
  0x41   :  { %v2253_v17 = vrot.slane %v2178_v12, 1  ;;  %v2254_v18 = vrot.slane %v2179_v13, 1  ;;  %6822 = vmatmul.mubr.msk.f32.vlgmr.msra.gmra.mxu1 %vm1332_vm1, %v2178_v12  ;;  %v2180_v56 = vld [vmem:[#allocation2 + $0x20] sm:$0xff]  ;;  %v2181_v57 = vld [vmem:[#allocation2 + $0x28] sm:$0x3]  ;;  %v2048_v58 = vsel %vm2030_vm8, %v1595_v39, %v2047_v51  ;;  %v1230_v12 = vmax.f32 %v264_v42, %v5959_v2 }
  0x42   :  { %v2256_v61 = vrot.slane %v2180_v56, 1  ;;  %v2257_v62 = vrot.slane %v2181_v57, 1  ;;  %6824 = vmatprep.mubr.msk.f32.mxu1 %vm1332_vm1, %v2180_v56  ;;  %v2049_v63 = vsel %vm2032_vm9, %v1599_v40, %v2048_v58  ;;  %v1231_v13 = vmax.f32 %v266_v43, %v5960_v3  ;;  %6872 = vmatpush3.msk.msra.mxu1 %vm2332_vm0, %v6114_v55 }
  0x43   :  { %v7869_v25 = vsel %vm2249_vm4, %v2253_v17, %v2254_v18  ;;  %v2050_v0 = vsel %vm2034_vm10, %v1603_v45, %v2049_v63  ;;  %v1234_v17 = vmax.f32 %v281_v59, %v5963_v8  ;;  %v1235_v18 = vmax.f32 %v283_v1, %v5964_v9 }
  0x44   :  { %6796 = vmatmul.mubr.msk.f32.vlgmr.msra.gmra.mxu0 %vm1332_vm1, %v7869_v25  ;;  %v7905_v5 = vsel %vm2249_vm4, %v2256_v61, %v2257_v62  ;;  %v1619_v23 = vrot.slane %v1230_v12, %v7790_v27  ;;  %v1623_v24 = vrot.slane %v1231_v13, %v7790_v27  ;;  %v1627_v28 = vrot.slane %v1232_v33, %v7790_v27 }
  0x45   :  { %6846 = vmatpush3.msk.msra.mxu0 %vm2332_vm0, %v7744_v4  ;;  %v1607_v4 = vrot.slane %v1227_v34, %v7790_v27  ;;  %6798 = vmatprep.mubr.msk.f32.mxu0 %vm1332_vm1, %v7905_v5  ;;  %v1631_v29 = vrot.slane %v1233_v14, %v7790_v27  ;;  %v1635_v34 = vrot.slane %v1234_v17, %v7790_v27  ;;  %v44_v17 = vld [vmem:[%s10299_s0 + $0xc0] sm:$0xff] }
  0x46   :  { %v1639_v35 = vrot.slane %v1235_v18, %v7790_v27  ;;  %v2052_v36 = vsel %vm2024_vm5, %v1615_v20, %v1611_v19  ;;  %v284_v39 = vcombine.high %v92_v54, %v92_v54  ;;  %v291_v40 = vrot.slane %v92_v54, %v7788_v26  ;;  %v46_v18 = vld [vmem:[%s10299_s0 + $0xd0] sm:$0xff] }
  0x47   :  { %v2051_v32 = vsel %vm2036_vm11, %v1607_v4, %v2050_v0  ;;  %v2053_v38 = vsel %vm2026_vm6, %v1619_v23, %v2052_v36  ;;  %v301_v45 = vcombine.high %v93_v37, %v93_v37  ;;  %v308_v4 = vrot.slane %v93_v37, %v7788_v26 }
  0x48   :  { %2162 = vst.msk [vmem:[#allocation2 + $0x31] sm:$0xff] %vm1332_vm1, %v2051_v32  ;;  %v2054_v44 = vsel %vm2028_vm7, %v1623_v24, %v2053_v38  ;;  %v298_v49 = vrot.slane %v284_v39, %v7788_v26  ;;  %v299_v50 = vcombine.high %v291_v40, %v291_v40  ;;  %v5965_v51 = vrot.slane %v291_v40, 9  ;;  %v6132_v32 = vld [vmem:[%s10298_s1 + $0x10] sm:$0xf] }
  0x49   :  { %v2055_v42 = vsel %vm2030_vm8, %v1627_v28, %v2054_v44  ;;  %v315_v56 = vrot.slane %v301_v45, %v7788_v26  ;;  %v316_v43 = vcombine.high %v308_v4, %v308_v4  ;;  %v5969_v1 = vrot.slane %v308_v4, 9  ;;  %6897 = vmatprep.subr.msk.mxu0 %vm2332_vm0, %v6132_v32 }
  0x4a   :  { %v2056_v54 = vsel %vm2032_vm9, %v1631_v29, %v2055_v42  ;;  %v300_v58 = vcombine.high %v298_v49, %v298_v49  ;;  %v5966_v59 = vrot.slane %v299_v50, 9  ;;  %v5967_v63 = vrot.slane %v298_v49, 9 }
  0x4b   :  { %v2057_v57 = vsel %vm2034_vm10, %v1635_v34, %v2056_v54  ;;  %v317_v62 = vcombine.high %v315_v56, %v315_v56  ;;  %v5970_v2 = vrot.slane %v316_v43, 9  ;;  %v5971_v3 = vrot.slane %v315_v56, 9 }
  0x4c   :  { %v2058_v61 = vsel %vm2036_vm11, %v1639_v35, %v2057_v57  ;;  %v5968_v0 = vrot.slane %v300_v58, 9  ;;  %v1236_v7 = vmax.f32 %v291_v40, %v5965_v51  ;;  %v1237_v8 = vmax.f32 %v299_v50, %v5966_v59 }
  0x4d   :  { %2163 = vst.msk [vmem:[#allocation2 + $0x41] sm:$0xff] %vm1332_vm1, %v2058_v61  ;;  %v5972_v6 = vrot.slane %v317_v62, 9  ;;  %v1238_v9 = vmax.f32 %v298_v49, %v5967_v63  ;;  %v1240_v11 = vmax.f32 %v308_v4, %v5969_v1  ;;  %v1241_v12 = vmax.f32 %v316_v43, %v5970_v2  ;;  %v45_v2 = vld [vmem:[%s10299_s0 + $0xc8] sm:$0xff] }
  0x4e   :  { %v1239_v10 = vmax.f32 %v300_v58, %v5968_v0  ;;  %v1242_v13 = vmax.f32 %v315_v56, %v5971_v3  ;;  %v1643_v14 = vrot.slane %v1236_v7, %v7790_v27  ;;  %v1647_v15 = vrot.slane %v1237_v8, %v7790_v27  ;;  %v47_v3 = vld [vmem:[%s10299_s0 + $0xd8] sm:$0xff] }
  0x4f   :  { %v2182_v47 = vld [vmem:[#allocation2 + $0x30] sm:$0xff]  ;;  %v2183_v48 = vld [vmem:[#allocation2 + $0x38] sm:$0x3]  ;;  %v1243_v33 = vmax.f32 %v317_v62, %v5972_v6  ;;  %v1651_v16 = vrot.slane %v1238_v9, %v7790_v27  ;;  %v1659_v20 = vrot.slane %v1240_v11, %v7790_v27  ;;  %v1663_v21 = vrot.slane %v1241_v12, %v7790_v27  ;;  %v8014_v9 = vld [vmem:[#allocation2 + $0xa0] sm:$0xff] }
  0x50   :  { %v2259_v52 = vrot.slane %v2182_v47, 1  ;;  %v2260_v53 = vrot.slane %v2183_v48, 1  ;;  %6825 = vmatmul.mubr.msk.f32.gmra.mxu1 %vm1332_vm1, %v2182_v47  ;;  %v1655_v19 = vrot.slane %v1239_v10, %v7790_v27  ;;  %v1667_v22 = vrot.slane %v1242_v13, %v7790_v27 }
  0x51   :  { %v1671_v23 = vrot.slane %v1243_v33, %v7790_v27  ;;  %v2059_v24 = vsel %vm2024_vm5, %v1647_v15, %v1643_v14  ;;  %v318_v28 = vcombine.high %v7940_v41, %v7940_v41  ;;  %v325_v29 = vrot.slane %v7940_v41, %v7788_v26  ;;  %v8020_v33 = vld [vmem:[#allocation2 + $0xa8] sm:$0x3] }
  0x52   :  { %v7953_v60 = vsel %vm2249_vm4, %v2259_v52, %v2260_v53  ;;  %v2060_v30 = vsel %vm2026_vm6, %v1651_v16, %v2059_v24  ;;  %v335_v31 = vcombine.high %v7944_v46, %v7944_v46  ;;  %v342_v34 = vrot.slane %v7944_v46, %v7788_v26 }
  0x53   :  { %6799 = vmatmul.mubr.msk.f32.gmra.mxu0 %vm1332_vm1, %v7953_v60  ;;  %v96_v35 = vmax.f32 %v44_v17, %v46_v18  ;;  %v2061_v38 = vsel %vm2028_vm7, %v1655_v19, %v2060_v30  ;;  %v332_v39 = vrot.slane %v318_v28, %v7788_v26  ;;  %v333_v40 = vcombine.high %v325_v29, %v325_v29 }
  0x54   :  { %v2184_v36 = vld [vmem:[#allocation2 + $0x40] sm:$0xff]  ;;  %v2185_v37 = vld [vmem:[#allocation2 + $0x48] sm:$0x3]  ;;  %v5973_v44 = vrot.slane %v325_v29, 9  ;;  %v2062_v41 = vsel %vm2030_vm8, %v1659_v20, %v2061_v38  ;;  %v349_v47 = vrot.slane %v335_v31, %v7788_v26  ;;  %v350_v42 = vcombine.high %v342_v34, %v342_v34 }
  0x55   :  { %v2262_v45 = vrot.slane %v2184_v36, 1  ;;  %v2263_v4 = vrot.slane %v2185_v37, 1  ;;  %6827 = vmatprep.mubr.msk.f32.mxu1 %vm1332_vm1, %v2184_v36  ;;  %v2063_v48 = vsel %vm2032_vm9, %v1663_v21, %v2062_v41  ;;  %v334_v46 = vcombine.high %v332_v39, %v332_v39 }
  0x56   :  { %v5974_v49 = vrot.slane %v333_v40, 9  ;;  %v2064_v51 = vsel %vm2034_vm10, %v1667_v22, %v2063_v48  ;;  %v351_v52 = vcombine.high %v349_v47, %v349_v47  ;;  %v5975_v53 = vrot.slane %v332_v39, 9 }
  0x57   :  { %v7999_v50 = vsel %vm2249_vm4, %v2262_v45, %v2263_v4  ;;  %v2065_v54 = vsel %vm2036_vm11, %v1671_v23, %v2064_v51  ;;  %v5976_v56 = vrot.slane %v334_v46, 9  ;;  %v5977_v57 = vrot.slane %v342_v34, 9 }
  0x58   :  { %6801 = vmatprep.mubr.msk.f32.mxu0 %vm1332_vm1, %v7999_v50  ;;  %v5978_v58 = vrot.slane %v350_v42, 9  ;;  %2164 = vst.msk [vmem:[#allocation2 + $0x51] sm:$0xff] %vm1332_vm1, %v2065_v54  ;;  %v5979_v43 = vrot.slane %v349_v47, 9  ;;  %v5980_v59 = vrot.slane %v351_v52, 9  ;;  %v1244_v61 = vmax.f32 %v325_v29, %v5973_v44 }
  0x59   :  { %v1245_v62 = vmax.f32 %v333_v40, %v5974_v49  ;;  %v1246_v63 = vmax.f32 %v332_v39, %v5975_v53  ;;  %v1247_v55 = vmax.f32 %v334_v46, %v5976_v56  ;;  %v1248_v0 = vmax.f32 %v342_v34, %v5977_v57 }
  0x5a   :  { %v1249_v1 = vmax.f32 %v350_v42, %v5978_v58  ;;  %v1250_v32 = vmax.f32 %v349_v47, %v5979_v43  ;;  %v1251_v6 = vmax.f32 %v351_v52, %v5980_v59  ;;  %v1675_v7 = vrot.slane %v1244_v61, %v7790_v27  ;;  %v52_v43 = vld [vmem:[%s10299_s0 + $0x100] sm:$0xff]  ;;  %v53_v59 = vld [vmem:[%s10299_s0 + $0x108] sm:$0xff] }
  0x5b   :  { %v1679_v8 = vrot.slane %v1245_v62, %v7790_v27  ;;  %v1683_v10 = vrot.slane %v1246_v63, %v7790_v27  ;;  %v1687_v11 = vrot.slane %v1247_v55, %v7790_v27  ;;  %v1691_v12 = vrot.slane %v1248_v0, %v7790_v27  ;;  %v54_v0 = vld [vmem:[%s10299_s0 + $0x110] sm:$0xff] }
  0x5c   :  { %v1695_v13 = vrot.slane %v1249_v1, %v7790_v27  ;;  %v1699_v14 = vrot.slane %v1250_v32, %v7790_v27  ;;  %v1703_v15 = vrot.slane %v1251_v6, %v7790_v27  ;;  %v97_v17 = vmax.f32 %v45_v2, %v47_v3  ;;  %v55_v1 = vld [vmem:[%s10299_s0 + $0x118] sm:$0xff]  ;;  %v56_v2 = vld [vmem:[%s10299_s0 + $0x120] sm:$0xff] }
  0x5d   :  { %v2066_v16 = vsel %vm2024_vm5, %v1679_v8, %v1675_v7  ;;  %v352_v19 = vcombine.high %v96_v35, %v96_v35  ;;  %v359_v20 = vrot.slane %v96_v35, %v7788_v26  ;;  %v2274_v21 = vrot.slane %v8014_v9, 1  ;;  %v57_v8 = vld [vmem:[%s10299_s0 + $0x128] sm:$0xff] }
  0x5e   :  { %v2067_v18 = vsel %vm2026_vm6, %v1683_v10, %v2066_v16  ;;  %v369_v23 = vcombine.high %v97_v17, %v97_v17  ;;  %v376_v24 = vrot.slane %v97_v17, %v7788_v26  ;;  %v2275_v28 = vrot.slane %v8020_v33, 1  ;;  %v58_v10 = vld [vmem:[%s10299_s0 + $0x130] sm:$0xff] }
  0x5f   :  { %v2068_v22 = vsel %vm2028_vm7, %v1687_v11, %v2067_v18  ;;  %v2186_v29 = vld [vmem:[#allocation2 + $0x50] sm:$0xff]  ;;  %v2187_v30 = vld [vmem:[#allocation2 + $0x58] sm:$0x3]  ;;  %v366_v34 = vrot.slane %v352_v19, %v7788_v26  ;;  %v367_v36 = vcombine.high %v359_v20, %v359_v20  ;;  %v5981_v37 = vrot.slane %v359_v20, 9 }
  0x60   :  { %v2069_v31 = vsel %vm2030_vm8, %v1691_v12, %v2068_v22  ;;  %v2265_v38 = vrot.slane %v2186_v29, 1  ;;  %v2266_v39 = vrot.slane %v2187_v30, 1  ;;  %6828 = vmatmul.mubr.msk.f32.gmra.mxu1 %vm1332_vm1, %v2186_v29  ;;  %v383_v40 = vrot.slane %v369_v23, %v7788_v26  ;;  %v59_v11 = vld [vmem:[%s10299_s0 + $0x138] sm:$0xff]  ;;  %v62_v16 = vld [vmem:[%s10299_s0 + $0x150] sm:$0xff] }
  0x61   :  { %v2070_v35 = vsel %vm2032_vm9, %v1695_v13, %v2069_v31  ;;  %v368_v45 = vcombine.high %v366_v34, %v366_v34  ;;  %v384_v4 = vcombine.high %v376_v24, %v376_v24  ;;  %v5982_v41 = vrot.slane %v367_v36, 9 }
  0x62   :  { %v2071_v44 = vsel %vm2034_vm10, %v1699_v14, %v2070_v35  ;;  %v8038_v47 = vsel %vm2249_vm4, %v2265_v38, %v2266_v39  ;;  %v385_v46 = vcombine.high %v383_v40, %v383_v40  ;;  %v5983_v42 = vrot.slane %v366_v34, 9 }
  0x63   :  { %v2072_v48 = vsel %vm2036_vm11, %v1703_v15, %v2071_v44  ;;  %6802 = vmatmul.mubr.msk.f32.gmra.mxu0 %vm1332_vm1, %v8038_v47  ;;  %v5984_v49 = vrot.slane %v368_v45, 9  ;;  %v5985_v51 = vrot.slane %v376_v24, 9  ;;  %v5986_v52 = vrot.slane %v384_v4, 9  ;;  %v60_v15 = vld [vmem:[%s10299_s0 + $0x140] sm:$0xff] }
  0x64   :  { %2165 = vst.msk [vmem:[#allocation2 + $0x61] sm:$0xff] %vm1332_vm1, %v2072_v48  ;;  %v5987_v53 = vrot.slane %v383_v40, 9  ;;  %v5988_v54 = vrot.slane %v385_v46, 9  ;;  %v1252_v56 = vmax.f32 %v359_v20, %v5981_v37  ;;  %v1253_v57 = vmax.f32 %v367_v36, %v5982_v41 }
  0x65   :  { %v1254_v58 = vmax.f32 %v366_v34, %v5983_v42  ;;  %v1255_v61 = vmax.f32 %v368_v45, %v5984_v49  ;;  %v1256_v62 = vmax.f32 %v376_v24, %v5985_v51  ;;  %v1257_v63 = vmax.f32 %v384_v4, %v5986_v52 }
  0x66   :  { %v1258_v55 = vmax.f32 %v383_v40, %v5987_v53  ;;  %v1259_v3 = vmax.f32 %v385_v46, %v5988_v54  ;;  %v1707_v32 = vrot.slane %v1252_v56, %v7790_v27  ;;  %v1711_v6 = vrot.slane %v1253_v57, %v7790_v27  ;;  %v8107_v40 = vld [vmem:[%s10298_s1 + $0x14] sm:$0xf] }
  0x67   :  { %v1715_v7 = vrot.slane %v1254_v58, %v7790_v27  ;;  %v1719_v12 = vrot.slane %v1255_v61, %v7790_v27  ;;  %v1723_v13 = vrot.slane %v1256_v62, %v7790_v27  ;;  %v1727_v33 = vrot.slane %v1257_v63, %v7790_v27  ;;  %6923 = vmatprep.subr.msk.mxu1 %vm2332_vm0, %v8107_v40 }
  0x68   :  { %v1731_v14 = vrot.slane %v1258_v55, %v7790_v27  ;;  %v1735_v17 = vrot.slane %v1259_v3, %v7790_v27  ;;  %v2073_v18 = vsel %vm2024_vm5, %v1711_v6, %v1707_v32  ;;  %v8084_v19 = vsel %vm2249_vm4, %v2274_v21, %v2275_v28 }
  0x69   :  { %v100_v20 = vmax.f32 %v52_v43, %v54_v0  ;;  %v2074_v22 = vsel %vm2026_vm6, %v1715_v7, %v2073_v18  ;;  %v101_v23 = vmax.f32 %v53_v59, %v55_v1  ;;  %v8087_v24 = vmax.f32 %v56_v2, %v58_v10 }
  0x6a   :  { %v8089_v29 = vmax.f32 %v57_v8, %v59_v11  ;;  %v2075_v34 = vsel %vm2028_vm7, %v1719_v12, %v2074_v22  ;;  %v8097_v38 = vmax.f32 %v60_v15, %v62_v16 }
  0x6b   :  { %v8091_v30 = vld [vmem:[#allocation2 + $0x60] sm:$0xff]  ;;  %v8093_v31 = vld [vmem:[#allocation2 + $0x68] sm:$0x3]  ;;  %v420_v36 = vcombine.high %v100_v20, %v100_v20  ;;  %v427_v37 = vrot.slane %v100_v20, %v7788_v26  ;;  %v2076_v39 = vsel %vm2030_vm8, %v1723_v13, %v2075_v34  ;;  %v437_v35 = vcombine.high %v101_v23, %v101_v23 }
  0x6c   :  { %v2268_v21 = vrot.slane %v8091_v30, 1  ;;  %v2269_v28 = vrot.slane %v8093_v31, 1  ;;  %6830 = vmatprep.mubr.msk.f32.mxu1 %vm1332_vm1, %v8091_v30  ;;  %v2077_v44 = vsel %vm2032_vm9, %v1727_v33, %v2076_v39  ;;  %v444_v41 = vrot.slane %v101_v23, %v7788_v26  ;;  %v61_v13 = vld [vmem:[%s10299_s0 + $0x148] sm:$0xff]  ;;  %v63_v33 = vld [vmem:[%s10299_s0 + $0x158] sm:$0xff] }
  0x6d   :  { %v434_v45 = vrot.slane %v420_v36, %v7788_v26  ;;  %v435_v4 = vcombine.high %v427_v37, %v427_v37  ;;  %v2078_v46 = vsel %vm2034_vm10, %v1731_v14, %v2077_v44  ;;  %v451_v42 = vrot.slane %v437_v35, %v7788_v26 }
  0x6e   :  { %v8115_v48 = vsel %vm2249_vm4, %v2268_v21, %v2269_v28  ;;  %v5997_v49 = vrot.slane %v427_v37, 9  ;;  %v2079_v51 = vsel %vm2036_vm11, %v1735_v17, %v2078_v46  ;;  %v452_v53 = vcombine.high %v444_v41, %v444_v41 }
  0x6f   :  { %6804 = vmatprep.mubr.msk.f32.mxu0 %vm1332_vm1, %v8115_v48  ;;  %v436_v52 = vcombine.high %v434_v45, %v434_v45  ;;  %v5998_v54 = vrot.slane %v435_v4, 9  ;;  %2166 = vst.msk [vmem:[#allocation2 + $0x71] sm:$0xff] %vm1332_vm1, %v2079_v51  ;;  %v453_v56 = vcombine.high %v451_v42, %v451_v42  ;;  %v5999_v57 = vrot.slane %v434_v45, 9 }
  0x70   :  { %v6001_v58 = vrot.slane %v444_v41, 9  ;;  %v6003_v43 = vrot.slane %v451_v42, 9  ;;  %v6002_v61 = vrot.slane %v452_v53, 9  ;;  %v1268_v62 = vmax.f32 %v427_v37, %v5997_v49 }
  0x71   :  { %v6000_v59 = vrot.slane %v436_v52, 9  ;;  %v1269_v63 = vmax.f32 %v435_v4, %v5998_v54  ;;  %v6004_v55 = vrot.slane %v453_v56, 9  ;;  %v1270_v0 = vmax.f32 %v434_v45, %v5999_v57 }
  0x72   :  { %v1272_v1 = vmax.f32 %v444_v41, %v6001_v58  ;;  %v1274_v2 = vmax.f32 %v451_v42, %v6003_v43  ;;  %v1273_v32 = vmax.f32 %v452_v53, %v6002_v61  ;;  %v1771_v6 = vrot.slane %v1268_v62, %v7790_v27 }
  0x73   :  { %v1271_v3 = vmax.f32 %v436_v52, %v6000_v59  ;;  %v1775_v7 = vrot.slane %v1269_v63, %v7790_v27  ;;  %v1275_v8 = vmax.f32 %v453_v56, %v6004_v55  ;;  %v1779_v10 = vrot.slane %v1270_v0, %v7790_v27 }
  0x74   :  { %v1787_v11 = vrot.slane %v1272_v1, %v7790_v27  ;;  %v1795_v12 = vrot.slane %v1274_v2, %v7790_v27  ;;  %v1791_v15 = vrot.slane %v1273_v32, %v7790_v27  ;;  %v454_v17 = vcombine.high %v8087_v24, %v8087_v24 }
  0x75   :  { %v1783_v14 = vrot.slane %v1271_v3, %v7790_v27  ;;  %v2087_v16 = vsel %vm2024_vm5, %v1775_v7, %v1771_v6  ;;  %v1799_v18 = vrot.slane %v1275_v8, %v7790_v27  ;;  %v461_v22 = vrot.slane %v8087_v24, %v7788_v26  ;;  %v64_v8 = vld [vmem:[%s10299_s0 + $0x160] sm:$0xff] }
  0x76   :  { %v2088_v20 = vsel %vm2026_vm6, %v1779_v10, %v2087_v16  ;;  %v471_v23 = vcombine.high %v8089_v29, %v8089_v29  ;;  %v8145_v34 = vld [vmem:[#allocation2 + $0x70] sm:$0xff]  ;;  %v8147_v36 = vld [vmem:[#allocation2 + $0x78] sm:$0x3]  ;;  %v468_v21 = vrot.slane %v454_v17, %v7788_v26  ;;  %v478_v28 = vrot.slane %v8089_v29, %v7788_v26 }
  0x77   :  { %v2089_v37 = vsel %vm2028_vm7, %v1783_v14, %v2088_v20  ;;  %v105_v39 = vmax.f32 %v61_v13, %v63_v33  ;;  %v2271_v35 = vrot.slane %v8145_v34, 1  ;;  %v2272_v44 = vrot.slane %v8147_v36, 1  ;;  %6831 = vmatmul.mubr.msk.f32.gmra.mxu1 %vm1332_vm1, %v8145_v34  ;;  %v66_v10 = vld [vmem:[%s10299_s0 + $0x170] sm:$0xff] }
  0x78   :  { %v2090_v24 = vsel %vm2030_vm8, %v1787_v11, %v2089_v37  ;;  %v469_v45 = vcombine.high %v461_v22, %v461_v22  ;;  %6833 = vmatprep.mubr.msk.f32.mxu1 %vm1332_vm1, %v8014_v9  ;;  %v470_v41 = vcombine.high %v468_v21, %v468_v21  ;;  %v485_v46 = vrot.slane %v471_v23, %v7788_v26 }
  0x79   :  { %v2091_v4 = vsel %vm2032_vm9, %v1791_v15, %v2090_v24  ;;  %v486_v29 = vcombine.high %v478_v28, %v478_v28  ;;  %v8163_v42 = vsel %vm2249_vm4, %v2271_v35, %v2272_v44  ;;  %v6005_v51 = vrot.slane %v461_v22, 9 }
  0x7a   :  { %10319 = vst [vmem:[#allocation4_spill] sm:$0xff] %v8163_v42  ;;  %v2092_v49 = vsel %vm2034_vm10, %v1795_v12, %v2091_v4  ;;  %v6006_v52 = vrot.slane %v469_v45, 9  ;;  %6805 = vmatmul.mubr.msk.f32.gmra.mxu0 %vm1332_vm1, %v8163_v42  ;;  %v487_v54 = vcombine.high %v485_v46, %v485_v46  ;;  %v6007_v9 = vrot.slane %v468_v21, 9 }
  0x7b   :  { %v2093_v53 = vsel %vm2036_vm11, %v1799_v18, %v2092_v49  ;;  %v6008_v56 = vrot.slane %v470_v41, 9  ;;  %6807 = vmatprep.mubr.msk.f32.mxu0 %vm1332_vm1, %v8084_v19  ;;  %v6009_v57 = vrot.slane %v478_v28, 9  ;;  %v6010_v58 = vrot.slane %v486_v29, 9 }
  0x7c   :  { %2168 = vst.msk [vmem:[#allocation2 + $0xb1] sm:$0xff] %vm1332_vm1, %v2093_v53  ;;  %v6011_v43 = vrot.slane %v485_v46, 9  ;;  %v1276_v59 = vmax.f32 %v461_v22, %v6005_v51  ;;  %v6012_v61 = vrot.slane %v487_v54, 9  ;;  %v1277_v62 = vmax.f32 %v469_v45, %v6006_v52 }
  0x7d   :  { %v1278_v63 = vmax.f32 %v468_v21, %v6007_v9  ;;  %v1279_v55 = vmax.f32 %v470_v41, %v6008_v56  ;;  %v1280_v0 = vmax.f32 %v478_v28, %v6009_v57  ;;  %v1281_v1 = vmax.f32 %v486_v29, %v6010_v58 }
  0x7e   :  { %v1282_v2 = vmax.f32 %v485_v46, %v6011_v43  ;;  %v1803_v3 = vrot.slane %v1276_v59, %v7790_v27  ;;  %v1283_v32 = vmax.f32 %v487_v54, %v6012_v61  ;;  %v1807_v6 = vrot.slane %v1277_v62, %v7790_v27 }
  0x7f   :  { %v1811_v19 = vrot.slane %v1278_v63, %v7790_v27  ;;  %v1815_v7 = vrot.slane %v1279_v55, %v7790_v27  ;;  %v1819_v11 = vrot.slane %v1280_v0, %v7790_v27  ;;  %v1823_v12 = vrot.slane %v1281_v1, %v7790_v27 }
  0x80   :  { %v1827_v13 = vrot.slane %v1282_v2, %v7790_v27  ;;  %v488_v33 = vcombine.high %v8097_v38, %v8097_v38  ;;  %v1831_v14 = vrot.slane %v1283_v32, %v7790_v27  ;;  %v2094_v15 = vsel %vm2024_vm5, %v1807_v6, %v1803_v3  ;;  %v65_v2 = vld [vmem:[%s10299_s0 + $0x168] sm:$0xff]  ;;  %v67_v3 = vld [vmem:[%s10299_s0 + $0x178] sm:$0xff]  ;;  %v68_v32 = vld [vmem:[%s10299_s0 + $0x180] sm:$0xff] }
  0x81   :  { %v495_v16 = vrot.slane %v8097_v38, %v7788_v26  ;;  %v505_v17 = vcombine.high %v105_v39, %v105_v39  ;;  %v2095_v18 = vsel %vm2026_vm6, %v1811_v19, %v2094_v15  ;;  %v512_v22 = vrot.slane %v105_v39, %v7788_v26 }
  0x82   :  { %v502_v20 = vrot.slane %v488_v33, %v7788_v26  ;;  %v106_v23 = vmax.f32 %v64_v8, %v66_v10  ;;  %v2096_v28 = vsel %vm2028_vm7, %v1815_v7, %v2095_v18  ;;  %v69_v10 = vld [vmem:[%s10299_s0 + $0x188] sm:$0xff]  ;;  %v107_v18 = vmax.f32 %v65_v2, %v67_v3 }
  0x83   :  { %v8194_v37 = vld [vmem:[#allocation2 + $0xb0] sm:$0xff]  ;;  %v8196_v21 = vld [vmem:[#allocation2 + $0xb8] sm:$0x3]  ;;  %v503_v35 = vcombine.high %v495_v16, %v495_v16  ;;  %v519_v44 = vrot.slane %v505_v17, %v7788_v26  ;;  %v6013_v24 = vrot.slane %v495_v16, 9  ;;  %v2097_v39 = vsel %vm2030_vm8, %v1819_v11, %v2096_v28 }
  0x84   :  { %v2277_v38 = vrot.slane %v8194_v37, 1  ;;  %v2278_v45 = vrot.slane %v8196_v21, 1  ;;  %6834 = vmatmul.mubr.msk.f32.gmra.mxu1 %vm1332_vm1, %v8194_v37  ;;  %v504_v4 = vcombine.high %v502_v20, %v502_v20  ;;  %v2098_v41 = vsel %vm2032_vm9, %v1823_v12, %v2097_v39  ;;  %v70_v11 = vld [vmem:[%s10299_s0 + $0x190] sm:$0xff]  ;;  %v71_v12 = vld [vmem:[%s10299_s0 + $0x198] sm:$0xff] }
  0x85   :  { %v520_v46 = vcombine.high %v512_v22, %v512_v22  ;;  %v521_v29 = vcombine.high %v519_v44, %v519_v44  ;;  %v6014_v49 = vrot.slane %v503_v35, 9  ;;  %v2099_v52 = vsel %vm2034_vm10, %v1827_v13, %v2098_v41 }
  0x86   :  { %v8207_v51 = vsel %vm2249_vm4, %v2277_v38, %v2278_v45  ;;  %v6015_v53 = vrot.slane %v502_v20, 9  ;;  %v6016_v54 = vrot.slane %v504_v4, 9  ;;  %v2100_v9 = vsel %vm2036_vm11, %v1831_v14, %v2099_v52 }
  0x87   :  { %10320 = vst [vmem:[#allocation5_spill] sm:$0xff] %v8207_v51  ;;  %6808 = vmatmul.mubr.msk.f32.gmra.mxu0 %vm1332_vm1, %v8207_v51  ;;  %v6017_v56 = vrot.slane %v512_v22, 9  ;;  %v6018_v57 = vrot.slane %v520_v46, 9  ;;  %v6019_v58 = vrot.slane %v519_v44, 9  ;;  %2169 = vst.msk [vmem:[#allocation2 + $0xc1] sm:$0xff] %vm1332_vm1, %v2100_v9  ;;  %v6020_v43 = vrot.slane %v521_v29, 9 }
  0x88   :  { %v1284_v59 = vmax.f32 %v495_v16, %v6013_v24  ;;  %v1285_v61 = vmax.f32 %v503_v35, %v6014_v49  ;;  %v1286_v62 = vmax.f32 %v502_v20, %v6015_v53  ;;  %v1287_v63 = vmax.f32 %v504_v4, %v6016_v54  ;;  %v7542_v51 = vld [vmem:[#allocation2 + $0x48] sm:$0x3] }
  0x89   :  { %v1288_v55 = vmax.f32 %v512_v22, %v6017_v56  ;;  %v1289_v0 = vmax.f32 %v520_v46, %v6018_v57  ;;  %v1290_v1 = vmax.f32 %v519_v44, %v6019_v58  ;;  %v1291_v6 = vmax.f32 %v521_v29, %v6020_v43 }
  0x8a   :  { %v1835_v19 = vrot.slane %v1284_v59, %v7790_v27  ;;  %v1839_v7 = vrot.slane %v1285_v61, %v7790_v27  ;;  %v1843_v8 = vrot.slane %v1286_v62, %v7790_v27  ;;  %v1847_v13 = vrot.slane %v1287_v63, %v7790_v27 }
  0x8b   :  { %v1851_v33 = vrot.slane %v1288_v55, %v7790_v27  ;;  %v1855_v14 = vrot.slane %v1289_v0, %v7790_v27  ;;  %v1859_v15 = vrot.slane %v1290_v1, %v7790_v27  ;;  %v1863_v16 = vrot.slane %v1291_v6, %v7790_v27 }
  0x8c   :  { %v2101_v17 = vsel %vm2024_vm5, %v1839_v7, %v1835_v19  ;;  %v522_v20 = vcombine.high %v106_v23, %v106_v23  ;;  %v529_v28 = vrot.slane %v106_v23, %v7788_v26  ;;  %v108_v35 = vmax.f32 %v68_v32, %v70_v11 }
  0x8d   :  { %v2102_v22 = vsel %vm2026_vm6, %v1843_v8, %v2101_v17  ;;  %v109_v44 = vmax.f32 %v69_v10, %v71_v12  ;;  %v539_v45 = vcombine.high %v107_v18, %v107_v18  ;;  %v546_v39 = vrot.slane %v107_v18, %v7788_v26 }
  0x8e   :  { %v2103_v24 = vsel %vm2028_vm7, %v1847_v13, %v2102_v22  ;;  %v536_v38 = vrot.slane %v522_v20, %v7788_v26  ;;  %v8246_v4 = vld [vmem:[#allocation2 + $0xc0] sm:$0xff]  ;;  %v8248_v41 = vld [vmem:[#allocation2 + $0xc8] sm:$0x3]  ;;  %v537_v29 = vcombine.high %v529_v28, %v529_v28  ;;  %v6021_v49 = vrot.slane %v529_v28, 9 }
  0x8f   :  { %v2104_v46 = vsel %vm2030_vm8, %v1851_v33, %v2103_v24  ;;  %v556_v52 = vcombine.high %v108_v35, %v108_v35  ;;  %v2280_v23 = vrot.slane %v8246_v4, 1  ;;  %v2281_v53 = vrot.slane %v8248_v41, 1  ;;  %6836 = vmatprep.mubr.msk.f32.mxu1 %vm1332_vm1, %v8246_v4 }
  0x90   :  { %v2105_v54 = vsel %vm2032_vm9, %v1855_v14, %v2104_v46  ;;  %v538_v9 = vcombine.high %v536_v38, %v536_v38  ;;  %v553_v57 = vrot.slane %v539_v45, %v7788_v26  ;;  %v554_v58 = vcombine.high %v546_v39, %v546_v39 }
  0x91   :  { %v2106_v56 = vsel %vm2034_vm10, %v1859_v15, %v2105_v54  ;;  %v6022_v43 = vrot.slane %v537_v29, 9  ;;  %v8259_v59 = vsel %vm2249_vm4, %v2280_v23, %v2281_v53  ;;  %v6023_v62 = vrot.slane %v536_v38, 9  ;;  %v72_v15 = vld [vmem:[%s10299_s0 + $0x1a0] sm:$0xff] }
  0x92   :  { %10321 = vst [vmem:[#allocation6_spill] sm:$0xff] %v8259_v59  ;;  %v2107_v61 = vsel %vm2036_vm11, %v1863_v16, %v2106_v56  ;;  %v6024_v63 = vrot.slane %v538_v9, 9  ;;  %6810 = vmatprep.mubr.msk.f32.mxu0 %vm1332_vm1, %v8259_v59  ;;  %v555_v55 = vcombine.high %v553_v57, %v553_v57  ;;  %v6025_v0 = vrot.slane %v546_v39, 9  ;;  %v74_v16 = vld [vmem:[%s10299_s0 + $0x1b0] sm:$0xff] }
  0x93   :  { %2170 = vst.msk [vmem:[#allocation2 + $0xd1] sm:$0xff] %vm1332_vm1, %v2107_v61  ;;  %v6026_v1 = vrot.slane %v554_v58, 9  ;;  %v6027_v2 = vrot.slane %v553_v57, 9  ;;  %v1292_v3 = vmax.f32 %v529_v28, %v6021_v49  ;;  %v1293_v32 = vmax.f32 %v537_v29, %v6022_v43 }
  0x94   :  { %v1294_v6 = vmax.f32 %v536_v38, %v6023_v62  ;;  %v1295_v19 = vmax.f32 %v538_v9, %v6024_v63  ;;  %v6028_v7 = vrot.slane %v555_v55, 9  ;;  %v1296_v8 = vmax.f32 %v546_v39, %v6025_v0 }
  0x95   :  { %v1297_v10 = vmax.f32 %v554_v58, %v6026_v1  ;;  %v1298_v11 = vmax.f32 %v553_v57, %v6027_v2  ;;  %v1867_v12 = vrot.slane %v1292_v3, %v7790_v27  ;;  %v1871_v13 = vrot.slane %v1293_v32, %v7790_v27 }
  0x96   :  { %v1875_v33 = vrot.slane %v1294_v6, %v7790_v27  ;;  %v1879_v14 = vrot.slane %v1295_v19, %v7790_v27  ;;  %v1299_v17 = vmax.f32 %v555_v55, %v6028_v7  ;;  %v1883_v18 = vrot.slane %v1296_v8, %v7790_v27 }
  0x97   :  { %v1887_v20 = vrot.slane %v1297_v10, %v7790_v27  ;;  %v1891_v22 = vrot.slane %v1298_v11, %v7790_v27  ;;  %v2108_v28 = vsel %vm2024_vm5, %v1871_v13, %v1867_v12  ;;  %v563_v24 = vrot.slane %v108_v35, %v7788_v26 }
  0x98   :  { %v570_v38 = vrot.slane %v556_v52, %v7788_v26  ;;  %v573_v45 = vcombine.high %v109_v44, %v109_v44  ;;  %v1895_v39 = vrot.slane %v1299_v17, %v7790_v27  ;;  %v2109_v46 = vsel %vm2026_vm6, %v1875_v33, %v2108_v28  ;;  %v76_v17 = vld [vmem:[%s10299_s0 + $0x1c0] sm:$0xff] }
  0x99   :  { %v580_v29 = vrot.slane %v109_v44, %v7788_v26  ;;  %v110_v49 = vmax.f32 %v72_v15, %v74_v16  ;;  %v2110_v54 = vsel %vm2028_vm7, %v1879_v14, %v2109_v46  ;;  %v571_v9 = vcombine.high %v563_v24, %v563_v24  ;;  %v73_v15 = vld [vmem:[%s10299_s0 + $0x1a8] sm:$0xff]  ;;  %v75_v16 = vld [vmem:[%s10299_s0 + $0x1b8] sm:$0xff] }
  0x9a   :  { %v8284_v23 = vld [vmem:[#allocation2 + $0xd0] sm:$0xff]  ;;  %v8286_v53 = vld [vmem:[#allocation2 + $0xd8] sm:$0x3]  ;;  %v572_v56 = vcombine.high %v570_v38, %v570_v38  ;;  %v587_v35 = vrot.slane %v573_v45, %v7788_v26  ;;  %v2111_v44 = vsel %vm2030_vm8, %v1883_v18, %v2110_v54  ;;  %v6029_v62 = vrot.slane %v563_v24, 9 }
  0x9b   :  { %v2283_v52 = vrot.slane %v8284_v23, 1  ;;  %v2284_v57 = vrot.slane %v8286_v53, 1  ;;  %6837 = vmatmul.mubr.msk.f32.gmra.mxu1 %vm1332_vm1, %v8284_v23  ;;  %v588_v58 = vcombine.high %v580_v29, %v580_v29  ;;  %v2112_v43 = vsel %vm2032_vm9, %v1887_v20, %v2111_v44  ;;  %v79_v45 = vld [vmem:[%s10299_s0 + $0x1d8] sm:$0xff] }
  0x9c   :  { %v589_v61 = vcombine.high %v587_v35, %v587_v35  ;;  %v6030_v63 = vrot.slane %v571_v9, 9  ;;  %v2113_v0 = vsel %vm2034_vm10, %v1891_v22, %v2112_v43  ;;  %v6031_v1 = vrot.slane %v570_v38, 9 }
  0x9d   :  { %v8297_v55 = vsel %vm2249_vm4, %v2283_v52, %v2284_v57  ;;  %v6032_v2 = vrot.slane %v572_v56, 9  ;;  %v2114_v3 = vsel %vm2036_vm11, %v1895_v39, %v2113_v0  ;;  %v6033_v32 = vrot.slane %v580_v29, 9 }
  0x9e   :  { %10322 = vst [vmem:[#allocation7_spill] sm:$0xff] %v8297_v55  ;;  %6811 = vmatmul.mubr.msk.f32.gmra.mxu0 %vm1332_vm1, %v8297_v55  ;;  %v6034_v6 = vrot.slane %v588_v58, 9  ;;  %v6035_v19 = vrot.slane %v587_v35, 9  ;;  %2171 = vst.msk [vmem:[#allocation2 + $0xe1] sm:$0xff] %vm1332_vm1, %v2114_v3  ;;  %v6036_v7 = vrot.slane %v589_v61, 9  ;;  %v1300_v8 = vmax.f32 %v563_v24, %v6029_v62  ;;  %v77_v24 = vld [vmem:[%s10299_s0 + $0x1c8] sm:$0xff] }
  0x9f   :  { %v1301_v10 = vmax.f32 %v571_v9, %v6030_v63  ;;  %v1302_v11 = vmax.f32 %v570_v38, %v6031_v1  ;;  %v1303_v12 = vmax.f32 %v572_v56, %v6032_v2  ;;  %v1304_v13 = vmax.f32 %v580_v29, %v6033_v32  ;;  %v78_v38 = vld [vmem:[%s10299_s0 + $0x1d0] sm:$0xff] }
  0xa0   :  { %v1305_v33 = vmax.f32 %v588_v58, %v6034_v6  ;;  %v1306_v14 = vmax.f32 %v587_v35, %v6035_v19  ;;  %v1307_v18 = vmax.f32 %v589_v61, %v6036_v7  ;;  %v1899_v20 = vrot.slane %v1300_v8, %v7790_v27 }
  0xa1   :  { %v1903_v22 = vrot.slane %v1301_v10, %v7790_v27  ;;  %v1907_v28 = vrot.slane %v1302_v11, %v7790_v27  ;;  %v1911_v39 = vrot.slane %v1303_v12, %v7790_v27  ;;  %v1915_v46 = vrot.slane %v1304_v13, %v7790_v27 }
  0xa2   :  { %v1919_v29 = vrot.slane %v1305_v33, %v7790_v27  ;;  %v1923_v54 = vrot.slane %v1306_v14, %v7790_v27  ;;  %v1927_v9 = vrot.slane %v1307_v18, %v7790_v27  ;;  %v111_v35 = vmax.f32 %v73_v15, %v75_v16 }
  0xa3   :  { %v2115_v56 = vsel %vm2024_vm5, %v1903_v22, %v1899_v20  ;;  %v590_v52 = vcombine.high %v110_v49, %v110_v49  ;;  %v597_v44 = vrot.slane %v110_v49, %v7788_v26  ;;  %v112_v58 = vmax.f32 %v76_v17, %v78_v38 }
  0xa4   :  { %v2116_v57 = vsel %vm2026_vm6, %v1907_v28, %v2115_v56  ;;  %v113_v43 = vmax.f32 %v77_v24, %v79_v45  ;;  %v607_v63 = vcombine.high %v111_v35, %v111_v35  ;;  %v614_v0 = vrot.slane %v111_v35, %v7788_v26 }
  0xa5   :  { %v2117_v61 = vsel %vm2028_vm7, %v1911_v39, %v2116_v57  ;;  %v604_v62 = vrot.slane %v590_v52, %v7788_v26  ;;  %v8336_v1 = vld [vmem:[#allocation2 + $0xe0] sm:$0xff]  ;;  %v8338_v2 = vld [vmem:[#allocation2 + $0xe8] sm:$0x3]  ;;  %v605_v32 = vcombine.high %v597_v44, %v597_v44  ;;  %v6037_v6 = vrot.slane %v597_v44, 9 }
  0xa6   :  { %v2118_v3 = vsel %vm2030_vm8, %v1915_v46, %v2117_v61  ;;  %v624_v19 = vcombine.high %v112_v58, %v112_v58  ;;  %v2286_v49 = vrot.slane %v8336_v1, 1  ;;  %v2287_v7 = vrot.slane %v8338_v2, 1  ;;  %6839 = vmatprep.mubr.msk.f32.mxu1 %vm1332_vm1, %v8336_v1 }
  0xa7   :  { %v2119_v8 = vsel %vm2032_vm9, %v1919_v29, %v2118_v3  ;;  %v606_v10 = vcombine.high %v604_v62, %v604_v62  ;;  %v621_v12 = vrot.slane %v607_v63, %v7788_v26  ;;  %v622_v13 = vcombine.high %v614_v0, %v614_v0 }
  0xa8   :  { %v2120_v11 = vsel %vm2034_vm10, %v1923_v54, %v2119_v8  ;;  %v6038_v33 = vrot.slane %v605_v32, 9  ;;  %v8349_v14 = vsel %vm2249_vm4, %v2286_v49, %v2287_v7  ;;  %v6039_v16 = vrot.slane %v604_v62, 9 }
  0xa9   :  { %10323 = vst [vmem:[#allocation8_spill] sm:$0xff] %v8349_v14  ;;  %v2121_v15 = vsel %vm2036_vm11, %v1927_v9, %v2120_v11  ;;  %v6040_v17 = vrot.slane %v606_v10, 9  ;;  %6813 = vmatprep.mubr.msk.f32.mxu0 %vm1332_vm1, %v8349_v14  ;;  %v623_v18 = vcombine.high %v621_v12, %v621_v12  ;;  %v6041_v20 = vrot.slane %v614_v0, 9 }
  0xaa   :  { %2172 = vst.msk [vmem:[#allocation2 + $0xf1] sm:$0xff] %vm1332_vm1, %v2121_v15  ;;  %v6042_v22 = vrot.slane %v622_v13, 9  ;;  %v6043_v28 = vrot.slane %v621_v12, 9  ;;  %v1308_v24 = vmax.f32 %v597_v44, %v6037_v6  ;;  %v1309_v38 = vmax.f32 %v605_v32, %v6038_v33 }
  0xab   :  { %v1310_v45 = vmax.f32 %v604_v62, %v6039_v16  ;;  %v1311_v39 = vmax.f32 %v606_v10, %v6040_v17  ;;  %v6044_v46 = vrot.slane %v623_v18, 9  ;;  %v1312_v29 = vmax.f32 %v614_v0, %v6041_v20 }
  0xac   :  { %v1313_v54 = vmax.f32 %v622_v13, %v6042_v22  ;;  %v1314_v56 = vmax.f32 %v621_v12, %v6043_v28  ;;  %v1931_v9 = vrot.slane %v1308_v24, %v7790_v27  ;;  %v1935_v35 = vrot.slane %v1309_v38, %v7790_v27 }
  0xad   :  { %v1939_v52 = vrot.slane %v1310_v45, %v7790_v27  ;;  %v1943_v57 = vrot.slane %v1311_v39, %v7790_v27  ;;  %v1315_v61 = vmax.f32 %v623_v18, %v6044_v46  ;;  %v1947_v63 = vrot.slane %v1312_v29, %v7790_v27 }
  0xae   :  { %v1951_v44 = vrot.slane %v1313_v54, %v7790_v27  ;;  %v2122_v62 = vsel %vm2024_vm5, %v1935_v35, %v1931_v9  ;;  %v631_v3 = vrot.slane %v112_v58, %v7788_v26  ;;  %v638_v0 = vrot.slane %v624_v19, %v7788_v26 }
  0xaf   :  { %v641_v32 = vcombine.high %v113_v43, %v113_v43  ;;  %v1955_v6 = vrot.slane %v1314_v56, %v7790_v27  ;;  %v1959_v49 = vrot.slane %v1315_v61, %v7790_v27  ;;  %v2123_v7 = vsel %vm2026_vm6, %v1939_v52, %v2122_v62 }
  0xb0   :  { %v648_v8 = vrot.slane %v113_v43, %v7788_v26  ;;  %v2124_v12 = vsel %vm2028_vm7, %v1943_v57, %v2123_v7  ;;  %v639_v13 = vcombine.high %v631_v3, %v631_v3  ;;  %v640_v33 = vcombine.high %v638_v0, %v638_v0 }
  0xb1   :  { %v8368_v10 = vld [vmem:[#allocation2 + $0xf0] sm:$0xff]  ;;  %v8370_v11 = vld [vmem:[#allocation2 + $0xf8] sm:$0x3]  ;;  %v655_v58 = vrot.slane %v641_v32, %v7788_v26  ;;  %v2125_v16 = vsel %vm2030_vm8, %v1947_v63, %v2124_v12  ;;  %v6045_v20 = vrot.slane %v631_v3, 9  ;;  %v6047_v38 = vrot.slane %v638_v0, 9 }
  0xb2   :  { %v2289_v19 = vrot.slane %v8368_v10, 1  ;;  %v2290_v15 = vrot.slane %v8370_v11, 1  ;;  %6840 = vmatmul.mubr.msk.f32.gmra.mxu1 %vm1332_vm1, %v8368_v10  ;;  %v656_v43 = vcombine.high %v648_v8, %v648_v8  ;;  %v2126_v17 = vsel %vm2032_vm9, %v1951_v44, %v2125_v16 }
  0xb3   :  { %v657_v18 = vcombine.high %v655_v58, %v655_v58  ;;  %v6046_v22 = vrot.slane %v639_v13, 9  ;;  %v2127_v24 = vsel %vm2034_vm10, %v1955_v6, %v2126_v17  ;;  %v6048_v45 = vrot.slane %v640_v33, 9 }
  0xb4   :  { %v8381_v28 = vsel %vm2249_vm4, %v2289_v19, %v2290_v15  ;;  %v2128_v39 = vsel %vm2036_vm11, %v1959_v49, %v2127_v24  ;;  %v6049_v46 = vrot.slane %v648_v8, 9  ;;  %v6050_v29 = vrot.slane %v656_v43, 9  ;;  %v7533_v24 = vld [vmem:[#allocation2 + $0x8] sm:$0x3] }
  0xb5   :  { %10324 = vst [vmem:[#allocation9_spill] sm:$0xff] %v8381_v28  ;;  %6814 = vmatmul.mubr.msk.f32.gmra.mxu0 %vm1332_vm1, %v8381_v28  ;;  %v6051_v54 = vrot.slane %v655_v58, 9  ;;  %2173 = vst.msk [vmem:[#allocation2 + $0x101] sm:$0xff] %vm1332_vm1, %v2128_v39  ;;  %v6052_v56 = vrot.slane %v657_v18, 9  ;;  %v1316_v9 = vmax.f32 %v631_v3, %v6045_v20  ;;  %v1317_v35 = vmax.f32 %v639_v13, %v6046_v22  ;;  %v48_v20 = vld [vmem:[%s10299_s0 + $0xe0] sm:$0xff]  ;;  %v50_v22 = vld [vmem:[%s10299_s0 + $0xf0] sm:$0xff] }
  0xb6   :  { %v1318_v52 = vmax.f32 %v638_v0, %v6047_v38  ;;  %v1319_v57 = vmax.f32 %v640_v33, %v6048_v45  ;;  %v1320_v61 = vmax.f32 %v648_v8, %v6049_v46  ;;  %v1321_v63 = vmax.f32 %v656_v43, %v6050_v29  ;;  %v7534_v45 = vld [vmem:[#allocation2 + $0x18] sm:$0x3]  ;;  %v49_v29 = vld [vmem:[%s10299_s0 + $0xe8] sm:$0xff] }
  0xb7   :  { %v1322_v44 = vmax.f32 %v655_v58, %v6051_v54  ;;  %v1323_v62 = vmax.f32 %v657_v18, %v6052_v56  ;;  %v1963_v32 = vrot.slane %v1316_v9, %v7790_v27  ;;  %v1967_v6 = vrot.slane %v1317_v35, %v7790_v27  ;;  %v51_v54 = vld [vmem:[%s10299_s0 + $0xf8] sm:$0xff]  ;;  %v7535_v35 = vld [vmem:[#allocation2] sm:$0xff] }
  0xb8   :  { %v1971_v49 = vrot.slane %v1318_v52, %v7790_v27  ;;  %v1975_v7 = vrot.slane %v1319_v57, %v7790_v27  ;;  %v1979_v12 = vrot.slane %v1320_v61, %v7790_v27  ;;  %v1983_v19 = vrot.slane %v1321_v63, %v7790_v27  ;;  %v7536_v57 = vld [vmem:[#allocation2 + $0x10] sm:$0xff] }
  0xb9   :  { %v2129_v3 = vsel %vm2024_vm5, %v1967_v6, %v1963_v32  ;;  %v1987_v0 = vrot.slane %v1322_v44, %v7790_v27  ;;  %v1991_v13 = vrot.slane %v1323_v62, %v7790_v27  ;;  %v2663_v38 = vrot.slane %v7533_v24, 2  ;;  %v8429_v44 = vld [vmem:[#allocation2 + $0x20] sm:$0xff]  ;;  %v7538_v6 = vld [vmem:[#allocation2 + $0x28] sm:$0x3] }
  0xba   :  { %v2130_v8 = vsel %vm2026_vm6, %v1971_v49, %v2129_v3  ;;  %v2666_v39 = vrot.slane %v7534_v45, 2  ;;  %v2662_v52 = vrot.slane %v7535_v35, 2  ;;  %v2665_v61 = vrot.slane %v7536_v57, 2 }
  0xbb   :  { %v2131_v33 = vsel %vm2028_vm7, %v1975_v7, %v2130_v8  ;;  %v98_v63 = vmax.f32 %v48_v20, %v50_v22  ;;  %v2668_v62 = vrot.slane %v8429_v44, 2  ;;  %v99_v32 = vmax.f32 %v49_v29, %v51_v54  ;;  %v8432_v7 = vld [vmem:[#allocation2 + $0x30] sm:$0xff]  ;;  %v8442_v22 = vld [vmem:[#allocation2 + $0x40] sm:$0xff] }
  0xbc   :  { %v8399_v58 = vld [vmem:[#allocation2 + $0x100] sm:$0xff]  ;;  %v8401_v15 = vld [vmem:[#allocation2 + $0x108] sm:$0x3]  ;;  %v2132_v16 = vsel %vm2030_vm8, %v1979_v12, %v2131_v33  ;;  %v2669_v49 = vrot.slane %v7538_v6, 2  ;;  %v2671_v12 = vrot.slane %v8432_v7, 2  ;;  %v8438_v8 = vsel %vm2661_vm12, %v2665_v61, %v2666_v39 }
  0xbd   :  { %v2292_v43 = vrot.slane %v8399_v58, 1  ;;  %v2293_v17 = vrot.slane %v8401_v15, 1  ;;  %6842 = vmatprep.mubr.msk.f32.mxu1 %vm1332_vm1, %v8399_v58  ;;  %v2133_v18 = vsel %vm2032_vm9, %v1983_v19, %v2132_v16  ;;  %v386_v19 = vcombine.high %v98_v63, %v98_v63  ;;  %v7540_v16 = vld [vmem:[#allocation2 + $0x38] sm:$0x3] }
  0xbe   :  { %v2134_v46 = vsel %vm2034_vm10, %v1987_v0, %v2133_v18  ;;  %v393_v3 = vrot.slane %v98_v63, %v7788_v26  ;;  %v2664_v0 = vsel %vm2661_vm12, %v2662_v52, %v2663_v38  ;;  %v410_v33 = vrot.slane %v99_v32, %v7788_v26 }
  0xbf   :  { %v8423_v56 = vsel %vm2249_vm4, %v2292_v43, %v2293_v17  ;;  %v2135_v9 = vsel %vm2036_vm11, %v1991_v13, %v2134_v46  ;;  %v403_v13 = vcombine.high %v99_v32, %v99_v32  ;;  %v2672_v43 = vrot.slane %v7540_v16, 2 }
  0xc0   :  { %10325 = vst [vmem:[#allocation10_spill] sm:$0xff] %v8423_v56  ;;  %6816 = vmatprep.mubr.msk.f32.mxu0 %vm1332_vm1, %v8423_v56  ;;  %2174 = vst.msk [vmem:[#allocation2 + $0x111] sm:$0xff] %vm1332_vm1, %v2135_v9  ;;  %v400_v17 = vrot.slane %v386_v19, %v7788_v26  ;;  %v401_v18 = vcombine.high %v393_v3, %v393_v3  ;;  %v5989_v20 = vrot.slane %v393_v3, 9  ;;  %v2674_v24 = vrot.slane %v8442_v22, 2 }
  0xc1   :  { %v417_v45 = vrot.slane %v403_v13, %v7788_v26  ;;  %v418_v46 = vcombine.high %v410_v33, %v410_v33  ;;  %v5993_v38 = vrot.slane %v410_v33, 9  ;;  %v2675_v42 = vrot.slane %v7542_v51, 2 }
  0xc2   :  { %v402_v29 = vcombine.high %v400_v17, %v400_v17  ;;  %v5990_v39 = vrot.slane %v401_v18, 9  ;;  %v5991_v54 = vrot.slane %v400_v17, 9  ;;  %v1260_v9 = vmax.f32 %v393_v3, %v5989_v20 }
  0xc3   :  { %v419_v61 = vcombine.high %v417_v45, %v417_v45  ;;  %v5994_v63 = vrot.slane %v418_v46, 9  ;;  %v5995_v32 = vrot.slane %v417_v45, 9  ;;  %v1264_v6 = vmax.f32 %v410_v33, %v5993_v38 }
  0xc4   :  { %v5992_v13 = vrot.slane %v402_v29, 9  ;;  %v1261_v56 = vmax.f32 %v401_v18, %v5990_v39  ;;  %v1262_v20 = vmax.f32 %v400_v17, %v5991_v54  ;;  %v1739_v33 = vrot.slane %v1260_v9, %v7790_v27 }
  0xc5   :  { %v5996_v3 = vrot.slane %v419_v61, 9  ;;  %v1265_v28 = vmax.f32 %v418_v46, %v5994_v63  ;;  %v1266_v14 = vmax.f32 %v417_v45, %v5995_v32  ;;  %v1755_v17 = vrot.slane %v1264_v6, %v7790_v27  ;;  %v8467_v45 = vld [vmem:[%s10298_s1 + $0x1c] sm:$0xf]  ;;  %v81_v63 = vld [vmem:[%s10299_s0 + $0x1e8] sm:$0xff]  ;;  %v82_v32 = vld [vmem:[%s10299_s0 + $0x1f0] sm:$0xff] }
  0xc6   :  { %v1263_v59 = vmax.f32 %v402_v29, %v5992_v13  ;;  %v1743_v38 = vrot.slane %v1261_v56, %v7790_v27  ;;  %v8476_v29 = vsel %vm2661_vm12, %v2668_v62, %v2669_v49  ;;  %v80_v62 = vld [vmem:[%s10299_s0 + $0x1e0] sm:$0xff]  ;;  %v8504_v49 = vld [vmem:[#allocation2 + $0x50] sm:$0xff]  ;;  %v2680_v6 = vrot.slane %v8091_v30, 2 }
  0xc7   :  { %v8446_v35 = vld [vmem:[#allocation2 + $0x110] sm:$0xff]  ;;  %v8448_v52 = vld [vmem:[#allocation2 + $0x118] sm:$0x3]  ;;  %v1267_v18 = vmax.f32 %v419_v61, %v5996_v3  ;;  %v1759_v46 = vrot.slane %v1265_v28, %v7790_v27  ;;  %v1763_v39 = vrot.slane %v1266_v14, %v7790_v27  ;;  %v2684_v3 = vrot.slane %v8147_v36, 2 }
  0xc8   :  { %v2295_v19 = vrot.slane %v8446_v35, 1  ;;  %v2296_v16 = vrot.slane %v8448_v52, 1  ;;  %6843 = vmatmul.mubr.msk.f32.gmra.mxu1 %vm1332_vm1, %v8446_v35  ;;  %v1751_v56 = vrot.slane %v1263_v59, %v7790_v27  ;;  %v2080_v51 = vsel %vm2024_vm5, %v1743_v38, %v1739_v33  ;;  %v8495_v14 = vld [vmem:[%s10298_s1 + $0x18] sm:$0xf]  ;;  %v7546_v33 = vld [vmem:[#allocation2 + $0xa0] sm:$0xff] }
  0xc9   :  { %6873 = vmatprep.mubr.msk.f32.mxu1 %vm1332_vm1, %v7536_v57  ;;  %v1747_v57 = vrot.slane %v1262_v20, %v7790_v27  ;;  %v1767_v59 = vrot.slane %v1267_v18, %v7790_v27  ;;  %v2686_v38 = vrot.slane %v7546_v33, 2  ;;  %v7547_v18 = vld [vmem:[#allocation2 + $0xa8] sm:$0x3] }
  0xca   :  { %v8456_v55 = vsel %vm2249_vm4, %v2295_v19, %v2296_v16  ;;  %v2681_v19 = vrot.slane %v8093_v31, 2  ;;  %v2683_v16 = vrot.slane %v8145_v34, 2 }
  0xcb   :  { %6817 = vmatmul.mubr.msk.f32.gmra.mxu0 %vm1332_vm1, %v8456_v55  ;;  %v2081_v54 = vsel %vm2026_vm6, %v1747_v57, %v2080_v51  ;;  %v2687_v57 = vrot.slane %v7547_v18, 2  ;;  %v2690_v51 = vrot.slane %v8196_v21, 2 }
  0xcc   :  { %6847 = vmatprep.mubr.msk.f32.mxu0 %vm1332_vm1, %v2664_v0  ;;  %6874 = vmatmul.mubr.msk.f32.vlgmr.msra.gmra.mxu1 %vm1332_vm1, %v8429_v44  ;;  %v8485_v0 = vsel %vm2661_vm12, %v2671_v12, %v2672_v43  ;;  %v2082_v28 = vsel %vm2028_vm7, %v1751_v56, %v2081_v54  ;;  %v2677_v12 = vrot.slane %v8504_v49, 2  ;;  %v7544_v43 = vld [vmem:[#allocation2 + $0x58] sm:$0x3] }
  0xcd   :  { %6876 = vmatprep.mubr.msk.f32.mxu1 %vm1332_vm1, %v8432_v7  ;;  %6924 = vmatpush3.msk.msra.mxu1 %vm2332_vm0, %v8107_v40  ;;  %v8502_v40 = vsel %vm2661_vm12, %v2674_v24, %v2675_v42  ;;  %v2678_v9 = vrot.slane %v7544_v43, 2  ;;  %v2083_v61 = vsel %vm2030_vm8, %v1755_v17, %v2082_v28  ;;  %v83_v42 = vld [vmem:[%s10299_s0 + $0x1f8] sm:$0xff]  ;;  %v7545_v24 = vld [vmem:[%s10298_s1 + $0x10] sm:$0xf]  ;;  %v114_v17 = vmax.f32 %v80_v62, %v82_v32 }
  0xce   :  { %6975 = vmatprep.subr.msk.mxu1 %vm2332_vm0, %v8467_v45  ;;  %v2084_v13 = vsel %vm2032_vm9, %v1759_v46, %v2083_v61  ;;  %v115_v56 = vmax.f32 %v81_v63, %v83_v42  ;;  %v2689_v46 = vrot.slane %v8194_v37, 2  ;;  %v8551_v62 = vsel %vm2661_vm12, %v2680_v6, %v2681_v19 }
  0xcf   :  { %6848 = vmatmul.mubr.msk.f32.vlgmr.msra.gmra.mxu0 %vm1332_vm1, %v8438_v8  ;;  %v2085_v20 = vsel %vm2034_vm10, %v1763_v39, %v2084_v13  ;;  %v8539_v36 = vsel %vm2661_vm12, %v2677_v12, %v2678_v9  ;;  %v658_v39 = vcombine.high %v114_v17, %v114_v17  ;;  %v665_v54 = vrot.slane %v114_v17, %v7788_v26 }
  0xd0   :  { %6898 = vmatpush3.msk.msra.mxu0 %vm2332_vm0, %v7545_v24  ;;  %6850 = vmatprep.mubr.msk.f32.mxu0 %vm1332_vm1, %v8476_v29  ;;  %v2086_v31 = vsel %vm2036_vm11, %v1767_v59, %v2085_v20  ;;  %v675_v59 = vcombine.high %v115_v56, %v115_v56  ;;  %v682_v28 = vrot.slane %v115_v56, %v7788_v26  ;;  %v2692_v43 = vrot.slane %v8246_v4, 2 }
  0xd1   :  { %6877 = vmatmul.mubr.msk.f32.gmra.mxu1 %vm1332_vm1, %v8442_v22  ;;  %6949 = vmatprep.subr.msk.mxu0 %vm2332_vm0, %v8495_v14  ;;  %2167 = vst.msk [vmem:[#allocation2 + $0x81] sm:$0xff] %vm1332_vm1, %v2086_v31  ;;  %v8554_v12 = vsel %vm2661_vm12, %v2683_v16, %v2684_v3  ;;  %v2688_v21 = vsel %vm2661_vm12, %v2686_v38, %v2687_v57  ;;  %v2693_v42 = vrot.slane %v8248_v41, 2  ;;  %v6053_v24 = vrot.slane %v665_v54, 9 }
  0xd2   :  { %6879 = vmatprep.mubr.msk.f32.mxu1 %vm1332_vm1, %v8504_v49  ;;  %v672_v9 = vrot.slane %v658_v39, %v7788_v26  ;;  %v673_v61 = vcombine.high %v665_v54, %v665_v54  ;;  %v689_v63 = vrot.slane %v675_v59, %v7788_v26  ;;  %v690_v32 = vcombine.high %v682_v28, %v682_v28 }
  0xd3   :  { %6851 = vmatmul.mubr.msk.f32.gmra.mxu0 %vm1332_vm1, %v8485_v0  ;;  %v6057_v6 = vrot.slane %v682_v28, 9  ;;  %v1324_v20 = vmax.f32 %v665_v54, %v6053_v24  ;;  %v2695_v41 = vrot.slane %v8284_v23, 2  ;;  %v2696_v56 = vrot.slane %v8286_v53, 2 }
  0xd4   :  { %6853 = vmatprep.mubr.msk.f32.mxu0 %vm1332_vm1, %v8502_v40  ;;  %v691_v19 = vcombine.high %v689_v63, %v689_v63  ;;  %v6054_v16 = vrot.slane %v673_v61, 9  ;;  %v6055_v13 = vrot.slane %v672_v9, 9  ;;  %v6058_v3 = vrot.slane %v690_v32, 9 }
  0xd5   :  { %6880 = vmatmul.mubr.msk.f32.gmra.mxu1 %vm1332_vm1, %v8091_v30  ;;  %v8565_v30 = vsel %vm2661_vm12, %v2689_v46, %v2690_v51  ;;  %v6059_v26 = vrot.slane %v689_v63, 9  ;;  %v1328_v33 = vmax.f32 %v682_v28, %v6057_v6  ;;  %v2698_v46 = vrot.slane %v8336_v1, 2 }
  0xd6   :  { %6882 = vmatprep.mubr.msk.f32.mxu1 %vm1332_vm1, %v8145_v34  ;;  %v674_v34 = vcombine.high %v672_v9, %v672_v9  ;;  %v6060_v57 = vrot.slane %v691_v19, 9  ;;  %v1325_v31 = vmax.f32 %v673_v61, %v6054_v16  ;;  %v1326_v17 = vmax.f32 %v672_v9, %v6055_v13 }
  0xd7   :  { %6854 = vmatmul.mubr.msk.f32.gmra.mxu0 %vm1332_vm1, %v8539_v36  ;;  %v1329_v51 = vmax.f32 %v690_v32, %v6058_v3  ;;  %v2699_v39 = vrot.slane %v8338_v2, 2  ;;  %v1330_v59 = vmax.f32 %v689_v63, %v6059_v26  ;;  %v1995_v28 = vrot.slane %v1324_v20, %v7790_v27 }
  0xd8   :  { %6856 = vmatprep.mubr.msk.f32.mxu0 %vm1332_vm1, %v8551_v62  ;;  %v8570_v38 = vld [vmem:[#allocation2 + $0x80] sm:$0xff]  ;;  %v6056_v18 = vrot.slane %v674_v34, 9  ;;  %v8585_v9 = vsel %vm2661_vm12, %v2692_v43, %v2693_v42  ;;  %v1331_v61 = vmax.f32 %v691_v19, %v6060_v57  ;;  %v1999_v53 = vrot.slane %v1325_v31, %v7790_v27 }
  0xd9   :  { %6883 = vmatmul.mubr.msk.f32.gmra.mxu1 %vm1332_vm1, %v8570_v38  ;;  %v2003_v24 = vrot.slane %v1326_v17, %v7790_v27  ;;  %v2701_v2 = vrot.slane %v8368_v10, 2  ;;  %v2015_v43 = vrot.slane %v1329_v51, %v7790_v27  ;;  %v8606_v42 = vsel %vm2661_vm12, %v2698_v46, %v2699_v39  ;;  %v10326_v39 = vld [vmem:[#allocation4_spill] sm:$0xff] }
  0xda   :  { %6885 = vmatprep.mubr.msk.f32.mxu1 %vm1332_vm1, %v8194_v37  ;;  %v1327_v54 = vmax.f32 %v674_v34, %v6056_v18  ;;  %v8596_v37 = vsel %vm2661_vm12, %v2695_v41, %v2696_v56  ;;  %v2136_v63 = vsel %vm2024_vm5, %v1999_v53, %v1995_v28  ;;  %v2702_v6 = vrot.slane %v8370_v11, 2  ;;  %v6204_v41 = vld [vmem:[%s10298_s1 + $0x20] sm:$0xf]  ;;  %v10328_v53 = vld [vmem:[#allocation6_spill] sm:$0xff] }
  0xdb   :  { %6857 = vmatmul.mubr.msk.f32.gmra.mxu0 %vm1332_vm1, %v8554_v12  ;;  %v2019_v34 = vrot.slane %v1330_v59, %v7790_v27  ;;  %v2137_v19 = vsel %vm2026_vm6, %v2003_v24, %v2136_v63  ;;  %v2704_v16 = vrot.slane %v8399_v58, 2  ;;  %v2705_v13 = vrot.slane %v8401_v15, 2  ;;  %v10329_v24 = vld [vmem:[#allocation7_spill] sm:$0xff] }
  0xdc   :  { %6859 = vmatprep.mubr.msk.f32.mxu0 %vm1332_vm1, %v2688_v21  ;;  %v2007_v32 = vrot.slane %v1327_v54, %v7790_v27  ;;  %v2011_v21 = vrot.slane %v1328_v33, %v7790_v27  ;;  %v2023_v3 = vrot.slane %v1331_v61, %v7790_v27  ;;  %v8624_v33 = vsel %vm2661_vm12, %v2701_v2, %v2702_v6  ;;  %v10327_v61 = vld [vmem:[#allocation5_spill] sm:$0xff] }
  0xdd   :  { %6886 = vmatmul.mubr.msk.f32.gmra.mxu1 %vm1332_vm1, %v8246_v4  ;;  %v2707_v27 = vrot.slane %v8446_v35, 2  ;;  %v2708_v15 = vrot.slane %v8448_v52, 2  ;;  %v8632_v57 = vsel %vm2661_vm12, %v2704_v16, %v2705_v13  ;;  %v3258_v46 = vrot.slane %v8570_v38, 2 }
  0xde   :  { %6888 = vmatprep.mubr.msk.f32.mxu1 %vm1332_vm1, %v8284_v23  ;;  %v2138_v26 = vsel %vm2028_vm7, %v2007_v32, %v2137_v19 }
  0xdf   :  { %6860 = vmatmul.mubr.msk.f32.gmra.mxu0 %vm1332_vm1, %v8565_v30  ;;  %v2139_v20 = vsel %vm2030_vm8, %v2011_v21, %v2138_v26  ;;  %v8643_v52 = vsel %vm2661_vm12, %v2707_v27, %v2708_v15  ;;  %v10330_v21 = vld [vmem:[#allocation8_spill] sm:$0xff]  ;;  %v2195_v27 = vld [vmem:[#allocation2 + $0x98] sm:$0x3] }
  0xe0   :  { %6862 = vmatprep.mubr.msk.f32.mxu0 %vm1332_vm1, %v8585_v9  ;;  %v2140_v11 = vsel %vm2032_vm9, %v2015_v43, %v2139_v20  ;;  %v10331_v43 = vld [vmem:[#allocation9_spill] sm:$0xff] }
  0xe1   :  { %6889 = vmatmul.mubr.msk.f32.gmra.mxu1 %vm1332_vm1, %v8336_v1  ;;  %v2141_v18 = vsel %vm2034_vm10, %v2019_v34, %v2140_v11  ;;  %v10332_v34 = vld [vmem:[#allocation10_spill] sm:$0xff] }
  0xe2   :  { %6891 = vmatprep.mubr.msk.f32.mxu1 %vm1332_vm1, %v8368_v10  ;;  %v2142_v31 = vsel %vm2036_vm11, %v2023_v3, %v2141_v18 }
  0xe3   :  { %6863 = vmatmul.mubr.msk.f32.gmra.mxu0 %vm1332_vm1, %v8596_v37  ;;  %2175 = vst.msk [vmem:[#allocation2 + $0x121] sm:$0xff] %vm1332_vm1, %v2142_v31 }
  0xe4   :  { %6865 = vmatprep.mubr.msk.f32.mxu0 %vm1332_vm1, %v8606_v42 }
  0xe5   :  { %6892 = vmatmul.mubr.msk.f32.gmra.mxu1 %vm1332_vm1, %v8399_v58 }
  0xe6   :  { %6894 = vmatprep.mubr.msk.f32.mxu1 %vm1332_vm1, %v8446_v35 }
  0xe7   :  { %6866 = vmatmul.mubr.msk.f32.gmra.mxu0 %vm1332_vm1, %v8624_v33 }
  0xe8   :  { %6868 = vmatprep.mubr.msk.f32.mxu0 %vm1332_vm1, %v8632_v57 }
  0xea   :  { %v8651_v17 = vld [vmem:[#allocation2 + $0x120] sm:$0xff]  ;;  %v2213_v32 = vld [vmem:[#allocation2 + $0x128] sm:$0x3] }
  0xeb   :  { %6869 = vmatmul.mubr.msk.f32.gmra.mxu0 %vm1332_vm1, %v8643_v52  ;;  %6895 = vmatmul.mubr.msk.f32.gmra.mxu1 %vm1332_vm1, %v8651_v17  ;;  %v3085_v2 = vrot.slane %v8651_v17, 1  ;;  %v3086_v63 = vrot.slane %v2213_v32, 1  ;;  %v3261_v6 = vrot.slane %v8651_v17, 2  ;;  %v3262_v19 = vrot.slane %v2213_v32, 2  ;;  %v6234_v32 = vld [vmem:[%s10300_s3 + $0xd8] sm:$0xff] }
  0xec   :  { %6899 = vmatprep.mubr.msk.f32.mxu0 %vm1332_vm1, %v7869_v25  ;;  %6925 = vmatprep.mubr.msk.f32.mxu1 %vm1332_vm1, %v8438_v8  ;;  %v2193_v25 = vld [vmem:[#allocation2 + $0x88] sm:$0x3]  ;;  %v3082_v8 = vrot.slane %v8570_v38, 1 }
  0xed   :  { %v3259_v51 = vrot.slane %v2193_v25, 2  ;;  %v3087_v16 = vsel %vm2249_vm4, %v3085_v2, %v3086_v63  ;;  %v8737_v26 = vsel %vm2661_vm12, %v3261_v6, %v3262_v19  ;;  %v6233_v2 = vld [vmem:[%s10300_s3 + $0xd0] sm:$0xff]  ;;  %v4113_v63 = vld [vmem:[%s10300_s3 + $0x40] sm:$0xff]  ;;  %v6232_v6 = vld [vmem:[%s10300_s3 + $0xc8] sm:$0xff] }
  0xee   :  { %v4112_v19 = vld [vmem:[%s10300_s3 + $0x38] sm:$0xff] }
  0xef   :  { %6900 = vmatmul.mubr.msk.f32.vlgmr.msra.gmra.mxu0 %vm1332_vm1, %v7905_v5  ;;  %6926 = vmatmul.mubr.msk.f32.vlgmr.msra.gmra.mxu1 %vm1332_vm1, %v8476_v29  ;;  %v8696_v28 = vsel %vm2661_vm12, %v3258_v46, %v3259_v51  ;;  %v4119_v46 = vld [vmem:[%s10300_s3 + $0x70] sm:$0xff]  ;;  %v6238_v51 = vld [vmem:[%s10300_s3 + $0xf8] sm:$0xff] }
  0xf0   :  { %6950 = vmatpush3.msk.msra.mxu0 %vm2332_vm0, %v8495_v14  ;;  %6902 = vmatprep.mubr.msk.f32.mxu0 %vm1332_vm1, %v7953_v60  ;;  %v3083_v14 = vrot.slane %v2193_v25, 1 }
  0xf1   :  { %7001 = vmatprep.subr.msk.mxu0 %vm2332_vm0, %v6204_v41  ;;  %6928 = vmatprep.mubr.msk.f32.mxu1 %vm1332_vm1, %v8485_v0 }
  0xf2   :  { %6976 = vmatpush3.msk.msra.mxu1 %vm2332_vm0, %v8467_v45  ;;  %v3084_v54 = vsel %vm2249_vm4, %v3082_v8, %v3083_v14 }
  0xf3   :  { %6903 = vmatmul.mubr.msk.f32.gmra.mxu0 %vm1332_vm1, %v7999_v50  ;;  %6929 = vmatmul.mubr.msk.f32.gmra.mxu1 %vm1332_vm1, %v8502_v40 }
  0xf4   :  { %6905 = vmatprep.mubr.msk.f32.mxu0 %vm1332_vm1, %v8038_v47  ;;  %6931 = vmatprep.mubr.msk.f32.mxu1 %vm1332_vm1, %v8539_v36 }
  0xf5   :  { %7027 = vmatprep.subr.mxu1 %v6238_v51 }
  0xf7   :  { %6906 = vmatmul.mubr.msk.f32.gmra.mxu0 %vm1332_vm1, %v8115_v48  ;;  %6932 = vmatmul.mubr.msk.f32.gmra.mxu1 %vm1332_vm1, %v8551_v62 }
  0xf8   :  { %6908 = vmatprep.mubr.msk.f32.mxu0 %vm1332_vm1, %v10326_v39  ;;  %6934 = vmatprep.mubr.msk.f32.mxu1 %vm1332_vm1, %v8554_v12 }
  0xfb   :  { %6909 = vmatmul.mubr.msk.f32.gmra.mxu0 %vm1332_vm1, %v3084_v54  ;;  %6935 = vmatmul.mubr.msk.f32.gmra.mxu1 %vm1332_vm1, %v8696_v28 }
  0xfc   :  { %6911 = vmatprep.mubr.msk.f32.mxu0 %vm1332_vm1, %v10327_v61  ;;  %6937 = vmatprep.mubr.msk.f32.mxu1 %vm1332_vm1, %v8565_v30  ;;  %v4116_v61 = vld [vmem:[%s10300_s3 + $0x58] sm:$0xff] }
  0xff   :  { %6912 = vmatmul.mubr.msk.f32.gmra.mxu0 %vm1332_vm1, %v10328_v53  ;;  %6938 = vmatmul.mubr.msk.f32.gmra.mxu1 %vm1332_vm1, %v8585_v9 }
 0x100   :  { %6914 = vmatprep.mubr.msk.f32.mxu0 %vm1332_vm1, %v10329_v24  ;;  %6940 = vmatprep.mubr.msk.f32.mxu1 %vm1332_vm1, %v8596_v37 }
 0x101   :  { %v6823_v56 = vpop.f32.mrf.mxu1 }
 0x103   :  { %6915 = vmatmul.mubr.msk.f32.gmra.mxu0 %vm1332_vm1, %v10330_v21  ;;  %6941 = vmatmul.mubr.msk.f32.gmra.mxu1 %vm1332_vm1, %v8606_v42  ;;  %v8719_v30 = vpop.f32.mrf.mxu1 }
 0x104   :  { %v6797_v59 = vpop.f32.mrf.mxu0  ;;  %6917 = vmatprep.mubr.msk.f32.mxu0 %vm1332_vm1, %v10331_v43  ;;  %6943 = vmatprep.mubr.msk.f32.mxu1 %vm1332_vm1, %v8624_v33 }
 0x105   :  { %v8688_v45 = vadd.f32 %v6823_v56, %v6797_v59  ;;  %v4117_v59 = vld [vmem:[%s10300_s3 + $0x60] sm:$0xff] }
 0x106   :  { %v8729_v13 = vpop.f32.mrf.mxu0 }
 0x107   :  { %6918 = vmatmul.mubr.msk.f32.gmra.mxu0 %vm1332_vm1, %v10332_v34  ;;  %6944 = vmatmul.mubr.msk.f32.gmra.mxu1 %vm1332_vm1, %v8632_v57 }
 0x108   :  { %6920 = vmatprep.mubr.msk.f32.mxu0 %vm1332_vm1, %v8456_v55  ;;  %6946 = vmatprep.mubr.msk.f32.mxu1 %vm1332_vm1, %v8643_v52 }
 0x10b   :  { %6921 = vmatmul.mubr.msk.f32.gmra.mxu0 %vm1332_vm1, %v3087_v16  ;;  %6947 = vmatmul.mubr.msk.f32.gmra.mxu1 %vm1332_vm1, %v8737_v26 }
 0x10c   :  { %6951 = vmatprep.mubr.msk.f32.mxu0 %vm1332_vm1, %v8429_v44  ;;  %6977 = vmatprep.mubr.msk.f32.mxu1 %vm1332_vm1, %v7905_v5  ;;  %v7548_v44 = vld [vmem:[#allocation2 + $0x60] sm:$0xff]  ;;  %v7549_v5 = vld [vmem:[#allocation2 + $0x70] sm:$0xff] }
 0x10f   :  { %6952 = vmatmul.mubr.msk.f32.vlgmr.msra.gmra.mxu0 %vm1332_vm1, %v8432_v7  ;;  %6978 = vmatmul.mubr.msk.f32.vlgmr.msra.gmra.mxu1 %vm1332_vm1, %v7953_v60  ;;  %v2194_v7 = vld [vmem:[#allocation2 + $0x90] sm:$0xff] }
 0x110   :  { %v6826_v3 = vpop.f32.mrf.mxu1  ;;  %7002 = vmatpush3.msk.msra.mxu0 %vm2332_vm0, %v6204_v41  ;;  %6954 = vmatprep.mubr.msk.f32.mxu0 %vm1332_vm1, %v8442_v22  ;;  %v3608_v60 = vrot.slane %v2194_v7, 1  ;;  %v3609_v22 = vrot.slane %v2195_v27, 1 }
 0x111   :  { %6980 = vmatprep.mubr.msk.f32.mxu1 %vm1332_vm1, %v7999_v50  ;;  %7028 = vmatpush3.msra.mxu1 %v6238_v51 }
 0x112   :  { %v3610_v50 = vsel %vm2249_vm4, %v3608_v60, %v3609_v22  ;;  %v4109_v60 = vld [vmem:[%s10300_s3 + $0x20] sm:$0xff]  ;;  %v6228_v22 = vld [vmem:[%s10300_s3 + $0xa8] sm:$0xff] }
 0x113   :  { %v6800_v20 = vpop.f32.mrf.mxu0  ;;  %6955 = vmatmul.mubr.msk.f32.gmra.mxu0 %vm1332_vm1, %v8504_v49  ;;  %6981 = vmatmul.mubr.msk.f32.gmra.mxu1 %vm1332_vm1, %v8038_v47  ;;  %v8773_v47 = vpop.f32.mrf.mxu1 }
 0x114   :  { %v8741_v11 = vadd.f32 %v6826_v3, %v6800_v20  ;;  %6957 = vmatprep.mubr.msk.f32.mxu0 %vm1332_vm1, %v7548_v44  ;;  %6983 = vmatprep.mubr.msk.f32.mxu1 %vm1332_vm1, %v8115_v48  ;;  %v6230_v20 = vld [vmem:[%s10300_s3 + $0xb8] sm:$0xff] }
 0x115   :  { %v8780_v48 = vpop.f32.mrf.mxu0 }
 0x117   :  { %6958 = vmatmul.mubr.msk.f32.gmra.mxu0 %vm1332_vm1, %v7549_v5  ;;  %6984 = vmatmul.mubr.msk.f32.gmra.mxu1 %vm1332_vm1, %v10326_v39  ;;  %v4118_v39 = vld [vmem:[%s10300_s3 + $0x68] sm:$0xff]  ;;  %v6229_v5 = vld [vmem:[%s10300_s3 + $0xb0] sm:$0xff] }
 0x118   :  { %6960 = vmatprep.mubr.msk.f32.mxu0 %vm1332_vm1, %v8570_v38  ;;  %6986 = vmatprep.mubr.msk.f32.mxu1 %vm1332_vm1, %v3084_v54  ;;  %v2215_v38 = vld [vmem:[#allocation2 + $0x138] sm:$0x3]  ;;  %v6237_v54 = vld [vmem:[%s10300_s3 + $0xf0] sm:$0xff] }
 0x119   :  { %v3788_v41 = vrot.slane %v2215_v38, 2  ;;  %7029 = vmatprep.subr.mxu1 %v6237_v54 }
 0x11a   :  { %7030 = vmatpush3.msra.mxu1 %v6237_v54 }
 0x11b   :  { %6961 = vmatmul.mubr.msk.f32.gmra.mxu0 %vm1332_vm1, %v2194_v7  ;;  %6987 = vmatmul.mubr.msk.f32.gmra.mxu1 %vm1332_vm1, %v3610_v50  ;;  %v4108_v50 = vld [vmem:[%s10300_s3 + $0x18] sm:$0xff] }
 0x11c   :  { %6963 = vmatprep.mubr.msk.f32.mxu0 %vm1332_vm1, %v8246_v4  ;;  %6989 = vmatprep.mubr.msk.f32.mxu1 %vm1332_vm1, %v10328_v53  ;;  %v6235_v53 = vld [vmem:[%s10300_s3 + $0xe0] sm:$0xff] }
 0x11f   :  { %6964 = vmatmul.mubr.msk.f32.gmra.mxu0 %vm1332_vm1, %v8284_v23  ;;  %6990 = vmatmul.mubr.msk.f32.gmra.mxu1 %vm1332_vm1, %v10329_v24  ;;  %v2214_v23 = vld [vmem:[#allocation2 + $0x130] sm:$0xff] }
 0x120   :  { %6966 = vmatprep.mubr.msk.f32.mxu0 %vm1332_vm1, %v8336_v1  ;;  %v6829_v49 = vpop.f32.mrf.mxu1  ;;  %6992 = vmatprep.mubr.msk.f32.mxu1 %vm1332_vm1, %v10330_v21  ;;  %v3611_v1 = vrot.slane %v2214_v23, 1  ;;  %v4115_v24 = vld [vmem:[%s10300_s3 + $0x50] sm:$0xff]  ;;  %v4114_v21 = vld [vmem:[%s10300_s3 + $0x48] sm:$0xff] }
 0x122   :  { %v8818_v18 = vpop.f32.mrf.mxu1 }
 0x123   :  { %6967 = vmatmul.mubr.msk.f32.gmra.mxu0 %vm1332_vm1, %v8368_v10  ;;  %v6803_v4 = vpop.f32.mrf.mxu0  ;;  %6993 = vmatmul.mubr.msk.f32.gmra.mxu1 %vm1332_vm1, %v10331_v43  ;;  %v3612_v10 = vrot.slane %v2215_v38, 1  ;;  %v4106_v38 = vld [vmem:[%s10300_s3 + $0x8] sm:$0xff] }
 0x124   :  { %6969 = vmatprep.mubr.msk.f32.mxu0 %vm1332_vm1, %v8399_v58  ;;  %v8792_v15 = vadd.f32 %v6829_v49, %v6803_v4  ;;  %6995 = vmatprep.mubr.msk.f32.mxu1 %vm1332_vm1, %v10332_v34  ;;  %v6227_v49 = vld [vmem:[%s10300_s3 + $0xa0] sm:$0xff]  ;;  %v4107_v4 = vld [vmem:[%s10300_s3 + $0x10] sm:$0xff] }
 0x125   :  { %v3613_v58 = vsel %vm2249_vm4, %v3611_v1, %v3612_v10  ;;  %v8820_v31 = vpop.f32.mrf.mxu0  ;;  %v6225_v1 = vld [vmem:[%s10300_s3 + $0x90] sm:$0xff]  ;;  %v4105_v10 = vld [vmem:[%s10300_s3] sm:$0xff] }
 0x127   :  { %6970 = vmatmul.mubr.msk.f32.gmra.mxu0 %vm1332_vm1, %v8446_v35  ;;  %6996 = vmatmul.mubr.msk.f32.gmra.mxu1 %vm1332_vm1, %v8456_v55  ;;  %v3784_v55 = vrot.slane %v2194_v7, 2  ;;  %v3785_v35 = vrot.slane %v2195_v27, 2  ;;  %v4110_v7 = vld [vmem:[%s10300_s3 + $0x28] sm:$0xff] }
 0x128   :  { %6972 = vmatprep.mubr.msk.f32.mxu0 %vm1332_vm1, %v8651_v17  ;;  %6998 = vmatprep.mubr.msk.f32.mxu1 %vm1332_vm1, %v3087_v16  ;;  %v3787_v17 = vrot.slane %v2214_v23, 2  ;;  %v6231_v16 = vld [vmem:[%s10300_s3 + $0xc0] sm:$0xff] }
 0x12b   :  { %6973 = vmatmul.mubr.msk.f32.gmra.mxu0 %vm1332_vm1, %v2214_v23  ;;  %6999 = vmatmul.mubr.msk.f32.gmra.mxu1 %vm1332_vm1, %v3613_v58  ;;  %v6226_v23 = vld [vmem:[%s10300_s3 + $0x98] sm:$0xff]  ;;  %v6224_v58 = vld [vmem:[%s10300_s3 + $0x88] sm:$0xff] }
 0x12c   :  { %7003 = vmatprep.mubr.msk.f32.mxu0 %vm1332_vm1, %v8476_v29  ;;  %v3786_v29 = vsel %vm2661_vm12, %v3784_v55, %v3785_v35  ;;  %v8957_v55 = vld [vmem:[#allocation3] sm:$0xff]  ;;  %v8959_v35 = vld [vmem:[#allocation3 + $0x8] sm:$0x3] }
 0x12f   :  { %7004 = vmatmul.mubr.msk.f32.vlgmr.msra.gmra.mxu0 %vm1332_vm1, %v8485_v0 }
 0x130   :  { %7006 = vmatprep.mubr.msk.f32.mxu0 %vm1332_vm1, %v8502_v40 }
 0x133   :  { %7007 = vmatmul.mubr.msk.f32.gmra.mxu0 %vm1332_vm1, %v8539_v36 }
 0x134   :  { %7009 = vmatprep.mubr.msk.f32.mxu0 %vm1332_vm1, %v8551_v62 }
 0x137   :  { %7010 = vmatmul.mubr.msk.f32.gmra.mxu0 %vm1332_vm1, %v8554_v12  ;;  %v6832_v0 = vpop.f32.mrf.mxu1 }
 0x138   :  { %7012 = vmatprep.mubr.msk.f32.mxu0 %vm1332_vm1, %v8696_v28  ;;  %v6236_v28 = vld [vmem:[%s10300_s3 + $0xe8] sm:$0xff] }
 0x139   :  { %v8836_v62 = vpop.f32.mrf.mxu1  ;;  %7031 = vmatprep.subr.mxu1 %v6236_v28 }
 0x13a   :  { %v6806_v40 = vpop.f32.mrf.mxu0  ;;  %7032 = vmatpush3.msra.mxu1 %v6236_v28 }
 0x13b   :  { %7013 = vmatmul.mubr.msk.f32.gmra.mxu0 %vm1332_vm1, %v3786_v29  ;;  %v8828_v36 = vadd.f32 %v6832_v0, %v6806_v40  ;;  %7033 = vmatprep.subr.mxu1 %v6235_v53  ;;  %v4153_v29 = vrot.slane %v8957_v55, 1  ;;  %v8965_v0 = vld [vmem:[%s10300_s3 + $0x1f8] sm:$0xff]  ;;  %v4154_v40 = vrot.slane %v8959_v35, 1 }
 0x13c   :  { %7015 = vmatprep.mubr.msk.f32.mxu0 %vm1332_vm1, %v8585_v9  ;;  %v8838_v12 = vpop.f32.mrf.mxu0  ;;  %7034 = vmatpush3.msra.mxu1 %v6235_v53  ;;  %10333 = vst [vmem:[#allocation4_spill] sm:$0xff] %v8965_v0 }
 0x13d   :  { %7035 = vmatprep.subr.mxu1 %v6234_v32 }
 0x13e   :  { %7036 = vmatpush3.msra.mxu1 %v6234_v32 }
 0x13f   :  { %7016 = vmatmul.mubr.msk.f32.gmra.mxu0 %vm1332_vm1, %v8596_v37  ;;  %7037 = vmatprep.subr.mxu1 %v6233_v2 }
 0x140   :  { %7018 = vmatprep.mubr.msk.f32.mxu0 %vm1332_vm1, %v8606_v42  ;;  %v3789_v42 = vsel %vm2661_vm12, %v3787_v17, %v3788_v41  ;;  %7038 = vmatpush3.msra.mxu1 %v6233_v2  ;;  %v6223_v17 = vld [vmem:[%s10300_s3 + $0x80] sm:$0xff]  ;;  %v4155_v41 = vsel %vm2249_vm4, %v4153_v29, %v4154_v40 }
 0x141   :  { %7039 = vmatprep.subr.mxu1 %v6232_v6  ;;  %7059 = vmatprep.mubr.f32.mxu1 %v4155_v41 }
 0x142   :  { %7040 = vmatpush3.msra.mxu1 %v6232_v6 }
 0x143   :  { %7019 = vmatmul.mubr.msk.f32.gmra.mxu0 %vm1332_vm1, %v8624_v33  ;;  %7041 = vmatprep.subr.mxu1 %v6231_v16 }
 0x144   :  { %7021 = vmatprep.mubr.msk.f32.mxu0 %vm1332_vm1, %v8632_v57  ;;  %v6835_v25 = vpop.f32.mrf.mxu1  ;;  %7042 = vmatpush3.msra.mxu1 %v6231_v16 }
 0x145   :  { %7043 = vmatprep.subr.mxu1 %v6230_v20 }
 0x146   :  { %v8852_v33 = vpop.f32.mrf.mxu1  ;;  %7044 = vmatpush3.msra.mxu1 %v6230_v20 }
 0x147   :  { %v6809_v9 = vpop.f32.mrf.mxu0  ;;  %7022 = vmatmul.mubr.msk.f32.gmra.mxu0 %vm1332_vm1, %v8643_v52  ;;  %v4120_v52 = vld [vmem:[%s10300_s3 + $0x78] sm:$0xff]  ;;  %7045 = vmatprep.subr.mxu1 %v6229_v5 }
 0x148   :  { %v8846_v37 = vadd.f32 %v6835_v25, %v6809_v9  ;;  %7024 = vmatprep.mubr.msk.f32.mxu0 %vm1332_vm1, %v8737_v26  ;;  %7083 = vmatprep.subr.mxu0 %v4120_v52  ;;  %v4111_v26 = vld [vmem:[%s10300_s3 + $0x30] sm:$0xff]  ;;  %v8977_v25 = vld [vmem:[%s10300_s3 + $0x178] sm:$0xff] }
 0x149   :  { %v8854_v8 = vpop.f32.mrf.mxu0  ;;  %7084 = vmatpush3.msra.mxu0 %v4120_v52  ;;  %7046 = vmatpush3.msra.mxu1 %v6229_v5  ;;  %10334 = vst [vmem:[#allocation5_spill] sm:$0xff] %v8977_v25 }
 0x14a   :  { %7085 = vmatprep.subr.mxu0 %v4119_v46  ;;  %7047 = vmatprep.subr.mxu1 %v6228_v22 }
 0x14b   :  { %7025 = vmatmul.mubr.msk.f32.gmra.mxu0 %vm1332_vm1, %v3789_v42  ;;  %7048 = vmatpush3.msra.mxu1 %v6228_v22 }
 0x14c   :  { %7086 = vmatpush3.msra.mxu0 %v4119_v46  ;;  %7049 = vmatprep.subr.mxu1 %v6227_v49 }
 0x14d   :  { %7087 = vmatprep.subr.mxu0 %v4118_v39  ;;  %7050 = vmatpush3.msra.mxu1 %v6227_v49 }
 0x14e   :  { %7088 = vmatpush3.msra.mxu0 %v4118_v39  ;;  %7051 = vmatprep.subr.mxu1 %v6226_v23 }
 0x14f   :  { %7089 = vmatprep.subr.mxu0 %v4117_v59  ;;  %7052 = vmatpush3.msra.mxu1 %v6226_v23 }
 0x150   :  { %7090 = vmatpush3.msra.mxu0 %v4117_v59  ;;  %7053 = vmatprep.subr.mxu1 %v6225_v1 }
 0x151   :  { %7091 = vmatprep.subr.mxu0 %v4116_v61  ;;  %7054 = vmatpush3.msra.mxu1 %v6225_v1 }
 0x152   :  { %7092 = vmatpush3.msra.mxu0 %v4116_v61  ;;  %7055 = vmatprep.subr.mxu1 %v6224_v58 }
 0x153   :  { %7093 = vmatprep.subr.mxu0 %v4115_v24  ;;  %7056 = vmatpush3.msra.mxu1 %v6224_v58 }
 0x154   :  { %7094 = vmatpush3.msra.mxu0 %v4115_v24  ;;  %7115 = vmatprep.mubr.f32.mxu0 %v8957_v55 }
 0x155   :  { %7095 = vmatprep.subr.mxu0 %v4114_v21  ;;  %7057 = vmatprep.subr.mxu1 %v6223_v17 }
 0x156   :  { %7096 = vmatpush3.msra.mxu0 %v4114_v21  ;;  %7058 = vmatpush3.msra.mxu1 %v6223_v17 }
 0x157   :  { %7097 = vmatprep.subr.mxu0 %v4113_v63  ;;  %7139 = vmatprep.subr.mxu1 %v8977_v25 }
 0x158   :  { %7098 = vmatpush3.msra.mxu0 %v4113_v63 }
 0x159   :  { %7099 = vmatprep.subr.mxu0 %v4112_v19 }
 0x15a   :  { %7100 = vmatpush3.msra.mxu0 %v4112_v19 }
 0x15b   :  { %v6838_v57 = vpop.f32.mrf.mxu1  ;;  %7101 = vmatprep.subr.mxu0 %v4111_v26 }
 0x15c   :  { %7102 = vmatpush3.msra.mxu0 %v4111_v26 }
 0x15d   :  { %v8897_v43 = vpop.f32.mrf.mxu1  ;;  %7103 = vmatprep.subr.mxu0 %v4110_v7 }
 0x15e   :  { %v6812_v14 = vpop.f32.mrf.mxu0  ;;  %7104 = vmatpush3.msra.mxu0 %v4110_v7 }
 0x15f   :  { %v8856_v56 = vadd.f32 %v6838_v57, %v6812_v14  ;;  %7105 = vmatprep.subr.mxu0 %v4109_v60 }
 0x160   :  { %v8905_v34 = vpop.f32.mrf.mxu0  ;;  %7106 = vmatpush3.msra.mxu0 %v4109_v60 }
 0x161   :  { %7107 = vmatprep.subr.mxu0 %v4108_v50 }
 0x162   :  { %7108 = vmatpush3.msra.mxu0 %v4108_v50 }
 0x163   :  { %7109 = vmatprep.subr.mxu0 %v4107_v4 }
 0x164   :  { %7110 = vmatpush3.msra.mxu0 %v4107_v4 }
 0x165   :  { %7111 = vmatprep.subr.mxu0 %v4106_v38 }
 0x166   :  { %7112 = vmatpush3.msra.mxu0 %v4106_v38 }
 0x167   :  { %7113 = vmatprep.subr.mxu0 %v4105_v10 }
 0x168   :  { %7114 = vmatpush3.msra.mxu0 %v4105_v10 }
 0x169   :  { %7195 = vmatprep.subr.mxu0 %v8965_v0 }
 0x172   :  { %v6841_v3 = vpop.f32.mrf.mxu1 }
 0x174   :  { %v8979_v9 = vpop.f32.mrf.mxu1 }
 0x175   :  { %v6815_v44 = vpop.f32.mrf.mxu0 }
 0x176   :  { %v8922_v27 = vadd.f32 %v6841_v3, %v6815_v44 }
 0x177   :  { %v8982_v42 = vpop.f32.mrf.mxu0 }
 0x188   :  { %v6844_v57 = vpop.f32.mrf.mxu1 }
 0x18a   :  { %v8984_v14 = vpop.f32.mrf.mxu1 }
 0x18b   :  { %v6818_v52 = vpop.f32.mrf.mxu0 }
 0x18c   :  { %v2658_v46 = vadd.f32 %v6844_v57, %v6818_v52  ;;  %v8986_v51 = vpop.f32.mrf.mxu1  ;;  %v4525_v52 = vrot.slane %v8959_v35, 2 }
 0x18d   :  { %v8988_v39 = vpop.f32.mrf.mxu0 }
 0x18e   :  { %v8990_v54 = vpop.f32.mrf.mxu1 }
 0x18f   :  { %v6849_v59 = vpop.f32.mrf.mxu0 }
 0x190   :  { %v8993_v28 = vadd.f32 %v6849_v59, %v8688_v45 }
 0x191   :  { %v8995_v61 = vpop.f32.mrf.mxu0  ;;  %v8997_v53 = vpop.f32.mrf.mxu1 }
 0x193   :  { %v6852_v24 = vpop.f32.mrf.mxu0  ;;  %v8999_v32 = vpop.f32.mrf.mxu1 }
 0x194   :  { %v9002_v21 = vadd.f32 %v6852_v24, %v8741_v11 }
 0x195   :  { %v9004_v2 = vpop.f32.mrf.mxu0  ;;  %v9006_v63 = vpop.f32.mrf.mxu1 }
 0x197   :  { %v6855_v6 = vpop.f32.mrf.mxu0  ;;  %v9008_v19 = vpop.f32.mrf.mxu1 }
 0x198   :  { %v9011_v45 = vadd.f32 %v6855_v6, %v8792_v15 }
 0x199   :  { %v9013_v16 = vpop.f32.mrf.mxu0  ;;  %v9015_v26 = vpop.f32.mrf.mxu1 }
 0x19b   :  { %v6858_v3 = vpop.f32.mrf.mxu0  ;;  %v9022_v44 = vpop.f32.mrf.mxu1 }
 0x19c   :  { %v9018_v20 = vadd.f32 %v6858_v3, %v8828_v36 }
 0x19d   :  { %v9020_v11 = vpop.f32.mrf.mxu0  ;;  %v9024_v5 = vpop.f32.mrf.mxu1 }
 0x19f   :  { %v6861_v7 = vpop.f32.mrf.mxu0  ;;  %v9031_v22 = vpop.f32.mrf.mxu1 }
 0x1a0   :  { %v9027_v60 = vadd.f32 %v6861_v7, %v8846_v37 }
 0x1a1   :  { %v9029_v15 = vpop.f32.mrf.mxu0  ;;  %v9033_v49 = vpop.f32.mrf.mxu1 }
 0x1a3   :  { %v6864_v50 = vpop.f32.mrf.mxu0  ;;  %v9040_v23 = vpop.f32.mrf.mxu1 }
 0x1a4   :  { %v9036_v36 = vadd.f32 %v6864_v50, %v8856_v56  ;;  %10335 = vst [vmem:[#allocation6_spill] sm:$0xff] %v9040_v23  ;;  %v4524_v56 = vrot.slane %v8957_v55, 2  ;;  %v2583_v23 = vadd.f32 %v8719_v30, %v8729_v13 }
 0x1a5   :  { %v9038_v4 = vpop.f32.mrf.mxu0  ;;  %v9042_v1 = vpop.f32.mrf.mxu1 }
 0x1a6   :  { %10336 = vst [vmem:[#allocation7_spill] sm:$0xff] %v9042_v1  ;;  %v9062_v24 = vsel %vm2661_vm12, %v4524_v56, %v4525_v52 }
 0x1a7   :  { %v6867_v38 = vpop.f32.mrf.mxu0  ;;  %v9049_v58 = vpop.f32.mrf.mxu1  ;;  %10343 = vst [vmem:[#allocation14_spill] sm:$0xff] %v9062_v24 }
 0x1a8   :  { %v9045_v37 = vadd.f32 %v6867_v38, %v8922_v27  ;;  %10338 = vst [vmem:[#allocation9_spill] sm:$0xff] %v9049_v58 }
 0x1a9   :  { %v9047_v10 = vpop.f32.mrf.mxu0 }
 0x1aa   :  { %10337 = vst [vmem:[#allocation8_spill] sm:$0xff] %v9045_v37 }
 0x1ab   :  { %v6870_v29 = vpop.f32.mrf.mxu0  ;;  %v9056_v41 = vpop.f32.mrf.mxu1 }
 0x1ac   :  { %v9051_v40 = vadd.f32 %v6870_v29, %v2658_v46  ;;  %10341 = vst [vmem:[#allocation12_spill] sm:$0xff] %v9056_v41 }
 0x1ad   :  { %v9053_v17 = vpop.f32.mrf.mxu0  ;;  %v9059_v59 = vpop.f32.mrf.mxu1 }
 0x1ae   :  { %10339 = vst [vmem:[#allocation10_spill] sm:$0xff] %v9051_v40  ;;  %10340 = vst [vmem:[#allocation11_spill] sm:$0xff] %v9053_v17 }
 0x1af   :  { %v6901_v57 = vpop.f32.mrf.mxu0  ;;  %10342 = vst [vmem:[#allocation13_spill] sm:$0xff] %v9059_v59  ;;  %v9064_v6 = vpop.f32.mrf.mxu1 }
 0x1b1   :  { %v3163_v27 = vpop.f32.mrf.mxu0  ;;  %v9068_v46 = vpop.f32.mrf.mxu1 }
 0x1b3   :  { %v9066_v3 = vpop.f32.mrf.mxu0  ;;  %v9072_v55 = vpop.f32.mrf.mxu1 }
 0x1b5   :  { %v9070_v7 = vpop.f32.mrf.mxu0  ;;  %v9076_v38 = vpop.f32.mrf.mxu1 }
 0x1b7   :  { %v9074_v50 = vpop.f32.mrf.mxu0  ;;  %v9080_v29 = vpop.f32.mrf.mxu1 }
 0x1b8   :  { %10344 = vst [vmem:[#allocation15_spill] sm:$0xff] %v9080_v29 }
 0x1b9   :  { %v9078_v35 = vpop.f32.mrf.mxu0  ;;  %v9084_v52 = vpop.f32.mrf.mxu1 }
 0x1ba   :  { %10346 = vst [vmem:[#allocation17_spill] sm:$0xff] %v9084_v52 }
 0x1bb   :  { %v9082_v56 = vpop.f32.mrf.mxu0  ;;  %v9088_v25 = vpop.f32.mrf.mxu1 }
 0x1bc   :  { %10345 = vst [vmem:[#allocation16_spill] sm:$0xff] %v9082_v56  ;;  %10348 = vst [vmem:[#allocation19_spill] sm:$0xff] %v9088_v25 }
 0x1bd   :  { %v9086_v24 = vpop.f32.mrf.mxu0  ;;  %v9092_v59 = vpop.f32.mrf.mxu1 }
 0x1be   :  { %10347 = vst [vmem:[#allocation18_spill] sm:$0xff] %v9086_v24  ;;  %10350 = vst [vmem:[#allocation21_spill] sm:$0xff] %v9092_v59 }
 0x1bf   :  { %v9090_v0 = vpop.f32.mrf.mxu0  ;;  %v9096_v40 = vpop.f32.mrf.mxu1 }
 0x1c0   :  { %10349 = vst [vmem:[#allocation20_spill] sm:$0xff] %v9090_v0  ;;  %10352 = vst [vmem:[#allocation23_spill] sm:$0xff] %v9096_v40 }
 0x1c1   :  { %v9094_v41 = vpop.f32.mrf.mxu0  ;;  %v9100_v58 = vpop.f32.mrf.mxu1 }
 0x1c2   :  { %10351 = vst [vmem:[#allocation22_spill] sm:$0xff] %v9094_v41  ;;  %10354 = vst [vmem:[#allocation25_spill] sm:$0xff] %v9100_v58 }
 0x1c3   :  { %v9098_v17 = vpop.f32.mrf.mxu0  ;;  %v9104_v37 = vpop.f32.mrf.mxu1 }
 0x1c4   :  { %10353 = vst [vmem:[#allocation24_spill] sm:$0xff] %v9098_v17  ;;  %10356 = vst [vmem:[#allocation27_spill] sm:$0xff] %v9104_v37 }
 0x1c5   :  { %v9102_v1 = vpop.f32.mrf.mxu0  ;;  %v9108_v24 = vpop.f32.mrf.mxu1 }
 0x1c6   :  { %10355 = vst [vmem:[#allocation26_spill] sm:$0xff] %v9102_v1  ;;  %10358 = vst [vmem:[#allocation29_spill] sm:$0xff] %v9108_v24 }
 0x1c7   :  { %v9106_v52 = vpop.f32.mrf.mxu0  ;;  %v9112_v0 = vpop.f32.mrf.mxu1 }
 0x1c8   :  { %10357 = vst [vmem:[#allocation28_spill] sm:$0xff] %v9106_v52  ;;  %10360 = vst [vmem:[#allocation31_spill] sm:$0xff] %v9112_v0 }
 0x1c9   :  { %v9110_v25 = vpop.f32.mrf.mxu0  ;;  %v9116_v41 = vpop.f32.mrf.mxu1 }
 0x1ca   :  { %10359 = vst [vmem:[#allocation30_spill] sm:$0xff] %v9110_v25  ;;  %10362 = vst [vmem:[#allocation33_spill] sm:$0xff] %v9116_v41 }
 0x1cb   :  { %v9114_v59 = vpop.f32.mrf.mxu0  ;;  %v9120_v17 = vpop.f32.mrf.mxu1 }
 0x1cc   :  { %10361 = vst [vmem:[#allocation32_spill] sm:$0xff] %v9114_v59  ;;  %10364 = vst [vmem:[#allocation35_spill] sm:$0xff] %v9120_v17 }
 0x1cd   :  { %v9118_v40 = vpop.f32.mrf.mxu0  ;;  %v9122_v1 = vpop.f32.mrf.mxu1 }
 0x1ce   :  { %10363 = vst [vmem:[#allocation34_spill] sm:$0xff] %v9118_v40  ;;  %10365 = vst [vmem:[#allocation36_spill] sm:$0xff] %v9122_v1 }
 0x1cf   :  { %v6953_v58 = vpop.f32.mrf.mxu0  ;;  %v6979_v56 = vpop.f32.mrf.mxu1 }
 0x1d1   :  { %v3511_v37 = vpop.f32.mrf.mxu0  ;;  %v9124_v29 = vpop.f32.mrf.mxu1 }
 0x1d2   :  { %10366 = vst [vmem:[#allocation37_spill] sm:$0xff] %v9124_v29 }
 0x1d3   :  { %v6956_v52 = vpop.f32.mrf.mxu0  ;;  %v9128_v25 = vpop.f32.mrf.mxu1 }
 0x1d4   :  { %10368 = vst [vmem:[#allocation39_spill] sm:$0xff] %v9128_v25 }
 0x1d5   :  { %v9126_v24 = vpop.f32.mrf.mxu0  ;;  %v9132_v59 = vpop.f32.mrf.mxu1 }
 0x1d6   :  { %10367 = vst [vmem:[#allocation38_spill] sm:$0xff] %v9126_v24  ;;  %10370 = vst [vmem:[#allocation41_spill] sm:$0xff] %v9132_v59  ;;  %v2892_v24 = vadd.f32 %v8995_v61, %v2583_v23  ;;  %v2593_v59 = vadd.f32 %v8773_v47, %v8780_v48  ;;  %v2603_v61 = vadd.f32 %v8818_v18, %v8820_v31 }
 0x1d7   :  { %v9130_v0 = vpop.f32.mrf.mxu0  ;;  %v9138_v17 = vpop.f32.mrf.mxu1  ;;  %v3067_v47 = vadd.f32 %v8997_v53, %v9002_v21  ;;  %v2633_v53 = vadd.f32 %v8897_v43, %v8905_v34 }
 0x1d8   :  { %10369 = vst [vmem:[#allocation40_spill] sm:$0xff] %v9130_v0  ;;  %10372 = vst [vmem:[#allocation43_spill] sm:$0xff] %v9138_v17  ;;  %v2894_v30 = vadd.f32 %v9004_v2, %v2593_v59 }
 0x1d9   :  { %v9134_v41 = vpop.f32.mrf.mxu0  ;;  %v9147_v25 = vpop.f32.mrf.mxu1  ;;  %v3245_v31 = vadd.f32 %v9066_v3, %v3067_v47  ;;  %v2902_v43 = vadd.f32 %v9038_v4, %v2633_v53  ;;  %v10376_v3 = vld [vmem:[#allocation15_spill] sm:$0xff] }
 0x1db   :  { %v9136_v40 = vpop.f32.mrf.mxu0  ;;  %v10387_v53 = vld [vmem:[#allocation39_spill] sm:$0xff] }
 0x1dc   :  { %10371 = vst [vmem:[#allocation42_spill] sm:$0xff] %v9136_v40  ;;  %v3065_v40 = vadd.f32 %v8986_v51, %v8993_v28  ;;  %v2613_v51 = vadd.f32 %v8836_v62, %v8838_v12  ;;  %v2896_v28 = vadd.f32 %v9013_v16, %v2603_v61  ;;  %v3069_v62 = vadd.f32 %v9006_v63, %v9011_v45  ;;  %v10383_v61 = vld [vmem:[#allocation18_spill] sm:$0xff] }
 0x1dd   :  { %v9140_v1 = vpop.f32.mrf.mxu0  ;;  %v2653_v45 = vadd.f32 %v8984_v14, %v8988_v39 }
 0x1de   :  { %10373 = vst [vmem:[#allocation44_spill] sm:$0xff] %v9140_v1  ;;  %v3064_v1 = vadd.f32 %v8990_v54, %v2892_v24  ;;  %v3243_v13 = vadd.f32 %v6901_v57, %v3065_v40  ;;  %v2623_v54 = vadd.f32 %v8852_v33, %v8854_v8  ;;  %v3066_v40 = vadd.f32 %v8999_v32, %v2894_v30  ;;  %v10382_v30 = vld [vmem:[#allocation17_spill] sm:$0xff] }
 0x1df   :  { %v9144_v29 = vpop.f32.mrf.mxu0  ;;  %v2898_v12 = vadd.f32 %v9020_v11, %v2613_v51  ;;  %v3068_v59 = vadd.f32 %v9008_v19, %v2896_v28  ;;  %v3247_v34 = vadd.f32 %v9074_v50, %v3069_v62  ;;  %v3071_v11 = vadd.f32 %v9015_v26, %v9018_v20 }
 0x1e0   :  { %10374 = vst [vmem:[#allocation45_spill] sm:$0xff] %v9144_v29  ;;  %v9159_v29 = vpop.f32.mrf.mxu1  ;;  %v3242_v48 = vadd.f32 %v3163_v27, %v3064_v1  ;;  %v3419_v18 = vadd.f32 %v9064_v6, %v3243_v13  ;;  %v2900_v33 = vadd.f32 %v9029_v15, %v2623_v54  ;;  %v3244_v21 = vadd.f32 %v9070_v7, %v3066_v40  ;;  %v10375_v6 = vld [vmem:[#allocation6_spill] sm:$0xff]  ;;  %v9220_v7 = vld [vmem:[%s10301_s2] ss:$0 sm:$0xff] }
 0x1e1   :  { %v9149_v0 = vpop.f32.mrf.mxu0  ;;  %v2643_v1 = vadd.f32 %v8979_v9, %v8982_v42  ;;  %v3421_v15 = vadd.f32 %v9072_v55, %v3245_v31  ;;  %v3070_v9 = vadd.f32 %v9022_v44, %v2898_v12  ;;  %v3073_v42 = vadd.f32 %v9024_v5, %v9027_v60  ;;  %v10377_v5 = vld [vmem:[#allocation16_spill] sm:$0xff]  ;;  %v10379_v55 = vld [vmem:[#allocation7_spill] sm:$0xff] }
 0x1e2   :  { %v9177_v57 = vpop.f32.mrf.mxu1  ;;  %v3418_v32 = vadd.f32 %v9068_v46, %v3242_v48  ;;  %v3591_v16 = vadd.f32 %v6953_v58, %v3419_v18  ;;  %v3072_v19 = vadd.f32 %v9031_v22, %v2900_v33  ;;  %v3246_v4 = vadd.f32 %v9078_v35, %v3068_v59  ;;  %v10384_v48 = vld [vmem:[#allocation20_spill] sm:$0xff]  ;;  %v10386_v18 = vld [vmem:[#allocation9_spill] sm:$0xff] }
 0x1e3   :  { %v9155_v17 = vpop.f32.mrf.mxu0  ;;  %v2904_v14 = vadd.f32 %v9047_v10, %v2643_v1  ;;  %v3420_v39 = vadd.f32 %v9076_v38, %v3244_v21  ;;  %v3593_v20 = vadd.f32 %v6956_v52, %v3421_v15  ;;  %v3074_v44 = vadd.f32 %v10375_v6, %v2902_v43  ;;  %v10378_v10 = vld [vmem:[#allocation8_spill] sm:$0xff]  ;;  %v10380_v38 = vld [vmem:[#allocation37_spill] sm:$0xff]  ;;  %v10391_v43 = vld [vmem:[#allocation19_spill] sm:$0xff] }
 0x1e4   :  { %v3590_v58 = vadd.f32 %v3511_v37, %v3418_v32  ;;  %v9201_v27 = vpop.f32.mrf.mxu1  ;;  %v3769_v26 = vadd.f32 %v6979_v56, %v3591_v16  ;;  %v3075_v37 = vadd.f32 %v9033_v49, %v9036_v36  ;;  %v3423_v46 = vadd.f32 %v10376_v3, %v3247_v34  ;;  %v10381_v56 = vld [vmem:[#allocation38_spill] sm:$0xff]  ;;  %v10385_v54 = vld [vmem:[#allocation40_spill] sm:$0xff]  ;;  %v10388_v32 = vld [vmem:[#allocation11_spill] sm:$0xff] }
 0x1e5   :  { %v9163_v23 = vpop.f32.mrf.mxu0  ;;  %v3249_v60 = vadd.f32 %v10377_v5, %v3071_v11  ;;  %v3077_v50 = vadd.f32 %v10379_v55, %v10378_v10  ;;  %v3592_v52 = vadd.f32 %v10381_v56, %v3420_v39  ;;  %v3422_v13 = vadd.f32 %v10382_v30, %v3246_v4  ;;  %v10389_v16 = vld [vmem:[#allocation10_spill] sm:$0xff]  ;;  %v10390_v1 = vld [vmem:[#allocation12_spill] sm:$0xff]  ;;  %v10395_v3 = vld [vmem:[#allocation23_spill] sm:$0xff] }
 0x1e6   :  { %v3768_v35 = vadd.f32 %v10380_v38, %v3590_v58  ;;  %v9226_v49 = vpop.f32.mrf.mxu1  ;;  %v3248_v47 = vadd.f32 %v10383_v61, %v3070_v9  ;;  %v3251_v51 = vadd.f32 %v10384_v48, %v3073_v42  ;;  %v3595_v28 = vadd.f32 %v10385_v54, %v3423_v46  ;;  %v10392_v58 = vld [vmem:[#allocation41_spill] sm:$0xff]  ;;  %v10394_v6 = vld [vmem:[#allocation22_spill] sm:$0xff]  ;;  %v10396_v5 = vld [vmem:[#allocation43_spill] sm:$0xff] }
 0x1e7   :  { %v9172_v2 = vpop.f32.mrf.mxu0  ;;  %v3076_v31 = vadd.f32 %v10386_v18, %v2904_v14  ;;  %v3771_v62 = vadd.f32 %v10387_v53, %v3593_v20  ;;  %v2906_v21 = vadd.f32 %v10388_v32, %v2653_v45  ;;  %v3079_v59 = vadd.f32 %v10390_v1, %v10389_v16  ;;  %v10397_v10 = vld [vmem:[#allocation42_spill] sm:$0xff]  ;;  %v10398_v56 = vld [vmem:[#allocation24_spill] sm:$0xff]  ;;  %v10402_v53 = vld [vmem:[#allocation13_spill] sm:$0xff] }
 0x1e8   :  { %v3425_v34 = vadd.f32 %v10391_v43, %v3249_v60  ;;  %v3594_v11 = vadd.f32 %v9134_v41, %v3422_v13  ;;  %v3770_v9 = vadd.f32 %v10392_v58, %v3592_v52  ;;  %v9241_v42 = vpop.f32.mrf.mxu1  ;;  %v3250_v45 = vadd.f32 %v10394_v6, %v3072_v19  ;;  %v10400_v13 = vld [vmem:[#allocation28_spill] sm:$0xff]  ;;  %v10405_v32 = vld [vmem:[#allocation45_spill] sm:$0xff] }
 0x1e9   :  { %v9185_v8 = vpop.f32.mrf.mxu0  ;;  %v3427_v46 = vadd.f32 %v10395_v3, %v3251_v51  ;;  %v3253_v52 = vadd.f32 %v10398_v56, %v3075_v37  ;;  %v3255_v61 = vadd.f32 %v10400_v13, %v3077_v50  ;;  %v10401_v48 = vld [vmem:[#allocation44_spill] sm:$0xff]  ;;  %v10407_v58 = vld [vmem:[#allocation29_spill] sm:$0xff] }
 0x1ea   :  { %v3597_v41 = vadd.f32 %v10397_v10, %v3425_v34  ;;  %v3772_v19 = vadd.f32 %v9147_v25, %v3594_v11  ;;  %v9255_v54 = vpop.f32.mrf.mxu1  ;;  %v10406_v11 = vld [vmem:[#allocation27_spill] sm:$0xff] }
 0x1eb   :  { %v9194_v63 = vpop.f32.mrf.mxu0  ;;  %v3599_v50 = vadd.f32 %v10405_v32, %v3427_v46  ;;  %v10410_v46 = vld [vmem:[#allocation33_spill] sm:$0xff] }
 0x1ec   :  { %v3775_v25 = vadd.f32 %v9159_v29, %v3597_v41 }
 0x1ed   :  { %v9208_v24 = vpop.f32.mrf.mxu0  ;;  %v3777_v10 = vadd.f32 %v9201_v27, %v3599_v50  ;;  %v6269_v27 = vld [vmem:[%s10300_s3 + $0x1f0] sm:$0xff] }
 0x1ef   :  { %v7005_v22 = vpop.f32.mrf.mxu0 }
 0x1f0   :  { %v3945_v36 = vadd.f32 %v7005_v22, %v3769_v26  ;;  %v10393_v26 = vld [vmem:[#allocation21_spill] sm:$0xff]  ;;  %v3773_v22 = vadd.f32 %v10396_v5, %v3595_v28 }
 0x1f1   :  { %v3865_v40 = vpop.f32.mrf.mxu0  ;;  %v3424_v20 = vadd.f32 %v10393_v26, %v3248_v47  ;;  %v9269_v26 = vpop.f32.mrf.mxu1 }
 0x1f2   :  { %v3968_v12 = vadd.f32 %v9220_v7, %v3945_v36  ;;  %v3944_v33 = vadd.f32 %v3865_v40, %v3768_v35  ;;  %v10399_v36 = vld [vmem:[#allocation26_spill] sm:$0xff] }
 0x1f3   :  { %v7008_v15 = vpop.f32.mrf.mxu0  ;;  %v3252_v30 = vadd.f32 %v10399_v36, %v3074_v44  ;;  %v3596_v51 = vadd.f32 %v10401_v48, %v3424_v20 }
 0x1f4   :  { %v3984_v4 = vmax.f32 %v3968_v12, 0.0  ;;  %v3967_v14 = vadd.f32 %v9220_v7, %v3944_v33  ;;  %v3947_v39 = vadd.f32 %v7008_v15, %v3771_v62  ;;  %v3078_v62 = vadd.f32 %v10402_v53, %v2906_v21  ;;  %v10403_v12 = vld [vmem:[#allocation25_spill] sm:$0xff]  ;;  %v10404_v33 = vld [vmem:[#allocation30_spill] sm:$0xff] }
 0x1f5   :  { %v3875_v60 = vpop.f32.mrf.mxu0  ;;  %v3426_v37 = vadd.f32 %v10403_v12, %v3250_v45  ;;  %v3254_v44 = vadd.f32 %v10404_v33, %v3076_v31  ;;  %v3429_v15 = vadd.f32 %v10406_v11, %v3253_v52  ;;  %v3774_v31 = vadd.f32 %v9177_v57, %v3596_v51  ;;  %v10409_v45 = vld [vmem:[#allocation32_spill] sm:$0xff]  ;;  %v10412_v51 = vld [vmem:[#allocation35_spill] sm:$0xff] }
 0x1f6   :  { %4050 = vst [vmem:[#allocation3 + $0x21] sm:$0xff] %v3984_v4  ;;  %v3983_v55 = vmax.f32 %v3967_v14, 0.0  ;;  %v3970_v38 = vadd.f32 %v9220_v7, %v3947_v39  ;;  %v3946_v35 = vadd.f32 %v3875_v60, %v3770_v9  ;;  %v3428_v9 = vadd.f32 %v10407_v58, %v3252_v30  ;;  %v10408_v4 = vld [vmem:[#allocation31_spill] sm:$0xff]  ;;  %v10414_v12 = vld [vmem:[#allocation4_spill] sm:$0xff] }
 0x1f7   :  { %v7011_v47 = vpop.f32.mrf.mxu0  ;;  %v3431_v21 = vadd.f32 %v10408_v4, %v3255_v61  ;;  %v3598_v14 = vadd.f32 %v9149_v0, %v3426_v37  ;;  %v3257_v3 = vadd.f32 %v10409_v45, %v3079_v59  ;;  %v3430_v5 = vadd.f32 %v10410_v46, %v3254_v44 }
 0x1f8   :  { %4049 = vst [vmem:[#allocation3 + $0x11] sm:$0xff] %v3983_v55  ;;  %v3986_v28 = vmax.f32 %v3970_v38, 0.0  ;;  %v3969_v40 = vadd.f32 %v9220_v7, %v3946_v35  ;;  %v3949_v18 = vadd.f32 %v7011_v47, %v3773_v22  ;;  %v10411_v22 = vld [vmem:[#allocation34_spill] sm:$0xff]  ;;  %v3601_v57 = vadd.f32 %v9155_v17, %v3429_v15 }
 0x1f9   :  { %v3885_v16 = vpop.f32.mrf.mxu0  ;;  %v3256_v60 = vadd.f32 %v10411_v22, %v3078_v62  ;;  %v3776_v59 = vadd.f32 %v9226_v49, %v3598_v14  ;;  %v3600_v52 = vadd.f32 %v9163_v23, %v3428_v9  ;;  %v3603_v53 = vadd.f32 %v9172_v2, %v3431_v21  ;;  %v6268_v2 = vld [vmem:[%s10300_s3 + $0x1e8] sm:$0xff] }
 0x1fa   :  { %4052 = vst [vmem:[#allocation3 + $0x41] sm:$0xff] %v3986_v28  ;;  %v3985_v1 = vmax.f32 %v3969_v40, 0.0  ;;  %v3972_v43 = vadd.f32 %v9220_v7, %v3949_v18  ;;  %v3948_v34 = vadd.f32 %v3885_v16, %v3772_v19  ;;  %v3749_v19 = vpop.f32.mrf.mxu1  ;;  %v3433_v28 = vadd.f32 %v10412_v51, %v3257_v3  ;;  %v10413_v40 = vld [vmem:[#allocation36_spill] sm:$0xff]  ;;  %v6253_v16 = vld [vmem:[%s10300_s3 + $0x170] sm:$0xff] }
 0x1fb   :  { %v7014_v39 = vpop.f32.mrf.mxu0  ;;  %v3432_v18 = vadd.f32 %v10413_v40, %v3256_v60  ;;  %v3779_v33 = vadd.f32 %v9241_v42, %v3601_v57  ;;  %v3602_v42 = vadd.f32 %v9185_v8, %v3430_v5 }
 0x1fc   :  { %4051 = vst [vmem:[#allocation3 + $0x31] sm:$0xff] %v3985_v1  ;;  %v3988_v29 = vmax.f32 %v3972_v43, 0.0  ;;  %v3971_v20 = vadd.f32 %v9220_v7, %v3948_v34  ;;  %v3951_v6 = vadd.f32 %v7014_v39, %v3775_v25  ;;  %v3778_v1 = vadd.f32 %v9255_v54, %v3600_v52  ;;  %v7000_v4 = vpop.f32.mrf.mxu1 }
 0x1fd   :  { %v3895_v41 = vpop.f32.mrf.mxu0  ;;  %v9276_v0 = vld [vmem:[#allocation3 + $0x20] sm:$0xff]  ;;  %v9278_v55 = vld [vmem:[#allocation3 + $0x28] sm:$0x3]  ;;  %v3781_v39 = vadd.f32 %v9269_v26, %v3603_v53  ;;  %v3780_v60 = vadd.f32 %v3749_v19, %v3602_v42  ;;  %v6250_v53 = vld [vmem:[%s10300_s3 + $0x158] sm:$0xff] }
 0x1fe   :  { %4054 = vst [vmem:[#allocation3 + $0x61] sm:$0xff] %v3988_v29  ;;  %v3987_v38 = vmax.f32 %v3971_v20, 0.0  ;;  %v3974_v35 = vadd.f32 %v9220_v7, %v3951_v6  ;;  %v3950_v56 = vadd.f32 %v3895_v41, %v3774_v31  ;;  %v4159_v17 = vrot.slane %v9276_v0, 1  ;;  %v10415_v29 = vld [vmem:[#allocation5_spill] sm:$0xff]  ;;  %v6267_v26 = vld [vmem:[%s10300_s3 + $0x1e0] sm:$0xff] }
 0x1ff   :  { %v7017_v36 = vpop.f32.mrf.mxu0  ;;  %v9284_v30 = vld [vmem:[#allocation3 + $0x10] sm:$0xff]  ;;  %v9289_v13 = vld [vmem:[#allocation3 + $0x18] sm:$0x3]  ;;  %v4160_v61 = vrot.slane %v9278_v55, 1  ;;  %v3605_v31 = vadd.f32 %v9194_v63, %v3433_v28  ;;  %v6252_v6 = vld [vmem:[%s10300_s3 + $0x168] sm:$0xff] }
 0x200   :  { %4053 = vst [vmem:[#allocation3 + $0x51] sm:$0xff] %v3987_v38  ;;  %v3990_v47 = vmax.f32 %v3974_v35, 0.0  ;;  %v3973_v49 = vadd.f32 %v9220_v7, %v3950_v56  ;;  %v3953_v48 = vadd.f32 %v7017_v36, %v3777_v10  ;;  %v4156_v23 = vrot.slane %v9284_v30, 1  ;;  %7116 = vmatmul.mubr.f32.vlgmr.msra.gmra.mxu0 %v9284_v30  ;;  %v3759_v56 = vpop.f32.mrf.mxu1  ;;  %v6251_v19 = vld [vmem:[%s10300_s3 + $0x160] sm:$0xff] }
 0x201   :  { %v3905_v62 = vpop.f32.mrf.mxu0  ;;  %7118 = vmatprep.mubr.f32.mxu0 %v9276_v0  ;;  %7196 = vmatpush3.msra.mxu0 %v10414_v12  ;;  %v4157_v37 = vrot.slane %v9289_v13, 1  ;;  %v9310_v25 = vld [vmem:[#allocation3 + $0x40] sm:$0xff]  ;;  %v9318_v11 = vsel %vm2249_vm4, %v4159_v17, %v4160_v61  ;;  %v9324_v9 = vld [vmem:[#allocation3 + $0x48] sm:$0x3]  ;;  %v3604_v10 = vadd.f32 %v9208_v24, %v3432_v18  ;;  %v3783_v61 = vadd.f32 %v7000_v4, %v3605_v31 }
 0x202   :  { %4056 = vst [vmem:[#allocation3 + $0x81] sm:$0xff] %v3990_v47  ;;  %v3989_v44 = vmax.f32 %v3973_v49, 0.0  ;;  %v3976_v32 = vadd.f32 %v9220_v7, %v3953_v48  ;;  %v3952_v50 = vadd.f32 %v3905_v62, %v3776_v59  ;;  %7197 = vmatprep.subr.mxu0 %v6269_v27  ;;  %v4165_v3 = vrot.slane %v9310_v25, 1  ;;  %v6266_v47 = vld [vmem:[%s10300_s3 + $0x1d8] sm:$0xff] }
 0x203   :  { %v7020_v43 = vpop.f32.mrf.mxu0  ;;  %v9315_v34 = vsel %vm2249_vm4, %v4156_v23, %v4157_v37  ;;  %7198 = vmatpush3.msra.mxu0 %v6269_v27  ;;  %v9320_v15 = vld [vmem:[#allocation3 + $0x30] sm:$0xff]  ;;  %v9322_v58 = vld [vmem:[#allocation3 + $0x38] sm:$0x3]  ;;  %v4166_v22 = vrot.slane %v9324_v9, 1  ;;  %v3782_v18 = vadd.f32 %v3759_v56, %v3604_v10  ;;  %v6247_v10 = vld [vmem:[%s10300_s3 + $0x140] sm:$0xff] }
 0x204   :  { %4055 = vst [vmem:[#allocation3 + $0x71] sm:$0xff] %v3989_v44  ;;  %v3992_v21 = vmax.f32 %v3976_v32, 0.0  ;;  %v3975_v54 = vadd.f32 %v9220_v7, %v3952_v50  ;;  %v3955_v8 = vadd.f32 %v7020_v43, %v3779_v33  ;;  %7060 = vmatmul.mubr.f32.vlgmr.msra.gmra.mxu1 %v9315_v34  ;;  %7119 = vmatmul.mubr.f32.gmra.mxu0 %v9320_v15  ;;  %v4162_v14 = vrot.slane %v9320_v15, 1 }
 0x205   :  { %7140 = vmatpush3.msra.mxu1 %v10415_v29  ;;  %7062 = vmatprep.mubr.f32.mxu1 %v9318_v11  ;;  %v3915_v20 = vpop.f32.mrf.mxu0  ;;  %v4163_v45 = vrot.slane %v9322_v58, 1  ;;  %v9354_v24 = vld [vmem:[#allocation3 + $0x60] sm:$0xff]  ;;  %v9357_v17 = vld [vmem:[#allocation3 + $0x68] sm:$0x3]  ;;  %v9369_v28 = vsel %vm2249_vm4, %v4165_v3, %v4166_v22 }
 0x206   :  { %4058 = vst [vmem:[#allocation3 + $0xc1] sm:$0xff] %v3992_v21  ;;  %v3991_v46 = vmax.f32 %v3975_v54, 0.0  ;;  %v3978_v5 = vadd.f32 %v9220_v7, %v3955_v8  ;;  %7141 = vmatprep.subr.mxu1 %v6253_v16  ;;  %7199 = vmatprep.subr.mxu0 %v6268_v2  ;;  %v3954_v63 = vadd.f32 %v3915_v20, %v3778_v1  ;;  %v4171_v12 = vrot.slane %v9354_v24, 1  ;;  %v9409_v3 = vld [vmem:[#allocation3 + $0xa8] sm:$0x3] }
 0x207   :  { %7121 = vmatprep.mubr.f32.mxu0 %v9310_v25  ;;  %7142 = vmatpush3.msra.mxu1 %v6253_v16  ;;  %v7023_v41 = vpop.f32.mrf.mxu0  ;;  %v9347_v57 = vsel %vm2249_vm4, %v4162_v14, %v4163_v45  ;;  %v9349_v38 = vld [vmem:[#allocation3 + $0x50] sm:$0xff]  ;;  %v9351_v35 = vld [vmem:[#allocation3 + $0x58] sm:$0x3]  ;;  %v4172_v37 = vrot.slane %v9357_v17, 1  ;;  %v9407_v45 = vld [vmem:[#allocation3 + $0xa0] sm:$0xff] }
 0x208   :  { %4057 = vst [vmem:[#allocation3 + $0xb1] sm:$0xff] %v3991_v46  ;;  %v3994_v59 = vmax.f32 %v3978_v5, 0.0  ;;  %v3977_v52 = vadd.f32 %v9220_v7, %v3954_v63  ;;  %7200 = vmatpush3.msra.mxu0 %v6268_v2  ;;  %7143 = vmatprep.subr.mxu1 %v6252_v6  ;;  %v3957_v36 = vadd.f32 %v7023_v41, %v3781_v39  ;;  %v4168_v27 = vrot.slane %v9349_v38, 1  ;;  %v6265_v16 = vld [vmem:[%s10300_s3 + $0x1d0] sm:$0xff]  ;;  %v6264_v39 = vld [vmem:[%s10300_s3 + $0x1c8] sm:$0xff] }
 0x209   :  { %7201 = vmatprep.subr.mxu0 %v6267_v26  ;;  %7063 = vmatmul.mubr.f32.gmra.mxu1 %v9347_v57  ;;  %v3925_v49 = vpop.f32.mrf.mxu0  ;;  %v4169_v48 = vrot.slane %v9351_v35, 1  ;;  %v6249_v14 = vld [vmem:[%s10300_s3 + $0x150] sm:$0xff]  ;;  %v9401_v29 = vsel %vm2249_vm4, %v4171_v12, %v4172_v37  ;;  %v6248_v46 = vld [vmem:[%s10300_s3 + $0x148] sm:$0xff]  ;;  %v4177_v22 = vrot.slane %v9407_v45, 1 }
 0x20a   :  { %4060 = vst [vmem:[#allocation3 + $0xe1] sm:$0xff] %v3994_v59  ;;  %v3993_v23 = vmax.f32 %v3977_v52, 0.0  ;;  %v3980_v51 = vadd.f32 %v9220_v7, %v3957_v36  ;;  %7144 = vmatpush3.msra.mxu1 %v6252_v6  ;;  %7202 = vmatpush3.msra.mxu0 %v6267_v26  ;;  %v3956_v40 = vadd.f32 %v3925_v49, %v3780_v60  ;;  %v6263_v6 = vld [vmem:[%s10300_s3 + $0x1c0] sm:$0xff]  ;;  %v4178_v60 = vrot.slane %v9409_v3, 1  ;;  %v6262_v59 = vld [vmem:[%s10300_s3 + $0x1b8] sm:$0xff]  ;;  %v6261_v49 = vld [vmem:[%s10300_s3 + $0x1b0] sm:$0xff] }
 0x20b   :  { %7065 = vmatprep.mubr.f32.mxu1 %v9369_v28  ;;  %7122 = vmatmul.mubr.f32.gmra.mxu0 %v9349_v38  ;;  %v7026_v62 = vpop.f32.mrf.mxu0  ;;  %v9378_v33 = vld [vmem:[#allocation3 + $0x70] sm:$0xff]  ;;  %v9380_v44 = vld [vmem:[#allocation3 + $0x78] sm:$0x3]  ;;  %v9387_v1 = vsel %vm2249_vm4, %v4168_v27, %v4169_v48 }
 0x20c   :  { %4059 = vst [vmem:[#allocation3 + $0xd1] sm:$0xff] %v3993_v23  ;;  %v3996_v32 = vmax.f32 %v3980_v51, 0.0  ;;  %7145 = vmatprep.subr.mxu1 %v6251_v19  ;;  %7203 = vmatprep.subr.mxu0 %v6266_v47  ;;  %v3979_v50 = vadd.f32 %v9220_v7, %v3956_v40  ;;  %v3959_v2 = vadd.f32 %v7026_v62, %v3783_v61  ;;  %v4174_v43 = vrot.slane %v9378_v33, 1  ;;  %v6246_v61 = vld [vmem:[%s10300_s3 + $0x138] sm:$0xff]  ;;  %v6260_v40 = vld [vmem:[%s10300_s3 + $0x1a8] sm:$0xff]  ;;  %v6245_v62 = vld [vmem:[%s10300_s3 + $0x130] sm:$0xff] }
 0x20d   :  { %7124 = vmatprep.mubr.f32.mxu0 %v9354_v24  ;;  %7146 = vmatpush3.msra.mxu1 %v6251_v19  ;;  %v3935_v42 = vpop.f32.mrf.mxu0  ;;  %v4175_v8 = vrot.slane %v9380_v44, 1  ;;  %v9435_v52 = vld [vmem:[#allocation3 + $0xc0] sm:$0xff]  ;;  %v9437_v36 = vld [vmem:[#allocation3 + $0xc8] sm:$0x3]  ;;  %v4179_v27 = vsel %vm2249_vm4, %v4177_v22, %v4178_v60  ;;  %v6257_v60 = vld [vmem:[%s10300_s3 + $0x190] sm:$0xff] }
 0x20e   :  { %4062 = vst [vmem:[#allocation3 + $0x101] sm:$0xff] %v3996_v32  ;;  %v3995_v4 = vmax.f32 %v3979_v50, 0.0  ;;  %7204 = vmatpush3.msra.mxu0 %v6266_v47  ;;  %7147 = vmatprep.subr.mxu1 %v6250_v53  ;;  %v3982_v21 = vadd.f32 %v9220_v7, %v3959_v2  ;;  %v3958_v54 = vadd.f32 %v3935_v42, %v3782_v18  ;;  %v4183_v23 = vrot.slane %v9435_v52, 1  ;;  %v6244_v50 = vld [vmem:[%s10300_s3 + $0x128] sm:$0xff]  ;;  %v6259_v42 = vld [vmem:[%s10300_s3 + $0x1a0] sm:$0xff] }
 0x20f   :  { %7205 = vmatprep.subr.mxu0 %v6265_v16  ;;  %7066 = vmatmul.mubr.f32.gmra.mxu1 %v9387_v1  ;;  %v9416_v5 = vld [vmem:[#allocation3 + $0xb0] sm:$0xff]  ;;  %v9418_v63 = vld [vmem:[#allocation3 + $0xb8] sm:$0x3]  ;;  %v9421_v26 = vsel %vm2249_vm4, %v4174_v43, %v4175_v8  ;;  %v4184_v51 = vrot.slane %v9437_v36, 1 }
 0x210   :  { %4061 = vst [vmem:[#allocation3 + $0xf1] sm:$0xff] %v3995_v4  ;;  %v3998_v31 = vmax.f32 %v3982_v21, 0.0  ;;  %7148 = vmatpush3.msra.mxu1 %v6250_v53  ;;  %7206 = vmatpush3.msra.mxu0 %v6265_v16  ;;  %v3981_v20 = vadd.f32 %v9220_v7, %v3958_v54  ;;  %v4180_v41 = vrot.slane %v9416_v5, 1  ;;  %v4181_v56 = vrot.slane %v9418_v63, 1  ;;  %v6258_v54 = vld [vmem:[%s10300_s3 + $0x198] sm:$0xff] }
 0x211   :  { %7068 = vmatprep.mubr.f32.mxu1 %v9401_v29  ;;  %7125 = vmatmul.mubr.f32.gmra.mxu0 %v9378_v33  ;;  %v9466_v12 = vld [vmem:[#allocation3 + $0xe0] sm:$0xff]  ;;  %v9468_v37 = vld [vmem:[#allocation3 + $0xe8] sm:$0x3]  ;;  %v9471_v32 = vsel %vm2249_vm4, %v4183_v23, %v4184_v51 }
 0x212   :  { %4064 = vst [vmem:[#allocation3 + $0x121] sm:$0xff] %v3998_v31  ;;  %7149 = vmatprep.subr.mxu1 %v6249_v14  ;;  %7207 = vmatprep.subr.mxu0 %v6264_v39  ;;  %v3997_v7 = vmax.f32 %v3981_v20, 0.0  ;;  %v9453_v48 = vsel %vm2249_vm4, %v4180_v41, %v4181_v56  ;;  %v4189_v4 = vrot.slane %v9466_v12, 1  ;;  %v4190_v21 = vrot.slane %v9468_v37, 1  ;;  %v6240_v51 = vld [vmem:[%s10300_s3 + $0x108] sm:$0xff] }
 0x213   :  { %7150 = vmatpush3.msra.mxu1 %v6249_v14  ;;  %7208 = vmatpush3.msra.mxu0 %v6264_v39  ;;  %v9444_v19 = vld [vmem:[#allocation3 + $0xd0] sm:$0xff]  ;;  %v9446_v47 = vld [vmem:[#allocation3 + $0xd8] sm:$0x3]  ;;  %v6243_v39 = vld [vmem:[%s10300_s3 + $0x120] sm:$0xff] }
 0x214   :  { %4063 = vst [vmem:[#allocation3 + $0x111] sm:$0xff] %v3997_v7  ;;  %7151 = vmatprep.subr.mxu1 %v6248_v46  ;;  %7209 = vmatprep.subr.mxu0 %v6263_v6  ;;  %v4186_v18 = vrot.slane %v9444_v19, 1  ;;  %v4187_v53 = vrot.slane %v9446_v47, 1 }
 0x215   :  { %7069 = vmatmul.mubr.f32.gmra.mxu1 %v9421_v26  ;;  %7127 = vmatprep.mubr.f32.mxu0 %v9407_v45  ;;  %v9500_v31 = vld [vmem:[#allocation3 + $0x100] sm:$0xff]  ;;  %v9502_v20 = vld [vmem:[#allocation3 + $0x108] sm:$0x3] }
 0x216   :  { %7152 = vmatpush3.msra.mxu1 %v6248_v46  ;;  %7210 = vmatpush3.msra.mxu0 %v6263_v6  ;;  %v9486_v43 = vsel %vm2249_vm4, %v4186_v18, %v4187_v53  ;;  %v9505_v6 = vsel %vm2249_vm4, %v4189_v4, %v4190_v21  ;;  %v6242_v46 = vld [vmem:[%s10300_s3 + $0x118] sm:$0xff]  ;;  %v4195_v41 = vrot.slane %v9500_v31, 1  ;;  %v4196_v56 = vrot.slane %v9502_v20, 1  ;;  %v6239_v53 = vld [vmem:[%s10300_s3 + $0x100] sm:$0xff]  ;;  %v6301_v21 = vld [vmem:[%s10300_s3 + $0x2f0] sm:$0xff] }
 0x217   :  { %7128 = vmatmul.mubr.f32.gmra.mxu0 %v9416_v5  ;;  %7153 = vmatprep.subr.mxu1 %v6247_v10  ;;  %v9478_v16 = vld [vmem:[#allocation3 + $0xf0] sm:$0xff]  ;;  %v9480_v2 = vld [vmem:[#allocation3 + $0xf8] sm:$0x3] }
 0x218   :  { %7211 = vmatprep.subr.mxu0 %v6262_v59  ;;  %7130 = vmatprep.mubr.f32.mxu0 %v9435_v52  ;;  %v4192_v8 = vrot.slane %v9478_v16, 1  ;;  %v4193_v14 = vrot.slane %v9480_v2, 1  ;;  %v9535_v23 = vsel %vm2249_vm4, %v4195_v41, %v4196_v56  ;;  %v6286_v4 = vld [vmem:[%s10300_s3 + $0x278] sm:$0xff]  ;;  %v6299_v41 = vld [vmem:[%s10300_s3 + $0x2e0] sm:$0xff]  ;;  %v4536_v56 = vrot.slane %v9310_v25, 2 }
 0x219   :  { %7154 = vmatpush3.msra.mxu1 %v6247_v10  ;;  %7212 = vmatpush3.msra.mxu0 %v6262_v59 }
 0x21a   :  { %7071 = vmatprep.mubr.f32.mxu1 %v4179_v27  ;;  %7155 = vmatprep.subr.mxu1 %v6246_v61  ;;  %v9520_v10 = vsel %vm2249_vm4, %v4192_v8, %v4193_v14  ;;  %v6285_v14 = vld [vmem:[%s10300_s3 + $0x270] sm:$0xff] }
 0x21b   :  { %7213 = vmatprep.subr.mxu0 %v6261_v49  ;;  %7072 = vmatmul.mubr.f32.gmra.mxu1 %v9453_v48  ;;  %v9512_v7 = vld [vmem:[#allocation3 + $0x110] sm:$0xff]  ;;  %v9514_v22 = vld [vmem:[#allocation3 + $0x118] sm:$0x3] }
 0x21c   :  { %7156 = vmatpush3.msra.mxu1 %v6246_v61  ;;  %7214 = vmatpush3.msra.mxu0 %v6261_v49  ;;  %v4198_v59 = vrot.slane %v9512_v7, 1  ;;  %v4199_v27 = vrot.slane %v9514_v22, 1  ;;  %v6241_v61 = vld [vmem:[%s10300_s3 + $0x110] sm:$0xff]  ;;  %v6256_v49 = vld [vmem:[%s10300_s3 + $0x188] sm:$0xff] }
 0x21d   :  { %7074 = vmatprep.mubr.f32.mxu1 %v9471_v32  ;;  %7131 = vmatmul.mubr.f32.gmra.mxu0 %v9444_v19 }
 0x21e   :  { %7157 = vmatprep.subr.mxu1 %v6245_v62  ;;  %7215 = vmatprep.subr.mxu0 %v6260_v40  ;;  %v9546_v18 = vsel %vm2249_vm4, %v4198_v59, %v4199_v27  ;;  %v6283_v59 = vld [vmem:[%s10300_s3 + $0x260] sm:$0xff]  ;;  %v4539_v27 = vrot.slane %v9349_v38, 2 }
 0x21f   :  { %7133 = vmatprep.mubr.f32.mxu0 %v9466_v12  ;;  %7158 = vmatpush3.msra.mxu1 %v6245_v62  ;;  %v6302_v62 = vld [vmem:[%s10300_s3 + $0x2f8] sm:$0xff] }
 0x220   :  { %7216 = vmatpush3.msra.mxu0 %v6260_v40  ;;  %7159 = vmatprep.subr.mxu1 %v6244_v50  ;;  %v6255_v40 = vld [vmem:[%s10300_s3 + $0x180] sm:$0xff] }
 0x221   :  { %7217 = vmatprep.subr.mxu0 %v6259_v42  ;;  %7075 = vmatmul.mubr.f32.gmra.mxu1 %v9486_v43 }
 0x222   :  { %7160 = vmatpush3.msra.mxu1 %v6244_v50  ;;  %7218 = vmatpush3.msra.mxu0 %v6259_v42  ;;  %v4527_v50 = vrot.slane %v9284_v30, 2  ;;  %v4528_v42 = vrot.slane %v9289_v13, 2  ;;  %v10416_v13 = vld [vmem:[#allocation14_spill] sm:$0xff] }
 0x223   :  { %7077 = vmatprep.mubr.f32.mxu1 %v9505_v6  ;;  %7134 = vmatmul.mubr.f32.gmra.mxu0 %v9478_v16 }
 0x224   :  { %7161 = vmatprep.subr.mxu1 %v6243_v39  ;;  %7219 = vmatprep.subr.mxu0 %v6258_v54  ;;  %v9570_v8 = vsel %vm2661_vm12, %v4527_v50, %v4528_v42  ;;  %v4545_v50 = vrot.slane %v9378_v33, 2  ;;  %v4546_v42 = vrot.slane %v9380_v44, 2  ;;  %v4549_v44 = vrot.slane %v9409_v3, 2 }
 0x225   :  { %7136 = vmatprep.mubr.f32.mxu0 %v9500_v31  ;;  %7162 = vmatpush3.msra.mxu1 %v6243_v39  ;;  %v4533_v39 = vrot.slane %v9320_v15, 2  ;;  %v4551_v3 = vrot.slane %v9416_v5, 2 }
 0x226   :  { %7220 = vmatpush3.msra.mxu0 %v6258_v54  ;;  %7163 = vmatprep.subr.mxu1 %v6242_v46  ;;  %v4530_v54 = vrot.slane %v9276_v0, 2 }
 0x227   :  { %7221 = vmatprep.subr.mxu0 %v6257_v60  ;;  %7078 = vmatmul.mubr.f32.gmra.mxu1 %v9520_v10 }
 0x228   :  { %7164 = vmatpush3.msra.mxu1 %v6242_v46  ;;  %7222 = vmatpush3.msra.mxu0 %v6257_v60  ;;  %v4534_v46 = vrot.slane %v9322_v58, 2  ;;  %v6284_v60 = vld [vmem:[%s10300_s3 + $0x268] sm:$0xff] }
 0x229   :  { %7080 = vmatprep.mubr.f32.mxu1 %v9535_v23  ;;  %7137 = vmatmul.mubr.f32.gmra.mxu0 %v9512_v7 }
 0x22a   :  { %7165 = vmatprep.subr.mxu1 %v6241_v61  ;;  %7223 = vmatprep.subr.mxu0 %v6256_v49  ;;  %v9596_v58 = vsel %vm2661_vm12, %v4533_v39, %v4534_v46  ;;  %v6278_v39 = vld [vmem:[%s10300_s3 + $0x238] sm:$0xff]  ;;  %v6293_v46 = vld [vmem:[%s10300_s3 + $0x2b0] sm:$0xff] }
 0x22b   :  { %7166 = vmatpush3.msra.mxu1 %v6241_v61  ;;  %7224 = vmatpush3.msra.mxu0 %v6256_v49  ;;  %v4540_v61 = vrot.slane %v9351_v35, 2  ;;  %v6282_v49 = vld [vmem:[%s10300_s3 + $0x258] sm:$0xff] }
 0x22c   :  { %7227 = vmatprep.mubr.f32.mxu0 %v9284_v30  ;;  %7167 = vmatprep.subr.mxu1 %v6240_v51  ;;  %v4531_v30 = vrot.slane %v9278_v55, 2 }
 0x22d   :  { %7225 = vmatprep.subr.mxu0 %v6255_v40  ;;  %7081 = vmatmul.mubr.f32.gmra.mxu1 %v9546_v18  ;;  %v9622_v35 = vsel %vm2661_vm12, %v4539_v27, %v4540_v61  ;;  %v6291_v27 = vld [vmem:[%s10300_s3 + $0x2a0] sm:$0xff]  ;;  %v4560_v61 = vrot.slane %v9466_v12, 2 }
 0x22e   :  { %7168 = vmatpush3.msra.mxu1 %v6240_v51  ;;  %7226 = vmatpush3.msra.mxu0 %v6255_v40  ;;  %v9580_v55 = vsel %vm2661_vm12, %v4530_v54, %v4531_v30  ;;  %v6297_v51 = vld [vmem:[%s10300_s3 + $0x2d0] sm:$0xff]  ;;  %v4542_v40 = vrot.slane %v9354_v24, 2  ;;  %v4548_v54 = vrot.slane %v9407_v45, 2  ;;  %v9650_v30 = vsel %vm2661_vm12, %v4545_v50, %v4546_v42  ;;  %v6294_v45 = vld [vmem:[%s10300_s3 + $0x2b8] sm:$0xff] }
 0x22f   :  { %7169 = vmatprep.subr.mxu1 %v6239_v53  ;;  %7228 = vmatmul.mubr.f32.vlgmr.msra.gmra.mxu0 %v9276_v0  ;;  %v6300_v0 = vld [vmem:[%s10300_s3 + $0x2e8] sm:$0xff]  ;;  %v6289_v50 = vld [vmem:[%s10300_s3 + $0x290] sm:$0xff]  ;;  %v4566_v42 = vrot.slane %v9500_v31, 2 }
 0x230   :  { %7307 = vmatprep.subr.mxu0 %v6302_v62  ;;  %7170 = vmatpush3.msra.mxu1 %v6239_v53  ;;  %v6281_v53 = vld [vmem:[%s10300_s3 + $0x250] sm:$0xff] }
 0x231   :  { %7230 = vmatprep.mubr.f32.mxu0 %v9320_v15  ;;  %7308 = vmatpush3.msra.mxu0 %v6302_v62  ;;  %v4537_v15 = vrot.slane %v9324_v9, 2  ;;  %v9634_v62 = vld [vmem:[#allocation3 + $0x80] sm:$0xff] }
 0x232   :  { %7171 = vmatprep.mubr.f32.mxu1 %v10416_v13  ;;  %7251 = vmatprep.subr.mxu1 %v6286_v4  ;;  %v6279_v13 = vld [vmem:[%s10300_s3 + $0x240] sm:$0xff] }
 0x233   :  { %7309 = vmatprep.subr.mxu0 %v6301_v21  ;;  %7172 = vmatmul.mubr.f32.vlgmr.msra.gmra.mxu1 %v9570_v8  ;;  %v9606_v9 = vsel %vm2661_vm12, %v4536_v56, %v4537_v15  ;;  %v6292_v56 = vld [vmem:[%s10300_s3 + $0x2a8] sm:$0xff]  ;;  %v4557_v15 = vrot.slane %v9444_v19, 2 }
 0x234   :  { %7252 = vmatpush3.msra.mxu1 %v6286_v4  ;;  %7310 = vmatpush3.msra.mxu0 %v6301_v21  ;;  %v6280_v4 = vld [vmem:[%s10300_s3 + $0x248] sm:$0xff]  ;;  %v6295_v21 = vld [vmem:[%s10300_s3 + $0x2c0] sm:$0xff] }
 0x235   :  { %7174 = vmatprep.mubr.f32.mxu1 %v9580_v55  ;;  %7231 = vmatmul.mubr.f32.gmra.mxu0 %v9310_v25  ;;  %v6298_v25 = vld [vmem:[%s10300_s3 + $0x2d8] sm:$0xff] }
 0x236   :  { %7253 = vmatprep.subr.mxu1 %v6285_v14  ;;  %7311 = vmatprep.subr.mxu0 %v6300_v0 }
 0x237   :  { %7233 = vmatprep.mubr.f32.mxu0 %v9349_v38  ;;  %7254 = vmatpush3.msra.mxu1 %v6285_v14  ;;  %v4543_v38 = vrot.slane %v9357_v17, 2  ;;  %v4552_v14 = vrot.slane %v9418_v63, 2  ;;  %v4555_v63 = vrot.slane %v9437_v36, 2 }
 0x238   :  { %7312 = vmatpush3.msra.mxu0 %v6300_v0  ;;  %7255 = vmatprep.subr.mxu1 %v6284_v60  ;;  %v4550_v0 = vsel %vm2661_vm12, %v4548_v54, %v4549_v44  ;;  %v6288_v54 = vld [vmem:[%s10300_s3 + $0x288] sm:$0xff]  ;;  %v9737_v44 = vld [vmem:[#allocation3 + $0x120] sm:$0xff] }
 0x239   :  { %7313 = vmatprep.subr.mxu0 %v6299_v41  ;;  %7175 = vmatmul.mubr.f32.gmra.mxu1 %v9596_v58  ;;  %v9632_v17 = vsel %vm2661_vm12, %v4542_v40, %v4543_v38  ;;  %v6290_v40 = vld [vmem:[%s10300_s3 + $0x298] sm:$0xff]  ;;  %v4563_v38 = vrot.slane %v9478_v16, 2 }
 0x23a   :  { %7256 = vmatpush3.msra.mxu1 %v6284_v60  ;;  %7314 = vmatpush3.msra.mxu0 %v6299_v41  ;;  %v9673_v60 = vsel %vm2661_vm12, %v4551_v3, %v4552_v14  ;;  %v6277_v41 = vld [vmem:[%s10300_s3 + $0x230] sm:$0xff]  ;;  %v6272_v3 = vld [vmem:[%s10300_s3 + $0x208] sm:$0xff]  ;;  %v6287_v14 = vld [vmem:[%s10300_s3 + $0x280] sm:$0xff] }
 0x23b   :  { %7177 = vmatprep.mubr.f32.mxu1 %v9606_v9  ;;  %7234 = vmatmul.mubr.f32.gmra.mxu0 %v9354_v24  ;;  %v6296_v24 = vld [vmem:[%s10300_s3 + $0x2c8] sm:$0xff] }
 0x23c   :  { %7257 = vmatprep.subr.mxu1 %v6283_v59  ;;  %7315 = vmatprep.subr.mxu0 %v6298_v25 }
 0x23d   :  { %7236 = vmatprep.mubr.f32.mxu0 %v9378_v33  ;;  %7258 = vmatpush3.msra.mxu1 %v6283_v59  ;;  %v4558_v59 = vrot.slane %v9446_v47, 2 }
 0x23e   :  { %7316 = vmatpush3.msra.mxu0 %v6298_v25  ;;  %7259 = vmatprep.subr.mxu1 %v6282_v49  ;;  %v6276_v25 = vld [vmem:[%s10300_s3 + $0x228] sm:$0xff] }
 0x23f   :  { %7317 = vmatprep.subr.mxu0 %v6297_v51  ;;  %7178 = vmatmul.mubr.f32.gmra.mxu1 %v9622_v35  ;;  %v9699_v47 = vsel %vm2661_vm12, %v4557_v15, %v4558_v59  ;;  %v6330_v15 = vld [vmem:[%s10300_s3 + $0x3d8] sm:$0xff]  ;;  %v4082_v59 = vld [vmem:[#allocation3 + $0x88] sm:$0x3] }
 0x240   :  { %7260 = vmatpush3.msra.mxu1 %v6282_v49  ;;  %7318 = vmatpush3.msra.mxu0 %v6297_v51  ;;  %v4561_v49 = vrot.slane %v9468_v37, 2  ;;  %v6275_v51 = vld [vmem:[%s10300_s3 + $0x220] sm:$0xff] }
 0x241   :  { %7180 = vmatprep.mubr.f32.mxu1 %v9632_v17  ;;  %7237 = vmatmul.mubr.f32.gmra.mxu0 %v9634_v62 }
 0x242   :  { %7261 = vmatprep.subr.mxu1 %v6281_v53  ;;  %7319 = vmatprep.subr.mxu0 %v6296_v24  ;;  %v9709_v37 = vsel %vm2661_vm12, %v4560_v61, %v4561_v49  ;;  %v6329_v61 = vld [vmem:[%s10300_s3 + $0x3d0] sm:$0xff]  ;;  %v5135_v49 = vrot.slane %v4082_v59, 2 }
 0x243   :  { %7239 = vmatprep.mubr.f32.mxu0 %v9416_v5  ;;  %7262 = vmatpush3.msra.mxu1 %v6281_v53  ;;  %v4554_v5 = vrot.slane %v9435_v52, 2  ;;  %v4564_v53 = vrot.slane %v9480_v2, 2 }
 0x244   :  { %7320 = vmatpush3.msra.mxu0 %v6296_v24  ;;  %7263 = vmatprep.subr.mxu1 %v6280_v4  ;;  %v6274_v24 = vld [vmem:[%s10300_s3 + $0x218] sm:$0xff] }
 0x245   :  { %7321 = vmatprep.subr.mxu0 %v6295_v21  ;;  %7181 = vmatmul.mubr.f32.gmra.mxu1 %v9650_v30  ;;  %v9683_v36 = vsel %vm2661_vm12, %v4554_v5, %v4555_v63  ;;  %v9725_v2 = vsel %vm2661_vm12, %v4563_v38, %v4564_v53  ;;  %v6332_v5 = vld [vmem:[%s10300_s3 + $0x3e8] sm:$0xff]  ;;  %v4948_v53 = vrot.slane %v9634_v62, 1 }
 0x246   :  { %7264 = vmatpush3.msra.mxu1 %v6280_v4  ;;  %7322 = vmatpush3.msra.mxu0 %v6295_v21  ;;  %v4567_v4 = vrot.slane %v9502_v20, 2  ;;  %v6273_v21 = vld [vmem:[%s10300_s3 + $0x210] sm:$0xff]  ;;  %v6316_v63 = vld [vmem:[%s10300_s3 + $0x368] sm:$0xff] }
 0x247   :  { %7240 = vmatmul.mubr.f32.gmra.mxu0 %v9435_v52  ;;  %7265 = vmatprep.subr.mxu1 %v6279_v13 }
 0x248   :  { %7323 = vmatprep.subr.mxu0 %v6294_v45  ;;  %7242 = vmatprep.mubr.f32.mxu0 %v9444_v19  ;;  %v9735_v20 = vsel %vm2661_vm12, %v4566_v42, %v4567_v4  ;;  %v6327_v42 = vld [vmem:[%s10300_s3 + $0x3c0] sm:$0xff] }
 0x249   :  { %7266 = vmatpush3.msra.mxu1 %v6279_v13  ;;  %7324 = vmatpush3.msra.mxu0 %v6294_v45  ;;  %v4569_v13 = vrot.slane %v9512_v7, 2  ;;  %v4570_v45 = vrot.slane %v9514_v22, 2 }
 0x24a   :  { %7183 = vmatprep.mubr.f32.mxu1 %v4550_v0  ;;  %7267 = vmatprep.subr.mxu1 %v6278_v39  ;;  %v6271_v0 = vld [vmem:[%s10300_s3 + $0x200] sm:$0xff] }
 0x24b   :  { %7325 = vmatprep.subr.mxu0 %v6293_v46  ;;  %7184 = vmatmul.mubr.f32.gmra.mxu1 %v9673_v60  ;;  %v9751_v22 = vsel %vm2661_vm12, %v4569_v13, %v4570_v45  ;;  %v6325_v13 = vld [vmem:[%s10300_s3 + $0x3b0] sm:$0xff]  ;;  %v6324_v45 = vld [vmem:[%s10300_s3 + $0x3a8] sm:$0xff] }
 0x24c   :  { %7268 = vmatpush3.msra.mxu1 %v6278_v39  ;;  %7326 = vmatpush3.msra.mxu0 %v6293_v46  ;;  %v6334_v39 = vld [vmem:[%s10300_s3 + $0x3f8] sm:$0xff]  ;;  %v6333_v46 = vld [vmem:[%s10300_s3 + $0x3f0] sm:$0xff] }
 0x24d   :  { %7186 = vmatprep.mubr.f32.mxu1 %v9683_v36  ;;  %7243 = vmatmul.mubr.f32.gmra.mxu0 %v9466_v12 }
 0x24e   :  { %7269 = vmatprep.subr.mxu1 %v6277_v41  ;;  %7327 = vmatprep.subr.mxu0 %v6292_v56 }
 0x24f   :  { %7245 = vmatprep.mubr.f32.mxu0 %v9478_v16  ;;  %7270 = vmatpush3.msra.mxu1 %v6277_v41  ;;  %v6331_v41 = vld [vmem:[%s10300_s3 + $0x3e0] sm:$0xff] }
 0x250   :  { %7328 = vmatpush3.msra.mxu0 %v6292_v56  ;;  %7271 = vmatprep.subr.mxu1 %v6276_v25  ;;  %v6315_v56 = vld [vmem:[%s10300_s3 + $0x360] sm:$0xff] }
 0x251   :  { %7329 = vmatprep.subr.mxu0 %v6291_v27  ;;  %7187 = vmatmul.mubr.f32.gmra.mxu1 %v9699_v47 }
 0x252   :  { %7272 = vmatpush3.msra.mxu1 %v6276_v25  ;;  %7330 = vmatpush3.msra.mxu0 %v6291_v27  ;;  %v6314_v25 = vld [vmem:[%s10300_s3 + $0x358] sm:$0xff]  ;;  %v5134_v27 = vrot.slane %v9634_v62, 2 }
 0x253   :  { %7189 = vmatprep.mubr.f32.mxu1 %v9709_v37  ;;  %7246 = vmatmul.mubr.f32.gmra.mxu0 %v9500_v31 }
 0x254   :  { %7273 = vmatprep.subr.mxu1 %v6275_v51  ;;  %7331 = vmatprep.subr.mxu0 %v6290_v40  ;;  %v9810_v38 = vsel %vm2661_vm12, %v5134_v27, %v5135_v49  ;;  %v6304_v27 = vld [vmem:[%s10300_s3 + $0x308] sm:$0xff] }
 0x255   :  { %7248 = vmatprep.mubr.f32.mxu0 %v9512_v7  ;;  %7274 = vmatpush3.msra.mxu1 %v6275_v51  ;;  %v6313_v51 = vld [vmem:[%s10300_s3 + $0x350] sm:$0xff] }
 0x256   :  { %7332 = vmatpush3.msra.mxu0 %v6290_v40  ;;  %7275 = vmatprep.subr.mxu1 %v6274_v24  ;;  %v6328_v40 = vld [vmem:[%s10300_s3 + $0x3c8] sm:$0xff] }
 0x257   :  { %7333 = vmatprep.subr.mxu0 %v6289_v50  ;;  %7190 = vmatmul.mubr.f32.gmra.mxu1 %v9725_v2 }
 0x258   :  { %7276 = vmatpush3.msra.mxu1 %v6274_v24  ;;  %7334 = vmatpush3.msra.mxu0 %v6289_v50  ;;  %v4949_v24 = vrot.slane %v4082_v59, 1  ;;  %v6312_v50 = vld [vmem:[%s10300_s3 + $0x348] sm:$0xff]  ;;  %v4951_v59 = vrot.slane %v9737_v44, 1 }
 0x259   :  { %7192 = vmatprep.mubr.f32.mxu1 %v9735_v20  ;;  %7249 = vmatmul.mubr.f32.gmra.mxu0 %v9737_v44 }
 0x25a   :  { %7277 = vmatprep.subr.mxu1 %v6273_v21  ;;  %7335 = vmatprep.subr.mxu0 %v6288_v54  ;;  %v9823_v4 = vsel %vm2249_vm4, %v4948_v53, %v4949_v24  ;;  %v7550_v53 = vld [vmem:[#allocation3 + $0x20] sm:$0xff]  ;;  %v7551_v24 = vld [vmem:[#allocation3 + $0x30] sm:$0xff] }
 0x25b   :  { %7278 = vmatpush3.msra.mxu1 %v6273_v21  ;;  %7336 = vmatpush3.msra.mxu0 %v6288_v54  ;;  %v6311_v21 = vld [vmem:[%s10300_s3 + $0x340] sm:$0xff]  ;;  %v6326_v54 = vld [vmem:[%s10300_s3 + $0x3b8] sm:$0xff] }
 0x25c   :  { %7339 = vmatprep.mubr.f32.mxu0 %v9570_v8  ;;  %7279 = vmatprep.subr.mxu1 %v6272_v3  ;;  %v6318_v8 = vld [vmem:[%s10300_s3 + $0x378] sm:$0xff] }
 0x25d   :  { %7337 = vmatprep.subr.mxu0 %v6287_v14  ;;  %7193 = vmatmul.mubr.f32.gmra.mxu1 %v9751_v22 }
 0x25e   :  { %7280 = vmatpush3.msra.mxu1 %v6272_v3  ;;  %7338 = vmatpush3.msra.mxu0 %v6287_v14  ;;  %v6308_v3 = vld [vmem:[%s10300_s3 + $0x328] sm:$0xff]  ;;  %v6323_v14 = vld [vmem:[%s10300_s3 + $0x3a0] sm:$0xff] }
 0x25f   :  { %7281 = vmatprep.subr.mxu1 %v6271_v0  ;;  %7283 = vmatprep.mubr.f32.mxu1 %v9315_v34  ;;  %v6317_v34 = vld [vmem:[%s10300_s3 + $0x370] sm:$0xff] }
 0x260   :  { %7340 = vmatmul.mubr.f32.vlgmr.msra.gmra.mxu0 %v9580_v55  ;;  %7419 = vmatprep.subr.mxu0 %v6334_v39 }
 0x261   :  { %7282 = vmatpush3.msra.mxu1 %v6271_v0  ;;  %7342 = vmatprep.mubr.f32.mxu0 %v9596_v58  ;;  %v6307_v0 = vld [vmem:[%s10300_s3 + $0x320] sm:$0xff] }
 0x262   :  { %7420 = vmatpush3.msra.mxu0 %v6334_v39  ;;  %7363 = vmatprep.subr.mxu1 %v6318_v8  ;;  %v6322_v39 = vld [vmem:[%s10300_s3 + $0x398] sm:$0xff] }
 0x263   :  { %7421 = vmatprep.subr.mxu0 %v6333_v46  ;;  %7284 = vmatmul.mubr.f32.vlgmr.msra.gmra.mxu1 %v9318_v11 }
 0x264   :  { %7364 = vmatpush3.msra.mxu1 %v6318_v8  ;;  %7422 = vmatpush3.msra.mxu0 %v6333_v46  ;;  %v4102_v8 = vld [vmem:[#allocation3 + $0x128] sm:$0x3]  ;;  %v6306_v46 = vld [vmem:[%s10300_s3 + $0x318] sm:$0xff] }
 0x265   :  { %7286 = vmatprep.mubr.f32.mxu1 %v9347_v57  ;;  %7343 = vmatmul.mubr.f32.gmra.mxu0 %v9606_v9 }
 0x266   :  { %7365 = vmatprep.subr.mxu1 %v6317_v34  ;;  %7423 = vmatprep.subr.mxu0 %v6332_v5 }
 0x267   :  { %7345 = vmatprep.mubr.f32.mxu0 %v9622_v35  ;;  %7366 = vmatpush3.msra.mxu1 %v6317_v34  ;;  %v5137_v34 = vrot.slane %v9737_v44, 2 }
 0x268   :  { %7424 = vmatpush3.msra.mxu0 %v6332_v5  ;;  %7367 = vmatprep.subr.mxu1 %v6316_v63  ;;  %v6321_v5 = vld [vmem:[%s10300_s3 + $0x390] sm:$0xff] }
 0x269   :  { %7425 = vmatprep.subr.mxu0 %v6331_v41  ;;  %7287 = vmatmul.mubr.f32.gmra.mxu1 %v9369_v28 }
 0x26a   :  { %7368 = vmatpush3.msra.mxu1 %v6316_v63  ;;  %7426 = vmatpush3.msra.mxu0 %v6331_v41  ;;  %v5138_v63 = vrot.slane %v4102_v8, 2  ;;  %v6305_v41 = vld [vmem:[%s10300_s3 + $0x310] sm:$0xff] }
 0x26b   :  { %7289 = vmatprep.mubr.f32.mxu1 %v9387_v1  ;;  %7346 = vmatmul.mubr.f32.gmra.mxu0 %v9632_v17 }
 0x26c   :  { %7369 = vmatprep.subr.mxu1 %v6315_v56  ;;  %7427 = vmatprep.subr.mxu0 %v6330_v15 }
 0x26d   :  { %7348 = vmatprep.mubr.f32.mxu0 %v9650_v30  ;;  %7370 = vmatpush3.msra.mxu1 %v6315_v56  ;;  %v6320_v56 = vld [vmem:[%s10300_s3 + $0x388] sm:$0xff] }
 0x26e   :  { %7428 = vmatpush3.msra.mxu0 %v6330_v15  ;;  %7371 = vmatprep.subr.mxu1 %v6314_v25  ;;  %v9882_v15 = vsel %vm2661_vm12, %v5137_v34, %v5138_v63 }
 0x26f   :  { %7429 = vmatprep.subr.mxu0 %v6329_v61  ;;  %7290 = vmatmul.mubr.f32.gmra.mxu1 %v9401_v29 }
 0x270   :  { %7372 = vmatpush3.msra.mxu1 %v6314_v25  ;;  %7430 = vmatpush3.msra.mxu0 %v6329_v61  ;;  %v4952_v25 = vrot.slane %v4102_v8, 1  ;;  %v6319_v61 = vld [vmem:[%s10300_s3 + $0x380] sm:$0xff] }
 0x271   :  { %7292 = vmatprep.mubr.f32.mxu1 %v9421_v26  ;;  %7349 = vmatmul.mubr.f32.gmra.mxu0 %v9810_v38 }
 0x272   :  { %7373 = vmatprep.subr.mxu1 %v6313_v51  ;;  %7431 = vmatprep.subr.mxu0 %v6328_v40  ;;  %v9895_v49 = vsel %vm2249_vm4, %v4951_v59, %v4952_v25 }
 0x273   :  { %7351 = vmatprep.mubr.f32.mxu0 %v9673_v60  ;;  %7374 = vmatpush3.msra.mxu1 %v6313_v51  ;;  %v6310_v60 = vld [vmem:[%s10300_s3 + $0x338] sm:$0xff]  ;;  %v6303_v51 = vld [vmem:[%s10300_s3 + $0x300] sm:$0xff] }
 0x274   :  { %7432 = vmatpush3.msra.mxu0 %v6328_v40  ;;  %7375 = vmatprep.subr.mxu1 %v6312_v50  ;;  %v6350_v40 = vld [vmem:[%s10300_s3 + $0x478] sm:$0xff] }
 0x275   :  { %7433 = vmatprep.subr.mxu0 %v6327_v42  ;;  %7293 = vmatmul.mubr.f32.gmra.mxu1 %v9823_v4 }
 0x276   :  { %7376 = vmatpush3.msra.mxu1 %v6312_v50  ;;  %7434 = vmatpush3.msra.mxu0 %v6327_v42  ;;  %v9909_v50 = vld [vmem:[#allocation3 + $0x90] sm:$0xff]  ;;  %v9911_v42 = vld [vmem:[#allocation3 + $0x98] sm:$0x3] }
 0x277   :  { %7295 = vmatprep.mubr.f32.mxu1 %v9453_v48  ;;  %7352 = vmatmul.mubr.f32.gmra.mxu0 %v9683_v36  ;;  %v6309_v48 = vld [vmem:[%s10300_s3 + $0x330] sm:$0xff] }
 0x278   :  { %7377 = vmatprep.subr.mxu1 %v6311_v21  ;;  %7435 = vmatprep.subr.mxu0 %v6326_v54 }
 0x279   :  { %7354 = vmatprep.mubr.f32.mxu0 %v9699_v47  ;;  %7378 = vmatpush3.msra.mxu1 %v6311_v21  ;;  %v7552_v21 = vld [vmem:[#allocation3 + $0x40] sm:$0xff] }
 0x27a   :  { %7436 = vmatpush3.msra.mxu0 %v6326_v54  ;;  %7379 = vmatprep.subr.mxu1 %v6310_v60  ;;  %v5502_v54 = vrot.slane %v9909_v50, 1 }
 0x27b   :  { %7437 = vmatprep.subr.mxu0 %v6325_v13  ;;  %7296 = vmatmul.mubr.f32.gmra.mxu1 %v9471_v32 }
 0x27c   :  { %7380 = vmatpush3.msra.mxu1 %v6310_v60  ;;  %7438 = vmatpush3.msra.mxu0 %v6325_v13  ;;  %v5503_v60 = vrot.slane %v9911_v42, 1  ;;  %v7553_v13 = vld [vmem:[#allocation3 + $0x50] sm:$0xff] }
 0x27d   :  { %7298 = vmatprep.mubr.f32.mxu1 %v9486_v43  ;;  %7355 = vmatmul.mubr.f32.gmra.mxu0 %v9709_v37 }
 0x27e   :  { %7381 = vmatprep.subr.mxu1 %v6309_v48  ;;  %7439 = vmatprep.subr.mxu0 %v6324_v45 }
 0x27f   :  { %7357 = vmatprep.mubr.f32.mxu0 %v9725_v2  ;;  %7382 = vmatpush3.msra.mxu1 %v6309_v48  ;;  %v7554_v48 = vld [vmem:[#allocation3 + $0x60] sm:$0xff] }
 0x280   :  { %7440 = vmatpush3.msra.mxu0 %v6324_v45  ;;  %7383 = vmatprep.subr.mxu1 %v6308_v3  ;;  %v6345_v45 = vld [vmem:[%s10300_s3 + $0x450] sm:$0xff] }
 0x281   :  { %7441 = vmatprep.subr.mxu0 %v6323_v14  ;;  %7299 = vmatmul.mubr.f32.gmra.mxu1 %v9505_v6 }
 0x282   :  { %7384 = vmatpush3.msra.mxu1 %v6308_v3  ;;  %7442 = vmatpush3.msra.mxu0 %v6323_v14 }
 0x283   :  { %7301 = vmatprep.mubr.f32.mxu1 %v9520_v10  ;;  %7358 = vmatmul.mubr.f32.gmra.mxu0 %v9735_v20 }
 0x284   :  { %7385 = vmatprep.subr.mxu1 %v6307_v0  ;;  %7443 = vmatprep.subr.mxu0 %v6322_v39 }
 0x285   :  { %7360 = vmatprep.mubr.f32.mxu0 %v9751_v22  ;;  %7386 = vmatpush3.msra.mxu1 %v6307_v0 }
 0x286   :  { %7444 = vmatpush3.msra.mxu0 %v6322_v39  ;;  %7387 = vmatprep.subr.mxu1 %v6306_v46 }
 0x287   :  { %7445 = vmatprep.subr.mxu0 %v6321_v5  ;;  %7302 = vmatmul.mubr.f32.gmra.mxu1 %v9535_v23 }
 0x288   :  { %7388 = vmatpush3.msra.mxu1 %v6306_v46  ;;  %7446 = vmatpush3.msra.mxu0 %v6321_v5 }
 0x289   :  { %7304 = vmatprep.mubr.f32.mxu1 %v9546_v18  ;;  %7361 = vmatmul.mubr.f32.gmra.mxu0 %v9882_v15 }
 0x28a   :  { %7389 = vmatprep.subr.mxu1 %v6305_v41  ;;  %7447 = vmatprep.subr.mxu0 %v6320_v56 }
 0x28b   :  { %7390 = vmatpush3.msra.mxu1 %v6305_v41  ;;  %7448 = vmatpush3.msra.mxu0 %v6320_v56 }
 0x28c   :  { %7451 = vmatprep.mubr.f32.mxu0 %v9318_v11  ;;  %7391 = vmatprep.subr.mxu1 %v6304_v27  ;;  %v6349_v11 = vld [vmem:[%s10300_s3 + $0x470] sm:$0xff] }
 0x28d   :  { %7449 = vmatprep.subr.mxu0 %v6319_v61  ;;  %7305 = vmatmul.mubr.f32.gmra.mxu1 %v9895_v49 }
 0x28e   :  { %7392 = vmatpush3.msra.mxu1 %v6304_v27  ;;  %7450 = vmatpush3.msra.mxu0 %v6319_v61 }
 0x28f   :  { %7393 = vmatprep.subr.mxu1 %v6303_v51  ;;  %7395 = vmatprep.mubr.f32.mxu1 %v7550_v53 }
 0x290   :  { %7452 = vmatmul.mubr.f32.vlgmr.msra.gmra.mxu0 %v9347_v57  ;;  %7394 = vmatpush3.msra.mxu1 %v6303_v51  ;;  %v6348_v57 = vld [vmem:[%s10300_s3 + $0x468] sm:$0xff] }
 0x291   :  { %7454 = vmatprep.mubr.f32.mxu0 %v9369_v28  ;;  %7475 = vmatprep.subr.mxu1 %v6350_v40  ;;  %v6347_v28 = vld [vmem:[%s10300_s3 + $0x460] sm:$0xff] }
 0x292   :  { %7396 = vmatmul.mubr.f32.vlgmr.msra.gmra.mxu1 %v7551_v24 }
 0x293   :  { %7476 = vmatpush3.msra.mxu1 %v6350_v40  ;;  %7398 = vmatprep.mubr.f32.mxu1 %v7552_v21 }
 0x294   :  { %7455 = vmatmul.mubr.f32.gmra.mxu0 %v9387_v1  ;;  %7477 = vmatprep.subr.mxu1 %v6349_v11  ;;  %v6346_v1 = vld [vmem:[%s10300_s3 + $0x458] sm:$0xff] }
 0x295   :  { %7457 = vmatprep.mubr.f32.mxu0 %v9401_v29  ;;  %7478 = vmatpush3.msra.mxu1 %v6349_v11  ;;  %v5504_v29 = vsel %vm2249_vm4, %v5502_v54, %v5503_v60 }
 0x296   :  { %7479 = vmatprep.subr.mxu1 %v6348_v57  ;;  %7399 = vmatmul.mubr.f32.gmra.mxu1 %v7553_v13 }
 0x297   :  { %7480 = vmatpush3.msra.mxu1 %v6348_v57  ;;  %7401 = vmatprep.mubr.f32.mxu1 %v7554_v48 }
 0x298   :  { %7458 = vmatmul.mubr.f32.gmra.mxu0 %v9421_v26  ;;  %7481 = vmatprep.subr.mxu1 %v6347_v28  ;;  %v6344_v26 = vld [vmem:[%s10300_s3 + $0x448] sm:$0xff] }
 0x299   :  { %7460 = vmatprep.mubr.f32.mxu0 %v9823_v4  ;;  %7482 = vmatpush3.msra.mxu1 %v6347_v28  ;;  %v6343_v4 = vld [vmem:[%s10300_s3 + $0x440] sm:$0xff] }
 0x29a   :  { %7483 = vmatprep.subr.mxu1 %v6346_v1  ;;  %7402 = vmatmul.mubr.f32.gmra.mxu1 %v9378_v33  ;;  %v6342_v33 = vld [vmem:[%s10300_s3 + $0x438] sm:$0xff] }
 0x29b   :  { %7484 = vmatpush3.msra.mxu1 %v6346_v1  ;;  %7404 = vmatprep.mubr.f32.mxu1 %v9634_v62  ;;  %v9952_v62 = vld [vmem:[#allocation3 + $0x130] sm:$0xff] }
 0x29c   :  { %7461 = vmatmul.mubr.f32.gmra.mxu0 %v5504_v29  ;;  %7485 = vmatprep.subr.mxu1 %v6345_v45 }
 0x29d   :  { %7463 = vmatprep.mubr.f32.mxu0 %v9471_v32  ;;  %7486 = vmatpush3.msra.mxu1 %v6345_v45  ;;  %v6341_v32 = vld [vmem:[%s10300_s3 + $0x430] sm:$0xff] }
 0x29e   :  { %7487 = vmatprep.subr.mxu1 %v6344_v26  ;;  %7405 = vmatmul.mubr.f32.gmra.mxu1 %v9909_v50 }
 0x29f   :  { %7488 = vmatpush3.msra.mxu1 %v6344_v26  ;;  %7407 = vmatprep.mubr.f32.mxu1 %v9435_v52  ;;  %v9954_v52 = vld [vmem:[#allocation3 + $0x138] sm:$0x3] }
 0x2a0   :  { %7464 = vmatmul.mubr.f32.gmra.mxu0 %v9486_v43  ;;  %7489 = vmatprep.subr.mxu1 %v6343_v4  ;;  %v6340_v43 = vld [vmem:[%s10300_s3 + $0x428] sm:$0xff]  ;;  %v5506_v3 = vrot.slane %v9954_v52, 1 }
 0x2a1   :  { %7466 = vmatprep.mubr.f32.mxu0 %v9505_v6  ;;  %7490 = vmatpush3.msra.mxu1 %v6343_v4  ;;  %v5505_v6 = vrot.slane %v9952_v62, 1 }
 0x2a2   :  { %7491 = vmatprep.subr.mxu1 %v6342_v33  ;;  %7408 = vmatmul.mubr.f32.gmra.mxu1 %v9444_v19  ;;  %v6339_v19 = vld [vmem:[%s10300_s3 + $0x420] sm:$0xff] }
 0x2a3   :  { %7492 = vmatpush3.msra.mxu1 %v6342_v33  ;;  %7410 = vmatprep.mubr.f32.mxu1 %v9466_v12  ;;  %v6338_v12 = vld [vmem:[%s10300_s3 + $0x418] sm:$0xff] }
 0x2a4   :  { %7467 = vmatmul.mubr.f32.gmra.mxu0 %v9520_v10  ;;  %7493 = vmatprep.subr.mxu1 %v6341_v32  ;;  %v6337_v10 = vld [vmem:[%s10300_s3 + $0x410] sm:$0xff] }
 0x2a5   :  { %7469 = vmatprep.mubr.f32.mxu0 %v9535_v23  ;;  %7494 = vmatpush3.msra.mxu1 %v6341_v32  ;;  %v5507_v23 = vsel %vm2249_vm4, %v5505_v6, %v5506_v3 }
 0x2a6   :  { %7495 = vmatprep.subr.mxu1 %v6340_v43  ;;  %7411 = vmatmul.mubr.f32.gmra.mxu1 %v9478_v16  ;;  %v6336_v16 = vld [vmem:[%s10300_s3 + $0x408] sm:$0xff] }
 0x2a7   :  { %7496 = vmatpush3.msra.mxu1 %v6340_v43  ;;  %7413 = vmatprep.mubr.f32.mxu1 %v9500_v31  ;;  %v6335_v31 = vld [vmem:[%s10300_s3 + $0x400] sm:$0xff] }
 0x2a8   :  { %7470 = vmatmul.mubr.f32.gmra.mxu0 %v9546_v18  ;;  %7497 = vmatprep.subr.mxu1 %v6339_v19  ;;  %v5689_v18 = vrot.slane %v9911_v42, 2 }
 0x2a9   :  { %7472 = vmatprep.mubr.f32.mxu0 %v9895_v49  ;;  %7498 = vmatpush3.msra.mxu1 %v6339_v19 }
 0x2aa   :  { %7499 = vmatprep.subr.mxu1 %v6338_v12  ;;  %7414 = vmatmul.mubr.f32.gmra.mxu1 %v9512_v7  ;;  %v5688_v7 = vrot.slane %v9909_v50, 2 }
 0x2ab   :  { %7500 = vmatpush3.msra.mxu1 %v6338_v12  ;;  %7416 = vmatprep.mubr.f32.mxu1 %v9737_v44 }
 0x2ac   :  { %7501 = vmatprep.subr.mxu1 %v6337_v10  ;;  %7473 = vmatmul.mubr.f32.gmra.mxu0 %v5507_v23 }
 0x2ad   :  { %7502 = vmatpush3.msra.mxu1 %v6337_v10 }
 0x2ae   :  { %7503 = vmatprep.subr.mxu1 %v6336_v16  ;;  %7417 = vmatmul.mubr.f32.gmra.mxu1 %v9952_v62 }
 0x2af   :  { %7504 = vmatpush3.msra.mxu1 %v6336_v16  ;;  %7507 = vmatprep.mubr.f32.mxu1 %v9580_v55  ;;  %v5690_v55 = vsel %vm2661_vm12, %v5688_v7, %v5689_v18 }
 0x2b0   :  { %7505 = vmatprep.subr.mxu1 %v6335_v31 }
 0x2b1   :  { %7506 = vmatpush3.msra.mxu1 %v6335_v31 }
 0x2b2   :  { %7508 = vmatmul.mubr.f32.vlgmr.msra.gmra.mxu1 %v9596_v58 }
 0x2b3   :  { %7510 = vmatprep.mubr.f32.mxu1 %v9606_v9 }
 0x2b6   :  { %7511 = vmatmul.mubr.f32.gmra.mxu1 %v9622_v35 }
 0x2b7   :  { %7513 = vmatprep.mubr.f32.mxu1 %v9632_v17 }
 0x2ba   :  { %7514 = vmatmul.mubr.f32.gmra.mxu1 %v9650_v30  ;;  %v5691_v30 = vrot.slane %v9952_v62, 2 }
 0x2bb   :  { %7516 = vmatprep.mubr.f32.mxu1 %v9810_v38  ;;  %v5692_v38 = vrot.slane %v9954_v52, 2 }
 0x2be   :  { %7517 = vmatmul.mubr.f32.gmra.mxu1 %v5690_v55 }
 0x2bf   :  { %7519 = vmatprep.mubr.f32.mxu1 %v9683_v36 }
 0x2c0   :  { %v7117_v58 = vpop.f32.mrf.mxu0 }
 0x2c2   :  { %7520 = vmatmul.mubr.f32.gmra.mxu1 %v9699_v47  ;;  %v4445_v9 = vpop.f32.mrf.mxu0 }
 0x2c3   :  { %7522 = vmatprep.mubr.f32.mxu1 %v9709_v37  ;;  %v5693_v37 = vsel %vm2661_vm12, %v5691_v30, %v5692_v38 }
 0x2c4   :  { %v7061_v35 = vpop.f32.mrf.mxu1  ;;  %v7120_v17 = vpop.f32.mrf.mxu0 }
 0x2c5   :  { %v4451_v44 = vadd.f32 %v7117_v58, %v7061_v35 }
 0x2c6   :  { %7523 = vmatmul.mubr.f32.gmra.mxu1 %v9725_v2  ;;  %v4300_v14 = vpop.f32.mrf.mxu1  ;;  %v4455_v36 = vpop.f32.mrf.mxu0 }
 0x2c7   :  { %7525 = vmatprep.mubr.f32.mxu1 %v9735_v20  ;;  %v4446_v0 = vadd.f32 %v4445_v9, %v4300_v14 }
 0x2c9   :  { %v7064_v39 = vpop.f32.mrf.mxu1 }
 0x2ca   :  { %7526 = vmatmul.mubr.f32.gmra.mxu1 %v9751_v22  ;;  %v4461_v47 = vadd.f32 %v7120_v17, %v7064_v39 }
 0x2cb   :  { %7528 = vmatprep.mubr.f32.mxu1 %v9882_v15  ;;  %v7123_v8 = vpop.f32.mrf.mxu0  ;;  %v4310_v46 = vpop.f32.mrf.mxu1 }
 0x2cc   :  { %v4456_v2 = vadd.f32 %v4455_v36, %v4310_v46 }
 0x2cd   :  { %v4465_v34 = vpop.f32.mrf.mxu0 }
 0x2ce   :  { %7529 = vmatmul.mubr.f32.gmra.mxu1 %v5693_v37 }
 0x2cf   :  { %v7067_v5 = vpop.f32.mrf.mxu1 }
 0x2d0   :  { %v4471_v63 = vadd.f32 %v7123_v8, %v7067_v5 }
 0x2d1   :  { %v7126_v20 = vpop.f32.mrf.mxu0  ;;  %v4320_v41 = vpop.f32.mrf.mxu1 }
 0x2d2   :  { %v4466_v56 = vadd.f32 %v4465_v34, %v4320_v41 }
 0x2d3   :  { %v4475_v59 = vpop.f32.mrf.mxu0 }
 0x2d5   :  { %v7070_v25 = vpop.f32.mrf.mxu1 }
 0x2d6   :  { %v4481_v27 = vadd.f32 %v7126_v20, %v7070_v25 }
 0x2d7   :  { %v7129_v61 = vpop.f32.mrf.mxu0  ;;  %v4330_v22 = vpop.f32.mrf.mxu1 }
 0x2d8   :  { %v4476_v49 = vadd.f32 %v4475_v59, %v4330_v22 }
 0x2d9   :  { %v4485_v51 = vpop.f32.mrf.mxu0 }
 0x2db   :  { %v7073_v15 = vpop.f32.mrf.mxu1 }
 0x2dc   :  { %v4491_v40 = vadd.f32 %v7129_v61, %v7073_v15 }
 0x2dd   :  { %v7132_v53 = vpop.f32.mrf.mxu0  ;;  %v4340_v11 = vpop.f32.mrf.mxu1 }
 0x2de   :  { %v4486_v24 = vadd.f32 %v4485_v51, %v4340_v11 }
 0x2df   :  { %v4495_v50 = vpop.f32.mrf.mxu0 }
 0x2e1   :  { %v7076_v42 = vpop.f32.mrf.mxu1 }
 0x2e2   :  { %v4501_v21 = vadd.f32 %v7132_v53, %v7076_v42 }
 0x2e3   :  { %v7135_v57 = vpop.f32.mrf.mxu0  ;;  %v4350_v28 = vpop.f32.mrf.mxu1 }
 0x2e4   :  { %v4496_v54 = vadd.f32 %v4495_v50, %v4350_v28 }
 0x2e5   :  { %v4505_v60 = vpop.f32.mrf.mxu0 }
 0x2e7   :  { %v7079_v13 = vpop.f32.mrf.mxu1 }
 0x2e8   :  { %v4511_v48 = vadd.f32 %v7135_v57, %v7079_v13 }
 0x2e9   :  { %v7138_v1 = vpop.f32.mrf.mxu0  ;;  %v4360_v29 = vpop.f32.mrf.mxu1 }
 0x2ea   :  { %v4506_v45 = vadd.f32 %v4505_v60, %v4360_v29 }
 0x2eb   :  { %v4515_v26 = vpop.f32.mrf.mxu0 }
 0x2ed   :  { %v7082_v4 = vpop.f32.mrf.mxu1 }
 0x2ee   :  { %v4521_v33 = vadd.f32 %v7138_v1, %v7082_v4 }
 0x2ef   :  { %v10007_v32 = vpop.f32.mrf.mxu0  ;;  %v4370_v62 = vpop.f32.mrf.mxu1 }
 0x2f0   :  { %v4516_v52 = vadd.f32 %v4515_v26, %v4370_v62 }
 0x2f1   :  { %v10009_v43 = vpop.f32.mrf.mxu0 }
 0x2f3   :  { %v7173_v19 = vpop.f32.mrf.mxu1 }
 0x2f4   :  { %v10011_v6 = vadd.f32 %v7173_v19, %v4451_v44 }
 0x2f5   :  { %v10013_v3 = vpop.f32.mrf.mxu0  ;;  %v4671_v12 = vpop.f32.mrf.mxu1 }
 0x2f6   :  { %v10015_v10 = vadd.f32 %v4671_v12, %v4446_v0 }
 0x2f7   :  { %v10017_v23 = vpop.f32.mrf.mxu0 }
 0x2f9   :  { %v7176_v16 = vpop.f32.mrf.mxu1 }
 0x2fa   :  { %v10019_v31 = vadd.f32 %v7176_v16, %v4461_v47 }
 0x2fb   :  { %v10021_v7 = vpop.f32.mrf.mxu0  ;;  %v4681_v18 = vpop.f32.mrf.mxu1 }
 0x2fc   :  { %v10023_v55 = vadd.f32 %v4681_v18, %v4456_v2 }
 0x2fd   :  { %v10025_v58 = vpop.f32.mrf.mxu0 }
 0x2ff   :  { %v7179_v9 = vpop.f32.mrf.mxu1 }
 0x300   :  { %v10027_v35 = vadd.f32 %v7179_v9, %v4471_v63 }
 0x301   :  { %v10029_v17 = vpop.f32.mrf.mxu0  ;;  %v4691_v44 = vpop.f32.mrf.mxu1 }
 0x302   :  { %v10031_v14 = vadd.f32 %v4691_v44, %v4466_v56 }
 0x303   :  { %v10033_v30 = vpop.f32.mrf.mxu0 }
 0x305   :  { %v7182_v38 = vpop.f32.mrf.mxu1 }
 0x306   :  { %v10035_v0 = vadd.f32 %v7182_v38, %v4481_v27 }
 0x307   :  { %v10037_v36 = vpop.f32.mrf.mxu0  ;;  %v4701_v39 = vpop.f32.mrf.mxu1 }
 0x308   :  { %v10039_v47 = vadd.f32 %v4701_v39, %v4476_v49 }
 0x309   :  { %v10041_v37 = vpop.f32.mrf.mxu0 }
 0x30b   :  { %v7185_v8 = vpop.f32.mrf.mxu1 }
 0x30c   :  { %v10043_v46 = vadd.f32 %v7185_v8, %v4491_v40 }
 0x30d   :  { %v10045_v2 = vpop.f32.mrf.mxu0  ;;  %v4711_v34 = vpop.f32.mrf.mxu1 }
 0x30e   :  { %v10047_v5 = vadd.f32 %v4711_v34, %v4486_v24 }
 0x30f   :  { %v10049_v63 = vpop.f32.mrf.mxu0 }
 0x310   :  { %10417 = vst [vmem:[#allocation6_spill] sm:$0xff] %v10049_v63  ;;  %v4931_v63 = vadd.f32 %v10013_v3, %v10019_v31  ;;  %v4932_v3 = vadd.f32 %v10025_v58, %v10031_v14  ;;  %v4934_v58 = vadd.f32 %v10033_v30, %v10039_v47 }
 0x311   :  { %v7188_v20 = vpop.f32.mrf.mxu1 }
 0x312   :  { %v10051_v41 = vadd.f32 %v7188_v20, %v4501_v21 }
 0x313   :  { %v10053_v56 = vpop.f32.mrf.mxu0  ;;  %v4721_v59 = vpop.f32.mrf.mxu1 }
 0x314   :  { %10418 = vst [vmem:[#allocation15_spill] sm:$0xff] %v10053_v56  ;;  %v10055_v25 = vadd.f32 %v4721_v59, %v4496_v54 }
 0x315   :  { %v10057_v27 = vpop.f32.mrf.mxu0 }
 0x316   :  { %10419 = vst [vmem:[#allocation16_spill] sm:$0xff] %v10055_v25  ;;  %10420 = vst [vmem:[#allocation8_spill] sm:$0xff] %v10057_v27 }
 0x317   :  { %v7191_v61 = vpop.f32.mrf.mxu1 }
 0x318   :  { %v10059_v22 = vadd.f32 %v7191_v61, %v4511_v48 }
 0x319   :  { %v10061_v49 = vpop.f32.mrf.mxu0  ;;  %v4731_v51 = vpop.f32.mrf.mxu1 }
 0x31a   :  { %10421 = vst [vmem:[#allocation7_spill] sm:$0xff] %v10059_v22  ;;  %10422 = vst [vmem:[#allocation37_spill] sm:$0xff] %v10061_v49  ;;  %v10063_v15 = vadd.f32 %v4731_v51, %v4506_v45 }
 0x31b   :  { %v10065_v40 = vpop.f32.mrf.mxu0 }
 0x31c   :  { %10423 = vst [vmem:[#allocation38_spill] sm:$0xff] %v10063_v15  ;;  %10424 = vst [vmem:[#allocation17_spill] sm:$0xff] %v10065_v40 }
 0x31d   :  { %v7194_v53 = vpop.f32.mrf.mxu1 }
 0x31e   :  { %v10067_v11 = vadd.f32 %v7194_v53, %v4521_v33 }
 0x31f   :  { %v4741_v24 = vpop.f32.mrf.mxu1 }
 0x320   :  { %10425 = vst [vmem:[#allocation18_spill] sm:$0xff] %v10067_v11  ;;  %v7341_v50 = vpop.f32.mrf.mxu0  ;;  %v10069_v42 = vadd.f32 %v4741_v24, %v4516_v52 }
 0x322   :  { %10426 = vst [vmem:[#allocation20_spill] sm:$0xff] %v10069_v42  ;;  %v10071_v21 = vpop.f32.mrf.mxu0 }
 0x323   :  { %v7285_v57 = vpop.f32.mrf.mxu1 }
 0x325   :  { %v10073_v28 = vpop.f32.mrf.mxu0  ;;  %v5039_v54 = vpop.f32.mrf.mxu1 }
 0x327   :  { %v10075_v60 = vpop.f32.mrf.mxu0 }
 0x329   :  { %v7288_v13 = vpop.f32.mrf.mxu1 }
 0x32a   :  { %v5121_v25 = vadd.f32 %v7288_v13, %v4931_v63 }
 0x32b   :  { %v10077_v48 = vpop.f32.mrf.mxu0  ;;  %v5049_v1 = vpop.f32.mrf.mxu1 }
 0x32d   :  { %v10079_v29 = vpop.f32.mrf.mxu0 }
 0x32f   :  { %v7291_v45 = vpop.f32.mrf.mxu1 }
 0x331   :  { %v10081_v26 = vpop.f32.mrf.mxu0  ;;  %v5059_v4 = vpop.f32.mrf.mxu1 }
 0x333   :  { %v10083_v33 = vpop.f32.mrf.mxu0 }
 0x335   :  { %v10085_v62 = vpop.f32.mrf.mxu1 }
 0x337   :  { %v10087_v52 = vpop.f32.mrf.mxu0  ;;  %v10089_v19 = vpop.f32.mrf.mxu1 }
 0x338   :  { %10427 = vst [vmem:[#allocation40_spill] sm:$0xff] %v10087_v52 }
 0x339   :  { %v10091_v12 = vpop.f32.mrf.mxu0 }
 0x33a   :  { %10428 = vst [vmem:[#allocation9_spill] sm:$0xff] %v10091_v12 }
 0x33b   :  { %v10093_v16 = vpop.f32.mrf.mxu1 }
 0x33d   :  { %v10095_v18 = vpop.f32.mrf.mxu0  ;;  %v10097_v9 = vpop.f32.mrf.mxu1 }
 0x33e   :  { %10429 = vst [vmem:[#allocation39_spill] sm:$0xff] %v10095_v18 }
 0x33f   :  { %v10099_v44 = vpop.f32.mrf.mxu0 }
 0x340   :  { %10430 = vst [vmem:[#allocation11_spill] sm:$0xff] %v10099_v44 }
 0x341   :  { %v10101_v38 = vpop.f32.mrf.mxu1 }
 0x343   :  { %v10103_v39 = vpop.f32.mrf.mxu0  ;;  %v10105_v8 = vpop.f32.mrf.mxu1 }
 0x344   :  { %10431 = vst [vmem:[#allocation10_spill] sm:$0xff] %v10103_v39  ;;  %10432 = vst [vmem:[#allocation12_spill] sm:$0xff] %v10105_v8  ;;  %v4928_v8 = vadd.f32 %v10009_v43, %v10015_v10 }
 0x345   :  { %v10107_v34 = vpop.f32.mrf.mxu0 }
 0x346   :  { %10433 = vst [vmem:[#allocation19_spill] sm:$0xff] %v10107_v34 }
 0x347   :  { %v10109_v20 = vpop.f32.mrf.mxu1 }
 0x348   :  { %10434 = vst [vmem:[#allocation41_spill] sm:$0xff] %v10109_v20  ;;  %v4929_v20 = vadd.f32 %v10007_v32, %v10011_v6  ;;  %v4930_v32 = vadd.f32 %v10017_v23, %v10023_v55  ;;  %v5307_v23 = vadd.f32 %v10073_v28, %v5121_v25  ;;  %v5122_v55 = vadd.f32 %v5059_v4, %v4932_v3 }
 0x349   :  { %v10111_v59 = vpop.f32.mrf.mxu1  ;;  %v10113_v61 = vpop.f32.mrf.mxu0 }
 0x34a   :  { %10435 = vst [vmem:[#allocation21_spill] sm:$0xff] %v10111_v59  ;;  %10436 = vst [vmem:[#allocation22_spill] sm:$0xff] %v10113_v61  ;;  %v5119_v22 = vadd.f32 %v7285_v57, %v4929_v20  ;;  %v4933_v57 = vadd.f32 %v10021_v7, %v10027_v35  ;;  %v5120_v43 = vadd.f32 %v5049_v1, %v4930_v32 }
 0x34b   :  { %v10117_v53 = vpop.f32.mrf.mxu0  ;;  %v4935_v7 = vadd.f32 %v10029_v17, %v10035_v0  ;;  %v10177_v17 = vld [vmem:[%s10302_s4] ss:$0 sm:$0xff]  ;;  %v5308_v30 = vadd.f32 %v10079_v29, %v5122_v55 }
 0x34c   :  { %10438 = vst [vmem:[#allocation43_spill] sm:$0xff] %v10117_v53  ;;  %v5305_v6 = vadd.f32 %v7341_v50, %v5119_v22  ;;  %v5306_v50 = vadd.f32 %v10075_v60, %v5120_v43  ;;  %v4937_v60 = vadd.f32 %v10037_v36, %v10043_v46  ;;  %v10443_v43 = vld [vmem:[#allocation16_spill] sm:$0xff] }
 0x34d   :  { %v10115_v51 = vpop.f32.mrf.mxu1 }
 0x34e   :  { %10437 = vst [vmem:[#allocation23_spill] sm:$0xff] %v10115_v51 }
 0x34f   :  { %v10119_v24 = vpop.f32.mrf.mxu1 }
 0x350   :  { %10439 = vst [vmem:[#allocation42_spill] sm:$0xff] %v10119_v24  ;;  %v7453_v40 = vpop.f32.mrf.mxu0 }
 0x352   :  { %v7397_v42 = vpop.f32.mrf.mxu1  ;;  %v5593_v39 = vpop.f32.mrf.mxu0 }
 0x353   :  { %v5483_v10 = vadd.f32 %v7397_v42, %v5305_v6 }
 0x354   :  { %v5403_v44 = vpop.f32.mrf.mxu1  ;;  %v7456_v18 = vpop.f32.mrf.mxu0 }
 0x355   :  { %v5673_v42 = vadd.f32 %v7453_v40, %v5483_v10  ;;  %v5124_v40 = vadd.f32 %v10089_v19, %v4934_v58  ;;  %v10444_v10 = vld [vmem:[#allocation6_spill] sm:$0xff] }
 0x356   :  { %v7400_v49 = vpop.f32.mrf.mxu1  ;;  %v10121_v15 = vpop.f32.mrf.mxu0 }
 0x357   :  { %v5485_v22 = vadd.f32 %v7400_v49, %v5307_v23 }
 0x358   :  { %v5413_v11 = vpop.f32.mrf.mxu1  ;;  %v10127_v51 = vpop.f32.mrf.mxu0 }
 0x359   :  { %v5484_v0 = vadd.f32 %v5413_v11, %v5306_v50  ;;  %v4936_v11 = vadd.f32 %v10041_v37, %v10047_v5  ;;  %v10449_v50 = vld [vmem:[#allocation15_spill] sm:$0xff] }
 0x35a   :  { %v7403_v34 = vpop.f32.mrf.mxu1  ;;  %v10135_v12 = vpop.f32.mrf.mxu0 }
 0x35b   :  { %v5126_v6 = vadd.f32 %v10097_v9, %v4936_v11  ;;  %v10456_v11 = vld [vmem:[#allocation39_spill] sm:$0xff] }
 0x35c   :  { %v5423_v27 = vpop.f32.mrf.mxu1 }
 0x35e   :  { %v10123_v59 = vpop.f32.mrf.mxu1 }
 0x360   :  { %v10125_v61 = vpop.f32.mrf.mxu1 }
 0x361   :  { %10440 = vst [vmem:[#allocation24_spill] sm:$0xff] %v10125_v61  ;;  %v5118_v61 = vadd.f32 %v5039_v54, %v4928_v8  ;;  %v5123_v8 = vadd.f32 %v7291_v45, %v4933_v57 }
 0x362   :  { %v10129_v53 = vpop.f32.mrf.mxu1 }
 0x363   :  { %10441 = vst [vmem:[#allocation26_spill] sm:$0xff] %v10129_v53  ;;  %v10145_v53 = vpop.f32.mrf.mxu0  ;;  %v5304_v54 = vadd.f32 %v10071_v21, %v5118_v61  ;;  %v5125_v21 = vadd.f32 %v10085_v62, %v4935_v7  ;;  %v5309_v14 = vadd.f32 %v10077_v48, %v5123_v8  ;;  %v5675_v62 = vadd.f32 %v7456_v18, %v5485_v22  ;;  %v10448_v22 = vld [vmem:[#allocation7_spill] sm:$0xff] }
 0x364   :  { %v10131_v24 = vpop.f32.mrf.mxu1  ;;  %v5486_v61 = vadd.f32 %v5423_v27, %v5308_v30  ;;  %v5310_v18 = vadd.f32 %v10083_v33, %v5124_v40  ;;  %v10453_v30 = vld [vmem:[#allocation38_spill] sm:$0xff] }
 0x365   :  { %10442 = vst [vmem:[#allocation28_spill] sm:$0xff] %v10131_v24  ;;  %v10158_v31 = vpop.f32.mrf.mxu0  ;;  %v5482_v13 = vadd.f32 %v5403_v44, %v5304_v54  ;;  %v5487_v45 = vadd.f32 %v7403_v34, %v5309_v14  ;;  %v5127_v44 = vadd.f32 %v10093_v16, %v4937_v60  ;;  %v5674_v34 = vadd.f32 %v10121_v15, %v5484_v0  ;;  %v10451_v14 = vld [vmem:[#allocation9_spill] sm:$0xff] }
 0x366   :  { %v10137_v56 = vpop.f32.mrf.mxu1  ;;  %v4939_v16 = vadd.f32 %v10045_v2, %v10051_v41  ;;  %v4938_v2 = vadd.f32 %v10444_v10, %v10443_v43  ;;  %v10445_v41 = vld [vmem:[#allocation40_spill] sm:$0xff]  ;;  %v10452_v60 = vld [vmem:[#allocation41_spill] sm:$0xff]  ;;  %v10461_v43 = vld [vmem:[#allocation23_spill] sm:$0xff] }
 0x367   :  { %v10172_v1 = vpop.f32.mrf.mxu0  ;;  %v5672_v28 = vadd.f32 %v5593_v39, %v5482_v13  ;;  %v5311_v39 = vadd.f32 %v10081_v26, %v5125_v21  ;;  %v5677_v5 = vadd.f32 %v10127_v51, %v5487_v45  ;;  %v5313_v33 = vadd.f32 %v10445_v41, %v5127_v44  ;;  %v10463_v41 = vld [vmem:[#allocation17_spill] sm:$0xff] }
 0x368   :  { %v10141_v52 = vpop.f32.mrf.mxu1  ;;  %v5129_v9 = vadd.f32 %v10101_v38, %v4939_v16  ;;  %v5676_v51 = vadd.f32 %v10135_v12, %v5486_v61  ;;  %v10447_v38 = vld [vmem:[#allocation12_spill] sm:$0xff]  ;;  %v10459_v16 = vld [vmem:[#allocation37_spill] sm:$0xff] }
 0x369   :  { %v10188_v19 = vpop.f32.mrf.mxu0  ;;  %v5489_v27 = vadd.f32 %v10123_v59, %v5311_v39  ;;  %v10446_v59 = vld [vmem:[#allocation24_spill] sm:$0xff]  ;;  %v5128_v7 = vadd.f32 %v10447_v38, %v4938_v2  ;;  %v10465_v38 = vld [vmem:[#allocation42_spill] sm:$0xff] }
 0x36a   :  { %v10147_v24 = vpop.f32.mrf.mxu1  ;;  %v5488_v3 = vadd.f32 %v10446_v59, %v5310_v18  ;;  %v10450_v21 = vld [vmem:[#allocation26_spill] sm:$0xff]  ;;  %v5315_v61 = vadd.f32 %v10456_v11, %v5129_v9  ;;  %v10462_v2 = vld [vmem:[#allocation20_spill] sm:$0xff] }
 0x36b   :  { %v7468_v54 = vpop.f32.mrf.mxu0  ;;  %v5491_v58 = vadd.f32 %v10450_v21, %v5313_v33  ;;  %v5679_v40 = vadd.f32 %v10145_v53, %v5489_v27  ;;  %v4942_v33 = vadd.f32 %v10463_v41, %v10462_v2 }
 0x36c   :  { %v10153_v20 = vpop.f32.mrf.mxu1  ;;  %v5678_v53 = vadd.f32 %v10158_v31, %v5488_v3 }
 0x36d   :  { %v5643_v44 = vpop.f32.mrf.mxu0 }
 0x36e   :  { %v10160_v63 = vpop.f32.mrf.mxu1 }
 0x370   :  { %v10165_v35 = vpop.f32.mrf.mxu1 }
 0x372   :  { %v7509_v25 = vpop.f32.mrf.mxu1 }
 0x373   :  { %v5859_v49 = vadd.f32 %v7509_v25, %v5673_v42  ;;  %v4941_v42 = vadd.f32 %v10449_v50, %v10448_v22  ;;  %v5312_v25 = vadd.f32 %v10451_v14, %v5126_v6  ;;  %v10458_v6 = vld [vmem:[#allocation18_spill] sm:$0xff]  ;;  %v10466_v50 = vld [vmem:[#allocation19_spill] sm:$0xff] }
 0x374   :  { %v5779_v47 = vpop.f32.mrf.mxu1  ;;  %v4943_v18 = vadd.f32 %v10459_v16, %v10458_v6 }
 0x375   :  { %v5882_v48 = vadd.f32 %v10177_v17, %v5859_v49  ;;  %v5858_v4 = vadd.f32 %v5779_v47, %v5672_v28  ;;  %v5131_v45 = vadd.f32 %v10452_v60, %v4941_v42  ;;  %v10454_v47 = vld [vmem:[#allocation8_spill] sm:$0xff] }
 0x376   :  { %v7512_v32 = vpop.f32.mrf.mxu1  ;;  %v5133_v10 = vadd.f32 %v10461_v43, %v4943_v18 }
 0x377   :  { %v5898_v36 = vmax.f32 %v5882_v48, 0.0  ;;  %v5881_v46 = vadd.f32 %v10177_v17, %v5858_v4  ;;  %v5861_v29 = vadd.f32 %v7512_v32, %v5675_v62  ;;  %v4940_v48 = vadd.f32 %v10454_v47, %v10453_v30  ;;  %v10455_v4 = vld [vmem:[#allocation28_spill] sm:$0xff]  ;;  %v10468_v30 = vld [vmem:[#allocation43_spill] sm:$0xff] }
 0x378   :  { %v5789_v37 = vpop.f32.mrf.mxu1  ;;  %v5490_v62 = vadd.f32 %v10455_v4, %v5312_v25 }
 0x379   :  { %5914 = vst [vmem:[%s10303_s5 + $0x8] sm:$0xff] %v5898_v36  ;;  %v5897_v26 = vmax.f32 %v5881_v46, 0.0  ;;  %v5884_v57 = vadd.f32 %v10177_v17, %v5861_v29  ;;  %v5860_v15 = vadd.f32 %v5789_v37, %v5674_v34  ;;  %v10457_v29 = vld [vmem:[#allocation21_spill] sm:$0xff]  ;;  %v10460_v37 = vld [vmem:[#allocation11_spill] sm:$0xff] }
 0x37a   :  { %v7515_v8 = vpop.f32.mrf.mxu1  ;;  %v5130_v34 = vadd.f32 %v10457_v29, %v4940_v48 }
 0x37b   :  { %5913 = vst [vmem:[%s10303_s5] sm:$0xff] %v5897_v26  ;;  %v5900_v13 = vmax.f32 %v5884_v57, 0.0  ;;  %v5883_v23 = vadd.f32 %v10177_v17, %v5860_v15  ;;  %v5863_v55 = vadd.f32 %v7515_v8, %v5677_v5  ;;  %v5314_v5 = vadd.f32 %v10460_v37, %v5128_v7  ;;  %v7471_v8 = vpop.f32.mrf.mxu0 }
 0x37c   :  { %v5799_v12 = vpop.f32.mrf.mxu1  ;;  %v5681_v26 = vadd.f32 %v10172_v1, %v5491_v58  ;;  %v5493_v57 = vadd.f32 %v10137_v56, %v5315_v61  ;;  %v5680_v1 = vadd.f32 %v10188_v19, %v5490_v62  ;;  %v5132_v7 = vadd.f32 %v10465_v38, %v4942_v33 }
 0x37d   :  { %5916 = vst [vmem:[%s10303_s5 + $0x18] sm:$0xff] %v5900_v13  ;;  %v5899_v0 = vmax.f32 %v5883_v23, 0.0  ;;  %v5886_v49 = vadd.f32 %v10177_v17, %v5863_v55  ;;  %v5862_v28 = vadd.f32 %v5799_v12, %v5676_v51  ;;  %v10464_v51 = vld [vmem:[#allocation10_spill] sm:$0xff]  ;;  %v5492_v56 = vadd.f32 %v10141_v52, %v5314_v5  ;;  %v5653_v25 = vpop.f32.mrf.mxu0 }
 0x37e   :  { %v7518_v39 = vpop.f32.mrf.mxu1  ;;  %v5317_v59 = vadd.f32 %v10464_v51, %v5131_v45  ;;  %v5316_v42 = vadd.f32 %v10466_v50, %v5130_v34  ;;  %v5683_v14 = vadd.f32 %v7468_v54, %v5493_v57  ;;  %v5318_v47 = vadd.f32 %v10468_v30, %v5132_v7 }
 0x37f   :  { %5915 = vst [vmem:[%s10303_s5 + $0x10] sm:$0xff] %v5899_v0  ;;  %v5902_v32 = vmax.f32 %v5886_v49, 0.0  ;;  %v5885_v36 = vadd.f32 %v10177_v17, %v5862_v28  ;;  %v5865_v46 = vadd.f32 %v7518_v39, %v5679_v40  ;;  %v10467_v0 = vld [vmem:[#allocation22_spill] sm:$0xff]  ;;  %v5682_v45 = vadd.f32 %v5643_v44, %v5492_v56  ;;  %v7474_v48 = vpop.f32.mrf.mxu0 }
 0x380   :  { %v5809_v27 = vpop.f32.mrf.mxu1  ;;  %v5495_v22 = vadd.f32 %v10147_v24, %v5317_v59  ;;  %v5494_v12 = vadd.f32 %v10153_v20, %v5316_v42  ;;  %v5319_v49 = vadd.f32 %v10467_v0, %v5133_v10 }
 0x381   :  { %5918 = vst [vmem:[%s10303_s5 + $0x28] sm:$0xff] %v5902_v32  ;;  %v5901_v15 = vmax.f32 %v5885_v36, 0.0  ;;  %v5888_v9 = vadd.f32 %v10177_v17, %v5865_v46  ;;  %v5864_v31 = vadd.f32 %v5809_v27, %v5678_v53  ;;  %v5496_v36 = vadd.f32 %v10165_v35, %v5318_v47  ;;  %v5663_v53 = vpop.f32.mrf.mxu0 }
 0x382   :  { %v7521_v3 = vpop.f32.mrf.mxu1  ;;  %v5685_v54 = vadd.f32 %v7471_v8, %v5495_v22  ;;  %v5497_v62 = vadd.f32 %v10160_v63, %v5319_v49  ;;  %v5684_v32 = vadd.f32 %v5653_v25, %v5494_v12 }
 0x383   :  { %5917 = vst [vmem:[%s10303_s5 + $0x20] sm:$0xff] %v5901_v15  ;;  %v5904_v13 = vmax.f32 %v5888_v9, 0.0  ;;  %v5887_v23 = vadd.f32 %v10177_v17, %v5864_v31  ;;  %v5867_v55 = vadd.f32 %v7521_v3, %v5681_v26  ;;  %v5686_v37 = vadd.f32 %v5663_v53, %v5496_v36 }
 0x384   :  { %v5819_v21 = vpop.f32.mrf.mxu1  ;;  %v5687_v34 = vadd.f32 %v7474_v48, %v5497_v62 }
 0x385   :  { %5920 = vst [vmem:[%s10303_s5 + $0x38] sm:$0xff] %v5904_v13  ;;  %v5903_v52 = vmax.f32 %v5887_v23, 0.0  ;;  %v5890_v19 = vadd.f32 %v10177_v17, %v5867_v55  ;;  %v5866_v58 = vadd.f32 %v5819_v21, %v5680_v1 }
 0x386   :  { %v7524_v28 = vpop.f32.mrf.mxu1 }
 0x387   :  { %5919 = vst [vmem:[%s10303_s5 + $0x30] sm:$0xff] %v5903_v52  ;;  %v5906_v24 = vmax.f32 %v5890_v19, 0.0  ;;  %v5889_v40 = vadd.f32 %v10177_v17, %v5866_v58  ;;  %v5869_v60 = vadd.f32 %v7524_v28, %v5683_v14 }
 0x388   :  { %v5829_v4 = vpop.f32.mrf.mxu1 }
 0x389   :  { %5922 = vst [vmem:[%s10303_s5 + $0x48] sm:$0xff] %v5906_v24  ;;  %v5905_v20 = vmax.f32 %v5889_v40, 0.0  ;;  %v5892_v11 = vadd.f32 %v10177_v17, %v5869_v60  ;;  %v5868_v61 = vadd.f32 %v5829_v4, %v5682_v45 }
 0x38a   :  { %v7527_v39 = vpop.f32.mrf.mxu1 }
 0x38b   :  { %5921 = vst [vmem:[%s10303_s5 + $0x40] sm:$0xff] %v5905_v20  ;;  %v5908_v44 = vmax.f32 %v5892_v11, 0.0  ;;  %v5891_v46 = vadd.f32 %v10177_v17, %v5868_v61  ;;  %v5871_v63 = vadd.f32 %v7527_v39, %v5685_v54 }
 0x38c   :  { %v5839_v29 = vpop.f32.mrf.mxu1 }
 0x38d   :  { %5924 = vst [vmem:[%s10303_s5 + $0x58] sm:$0xff] %v5908_v44  ;;  %v5907_v6 = vmax.f32 %v5891_v46, 0.0  ;;  %v5894_v16 = vadd.f32 %v10177_v17, %v5871_v63  ;;  %v5870_v18 = vadd.f32 %v5839_v29, %v5684_v32 }
 0x38e   :  { %v7530_v35 = vpop.f32.mrf.mxu1 }
 0x38f   :  { %5923 = vst [vmem:[%s10303_s5 + $0x50] sm:$0xff] %v5907_v6  ;;  %v5910_v5 = vmax.f32 %v5894_v16, 0.0  ;;  %v5893_v27 = vadd.f32 %v10177_v17, %v5870_v18  ;;  %v5873_v26 = vadd.f32 %v7530_v35, %v5687_v34 }
 0x390   :  { %v5849_v57 = vpop.f32.mrf.mxu1 }
 0x391   :  { %5926 = vst [vmem:[%s10303_s5 + $0x68] sm:$0xff] %v5910_v5  ;;  %v5909_v15 = vmax.f32 %v5893_v27, 0.0  ;;  %v5896_v9 = vadd.f32 %v10177_v17, %v5873_v26  ;;  %v5872_v31 = vadd.f32 %v5849_v57, %v5686_v37 }
 0x393   :  { %5925 = vst [vmem:[%s10303_s5 + $0x60] sm:$0xff] %v5909_v15  ;;  %v5912_v43 = vmax.f32 %v5896_v9, 0.0  ;;  %v5895_v10 = vadd.f32 %v10177_v17, %v5872_v31 }
 0x395   :  { %5928 = vst [vmem:[%s10303_s5 + $0x78] sm:$0xff] %v5912_v43  ;;  %v5911_v2 = vmax.f32 %v5895_v10, 0.0 }
 0x397   :  { %5927 = vst [vmem:[%s10303_s5 + $0x70] sm:$0xff] %v5911_v2 }

</bundles_post_ra>
